<compile_context>
chip_gen: v6e
topology: v6e:2x2x1
jax: 0.10.0
libtpu: 0.0.40
codegen_flags: <defaults>
</compile_context>

<pallas_src>
import functools

import jax
import jax.numpy as jnp
from jax.experimental import pallas as pl
from jax.experimental.pallas import tpu as pltpu

LN_EPS = 1e-5
FF_DIM = 2048              # PyTorch TransformerDecoderLayer default dim_feedforward
MM_DTYPE = jnp.bfloat16    # MXU operand dtype; accumulation is always f32


def _mm(x, w):
    """x: (N, K); w: (Dout, K) in PyTorch layout (contracted on its last dim).

    The MXU consumes a transposed RHS natively, so no weight transpose is ever
    materialized.  Operands are cast to bf16, accumulation stays f32."""
    return jax.lax.dot_general(
        x.astype(MM_DTYPE), w.astype(MM_DTYPE),
        dimension_numbers=(((1,), (1,)), ((), ())),
        preferred_element_type=jnp.float32)


# ----------------------------------------------------------------------------
# Fused decoder kernel: one grid step == one decoder layer
# ----------------------------------------------------------------------------
def _fused_decoder_kernel(
    # inputs
    tgt_ref, mem_ref,
    sa_wi_ref, sa_bi_ref, sa_wo_ref, sa_bo_ref,
    ca_wi_ref, ca_bi_ref, ca_wo_ref, ca_bo_ref,
    ff_w1_ref, ff_b1_ref, ff_w2_ref, ff_b2_ref,
    ln1_w_ref, ln1_b_ref, ln2_w_ref, ln2_b_ref, ln3_w_ref, ln3_b_ref,
    fc_w_ref, fc_b_ref,
    # outputs
    out_ref,
    # scratch (persist across grid steps)
    x_scr, attn_scr,
    *, n_heads, t_len, batch):
    e = x_scr.shape[1]
    dh = e // n_heads
    scale = 1.0 / float(dh) ** 0.5

    layer = pl.program_id(0)

    @pl.when(layer == 0)
    def _init():
        x_scr[...] = tgt_ref[...]

    x = x_scr[...]                                       # (B*T, E) f32

    def add_ln(res, y, g_ref, b_ref):
        # Post-LN residual: LayerNorm(res + y), biased variance, f32 math.
        z = res + y
        mu = jnp.mean(z, axis=-1, keepdims=True)
        zc = z - mu
        var = jnp.mean(zc * zc, axis=-1, keepdims=True)
        return zc * jax.lax.rsqrt(var + LN_EPS) * g_ref[...] + b_ref[...]

    def attend_project(q_b, k_b, v_b, w_out):
        """softmax(q k^T / sqrt(dh)) v for one batch element, with the output
        projection folded in per head (avoids lane-dim concatenation)."""
        acc = jnp.zeros((q_b.shape[0], e), jnp.float32)
        for h in range(n_heads):
            lo = h * dh
            qh = q_b[:, lo:lo + dh] * scale              # (t_q, dh)
            kh = k_b[:, lo:lo + dh]                      # (s_k, dh)
            vh = v_b[:, lo:lo + dh]                      # (s_k, dh)
            s = jax.lax.dot_general(
                qh, kh, (((1,), (1,)), ((), ())),
                preferred_element_type=jnp.float32)      # (t_q, s_k)
            s = s - jnp.max(s, axis=-1, keepdims=True)
            p = jnp.exp(s)
            p = p * pl.reciprocal(jnp.sum(p, axis=-1, keepdims=True),
                                  approx=True)
            o_h = jnp.dot(p, vh, preferred_element_type=jnp.float32)  # (t_q, dh)
            w_h = w_out[:, lo:lo + dh]                   # (E, dh)
            acc = acc + jax.lax.dot_general(
                o_h.astype(w_h.dtype), w_h, (((1,), (1,)), ((), ())),
                preferred_element_type=jnp.float32)      # (t_q, E)
        return acc

    # ---------------- self-attention block + post-LN ----------------
    qkv = _mm(x, sa_wi_ref[...]) + sa_bi_ref[...]        # (B*T, 3E), one matmul
    sa_wo = sa_wo_ref[...]
    for b_i in range(batch):
        r0 = b_i * t_len
        q_b = qkv[r0:r0 + t_len, 0:e]
        k_b = qkv[r0:r0 + t_len, e:2 * e]
        v_b = qkv[r0:r0 + t_len, 2 * e:3 * e]
        attn_scr[r0:r0 + t_len, :] = attend_project(q_b, k_b, v_b, sa_wo)
    sa = attn_scr[...] + sa_bo_ref[...]
    x = add_ln(x, sa, ln1_w_ref, ln1_b_ref)

    # ---------------- cross-attention block + post-LN ----------------
    ca_wi = ca_wi_ref[...]                               # (3E, E)
    ca_bi = ca_bi_ref[...]                               # (1, 3E)
    ca_wo = ca_wo_ref[...]
    qx = _mm(x, ca_wi[0:e, :]) + ca_bi[:, 0:e]           # (B*T, E)
    for b_i in range(batch):
        r0 = b_i * t_len
        mem_b = mem_ref[b_i]                             # (S, E) f32
        kv_b = _mm(mem_b, ca_wi[e:3 * e, :]) + ca_bi[:, e:3 * e]  # (S, 2E)
        q_b = qx[r0:r0 + t_len, :]
        attn_scr[r0:r0 + t_len, :] = attend_project(
            q_b, kv_b[:, 0:e], kv_b[:, e:2 * e], ca_wo)
    ca = attn_scr[...] + ca_bo_ref[...]
    x = add_ln(x, ca, ln2_w_ref, ln2_b_ref)

    # ---------------- feed-forward block + post-LN ----------------
    h = jnp.maximum(_mm(x, ff_w1_ref[...]) + ff_b1_ref[...], 0.0)  # (B*T, FF)
    ffo = _mm(h, ff_w2_ref[...]) + ff_b2_ref[...]
    x = add_ln(x, ffo, ln3_w_ref, ln3_b_ref)

    x_scr[...] = x

    # ---------------- final Linear(E -> hidden_dim) ----------------
    @pl.when(layer == pl.num_programs(0) - 1)
    def _final():
        out_ref[...] = _mm(x, fc_w_ref[...]) + fc_b_ref[...]


# ----------------------------------------------------------------------------
# Wrapper: single fused pallas_call for the whole decoder + fc
# ----------------------------------------------------------------------------
def transformer_decoder(tgt, memory, packed, n_heads):
    t, b, e = tgt.shape
    s = memory.shape[0]
    assert e % n_heads == 0, "embed_dim must be divisible by n_heads"
    n_layers = packed["sa_wi"].shape[0]
    hidden = packed["fc_w"].shape[0]
    ff = packed["ff_w1"].shape[1]

    # One-time layout change in XLA: seq-first (T,B,E) -> batch-major rows.
    tgt2d = tgt.transpose(1, 0, 2).reshape(b * t, e)     # (B*T, E)
    mem3 = memory.transpose(1, 0, 2)                     # (B, S, E)

    full2 = lambda shape: pl.BlockSpec(shape, lambda l: (0, 0))
    full3 = lambda shape: pl.BlockSpec(shape, lambda l: (0, 0, 0))
    perlayer = lambda shape: pl.BlockSpec((None,) + shape, lambda l: (l, 0, 0))

    in_specs = [
        full2((b * t, e)),                               # tgt (rows)
        full3((b, s, e)),                                # memory (B, S, E)
        perlayer((3 * e, e)), perlayer((1, 3 * e)),      # self-attn in-proj w/b
        perlayer((e, e)),     perlayer((1, e)),          # self-attn out-proj w/b
        perlayer((3 * e, e)), perlayer((1, 3 * e)),      # cross-attn in-proj w/b
        perlayer((e, e)),     perlayer((1, e)),          # cross-attn out-proj w/b
        perlayer((ff, e)),    perlayer((1, ff)),         # linear1 w/b
        perlayer((e, ff)),    perlayer((1, e)),          # linear2 w/b
        perlayer((1, e)), perlayer((1, e)),              # norm1 w/b
        perlayer((1, e)), perlayer((1, e)),              # norm2 w/b
        perlayer((1, e)), perlayer((1, e)),              # norm3 w/b
        full2((hidden, e)), full2((1, hidden)),          # fc w/b
    ]

    grid_spec = pltpu.PrefetchScalarGridSpec(
        num_scalar_prefetch=0,
        grid=(n_layers,),
        in_specs=in_specs,
        out_specs=pl.BlockSpec((b * t, hidden), lambda l: (0, 0)),
        scratch_shapes=[pltpu.VMEM((b * t, e), jnp.float32),   # x (carried)
                        pltpu.VMEM((b * t, e), jnp.float32)],  # attn staging
    )

    kernel = functools.partial(_fused_decoder_kernel,
                               n_heads=n_heads, t_len=t, batch=b)

    out2d = pl.pallas_call(
        kernel,
        out_shape=jax.ShapeDtypeStruct((b * t, hidden), jnp.float32),
        grid_spec=grid_spec,
        compiler_params=pltpu.CompilerParams(
            dimension_semantics=("arbitrary",),          # layers carry state
            vmem_limit_bytes=32 * 1024 * 1024,
        ),
    )(tgt2d, mem3,
      packed["sa_wi"], packed["sa_bi"], packed["sa_wo"], packed["sa_bo"],
      packed["ca_wi"], packed["ca_bi"], packed["ca_wo"], packed["ca_bo"],
      packed["ff_w1"], packed["ff_b1"], packed["ff_w2"], packed["ff_b2"],
      packed["ln1_w"], packed["ln1_b"], packed["ln2_w"], packed["ln2_b"],
      packed["ln3_w"], packed["ln3_b"],
      packed["fc_w"], packed["fc_b"])

    return out2d.reshape(b, t, hidden).transpose(1, 0, 2)   # (T, B, hidden)


# ----------------------------------------------------------------------------
# Parameter init (PyTorch shapes) + packing into stacked, kernel-ready arrays
# ----------------------------------------------------------------------------
def init_params(key, embed_dim, n_heads, hidden_dim, n_layers, ff_dim=FF_DIM):
    del n_heads  # head count does not change parameter shapes

    def dense(k, shape, scale=0.02):
        return (scale * jax.random.normal(k, shape)).astype(jnp.float32)

    def mha_params(k):
        k = jax.random.split(k, 4)
        return {
            "in_proj_weight": dense(k[0], (3 * embed_dim, embed_dim)),
            "in_proj_bias": dense(k[1], (3 * embed_dim,)),
            "out_proj_weight": dense(k[2], (embed_dim, embed_dim)),
            "out_proj_bias": dense(k[3], (embed_dim,)),
        }

    layers = []
    keys = jax.random.split(key, n_layers + 1)
    for lk in keys[:-1]:
        ks = jax.random.split(lk, 6)
        layers.append({
            "self_attn": mha_params(ks[0]),
            "cross_attn": mha_params(ks[1]),
            "linear1_w": dense(ks[2], (ff_dim, embed_dim)),
            "linear1_b": jnp.zeros((ff_dim,), jnp.float32),
            "linear2_w": dense(ks[3], (embed_dim, ff_dim)),
            "linear2_b": jnp.zeros((embed_dim,), jnp.float32),
            "norm1_w": jnp.ones((embed_dim,), jnp.float32),
            "norm1_b": jnp.zeros((embed_dim,), jnp.float32),
            "norm2_w": jnp.ones((embed_dim,), jnp.float32),
            "norm2_b": jnp.zeros((embed_dim,), jnp.float32),
            "norm3_w": jnp.ones((embed_dim,), jnp.float32),
            "norm3_b": jnp.zeros((embed_dim,), jnp.float32),
        })
    fk = jax.random.split(keys[-1], 2)
    return {
        "layers": layers,
        "fc_w": dense(fk[0], (hidden_dim, embed_dim)),
        "fc_b": dense(fk[1], (hidden_dim,)),
    }


def pack_params(params, mm_dtype=MM_DTYPE):
    """Stack per-layer params on a leading layer axis; matmul weights -> bf16
    (halves weight DMA traffic), biases / LN params stay f32."""
    layers = params["layers"]

    def stack(get):
        return jnp.stack([get(lp) for lp in layers], axis=0)

    def row(v):
        return v.reshape(1, -1)

    return {
        "sa_wi": stack(lambda p: p["self_attn"]["in_proj_weight"]).astype(mm_dtype),
        "sa_bi": stack(lambda p: row(p["self_attn"]["in_proj_bias"])),
        "sa_wo": stack(lambda p: p["self_attn"]["out_proj_weight"]).astype(mm_dtype),
        "sa_bo": stack(lambda p: row(p["self_attn"]["out_proj_bias"])),
        "ca_wi": stack(lambda p: p["cross_attn"]["in_proj_weight"]).astype(mm_dtype),
        "ca_bi": stack(lambda p: row(p["cross_attn"]["in_proj_bias"])),
        "ca_wo": stack(lambda p: p["cross_attn"]["out_proj_weight"]).astype(mm_dtype),
        "ca_bo": stack(lambda p: row(p["cross_attn"]["out_proj_bias"])),
        "ff_w1": stack(lambda p: p["linear1_w"]).astype(mm_dtype),
        "ff_b1": stack(lambda p: row(p["linear1_b"])),
        "ff_w2": stack(lambda p: p["linear2_w"]).astype(mm_dtype),
        "ff_b2": stack(lambda p: row(p["linear2_b"])),
        "ln1_w": stack(lambda p: row(p["norm1_w"])),
        "ln1_b": stack(lambda p: row(p["norm1_b"])),
        "ln2_w": stack(lambda p: row(p["norm2_w"])),
        "ln2_b": stack(lambda p: row(p["norm2_b"])),
        "ln3_w": stack(lambda p: row(p["norm3_w"])),
        "ln3_b": stack(lambda p: row(p["norm3_b"])),
        "fc_w": params["fc_w"].astype(mm_dtype),
        "fc_b": row(params["fc_b"]),
    }


# ----------------------------------------------------------------------------
if __name__ == "__main__":
    EMBED_DIM = 32
    N_HEADS = 4
    HIDDEN_DIM = 64
    N_LAYERS = 2
    T, S, B = 8, 10, 2  # tgt seq len, memory seq len, batch

    root = jax.random.PRNGKey(0)
    k_tgt, k_mem, k_par = jax.random.split(root, 3)

    tgt = jax.random.normal(k_tgt, (T, B, EMBED_DIM), dtype=jnp.float32)
    memory = jax.random.normal(k_mem, (S, B, EMBED_DIM), dtype=jnp.float32)
    params = init_params(k_par, EMBED_DIM, N_HEADS, HIDDEN_DIM, N_LAYERS)
    packed = pack_params(params)

    fwd = jax.jit(functools.partial(transformer_decoder, n_heads=N_HEADS))
    out = fwd(tgt, memory, packed)
    out = jax.block_until_ready(out)

    assert out.shape == (T, B, HIDDEN_DIM), out.shape
    assert bool(jnp.all(jnp.isfinite(out)))
    print("KERNEL_OK")
</pallas_src>

<mosaic_0001>
module attributes {stable_mosaic.version = 11 : i64} {
  func.func @_fused_decoder_kernel(%arg0: i32, %arg1: memref<16x32xf32, #tpu.memory_space<vmem>>, %arg2: memref<2x10x32xf32, #tpu.memory_space<vmem>>, %arg3: memref<1x96x32xbf16, #tpu.memory_space<vmem>>, %arg4: memref<1x1x96xf32, #tpu.memory_space<vmem>>, %arg5: memref<1x32x32xbf16, #tpu.memory_space<vmem>>, %arg6: memref<1x1x32xf32, #tpu.memory_space<vmem>>, %arg7: memref<1x96x32xbf16, #tpu.memory_space<vmem>>, %arg8: memref<1x1x96xf32, #tpu.memory_space<vmem>>, %arg9: memref<1x32x32xbf16, #tpu.memory_space<vmem>>, %arg10: memref<1x1x32xf32, #tpu.memory_space<vmem>>, %arg11: memref<1x2048x32xbf16, #tpu.memory_space<vmem>>, %arg12: memref<1x1x2048xf32, #tpu.memory_space<vmem>>, %arg13: memref<1x32x2048xbf16, #tpu.memory_space<vmem>>, %arg14: memref<1x1x32xf32, #tpu.memory_space<vmem>>, %arg15: memref<1x1x32xf32, #tpu.memory_space<vmem>>, %arg16: memref<1x1x32xf32, #tpu.memory_space<vmem>>, %arg17: memref<1x1x32xf32, #tpu.memory_space<vmem>>, %arg18: memref<1x1x32xf32, #tpu.memory_space<vmem>>, %arg19: memref<1x1x32xf32, #tpu.memory_space<vmem>>, %arg20: memref<1x1x32xf32, #tpu.memory_space<vmem>>, %arg21: memref<64x32xbf16, #tpu.memory_space<vmem>>, %arg22: memref<1x64xf32, #tpu.memory_space<vmem>>, %arg23: memref<16x64xf32, #tpu.memory_space<vmem>>, %arg24: memref<16x32xf32, #tpu.memory_space<vmem>>, %arg25: memref<16x32xf32, #tpu.memory_space<vmem>>) attributes {dimension_semantics = [#tpu.dimension_semantics<arbitrary>], iteration_bounds = array<i64: 2>, scalar_prefetch = 0 : i64, scratch_operands = 2 : i64, tpu.core_type = #tpu.core_type<tc>, window_params = [{pipeline_mode = #tpu.pipeline_mode<synchronous>, transform_indices = @transform_0, window_bounds = array<i64: 16, 32>}, {pipeline_mode = #tpu.pipeline_mode<synchronous>, transform_indices = @transform_1, window_bounds = array<i64: 2, 10, 32>}, {transform_indices = @transform_2, window_bounds = array<i64: 1, 96, 32>}, {transform_indices = @transform_3, window_bounds = array<i64: 1, 1, 96>}, {transform_indices = @transform_4, window_bounds = array<i64: 1, 32, 32>}, {transform_indices = @transform_5, window_bounds = array<i64: 1, 1, 32>}, {transform_indices = @transform_6, window_bounds = array<i64: 1, 96, 32>}, {transform_indices = @transform_7, window_bounds = array<i64: 1, 1, 96>}, {transform_indices = @transform_8, window_bounds = array<i64: 1, 32, 32>}, {transform_indices = @transform_9, window_bounds = array<i64: 1, 1, 32>}, {transform_indices = @transform_10, window_bounds = array<i64: 1, 2048, 32>}, {transform_indices = @transform_11, window_bounds = array<i64: 1, 1, 2048>}, {transform_indices = @transform_12, window_bounds = array<i64: 1, 32, 2048>}, {transform_indices = @transform_13, window_bounds = array<i64: 1, 1, 32>}, {transform_indices = @transform_14, window_bounds = array<i64: 1, 1, 32>}, {transform_indices = @transform_15, window_bounds = array<i64: 1, 1, 32>}, {transform_indices = @transform_16, window_bounds = array<i64: 1, 1, 32>}, {transform_indices = @transform_17, window_bounds = array<i64: 1, 1, 32>}, {transform_indices = @transform_18, window_bounds = array<i64: 1, 1, 32>}, {transform_indices = @transform_19, window_bounds = array<i64: 1, 1, 32>}, {pipeline_mode = #tpu.pipeline_mode<synchronous>, transform_indices = @transform_20, window_bounds = array<i64: 64, 32>}, {pipeline_mode = #tpu.pipeline_mode<synchronous>, transform_indices = @transform_21, window_bounds = array<i64: 1, 64>}, {pipeline_mode = #tpu.pipeline_mode<synchronous>, transform_indices = @transform_22, window_bounds = array<i64: 16, 64>}]} {
    %c0_i32 = arith.constant 0 : i32
    %0 = arith.cmpi eq, %arg0, %c0_i32 : i32
    %1 = arith.extui %0 : i1 to i32
    %c0_i32_0 = arith.constant 0 : i32
    %2 = arith.cmpi ne, %1, %c0_i32_0 : i32
    scf.if %2 {
      %c0_196 = arith.constant 0 : index
      %c0_197 = arith.constant 0 : index
      %505 = vector.load %arg1[%c0_196, %c0_197] : memref<16x32xf32, #tpu.memory_space<vmem>>, vector<16x32xf32>
      %c0_198 = arith.constant 0 : index
      %c0_199 = arith.constant 0 : index
      %506 = vector.load %arg24[%c0_198, %c0_199] : memref<16x32xf32, #tpu.memory_space<vmem>>, vector<16x32xf32>
      tpu.vector_store %arg24[%c0_198, %c0_199], %505 {strides = array<i32>} : memref<16x32xf32, #tpu.memory_space<vmem>>, vector<16x32xf32>,
    } else {
    }
    %c0 = arith.constant 0 : index
    %c0_1 = arith.constant 0 : index
    %3 = vector.load %arg24[%c0, %c0_1] : memref<16x32xf32, #tpu.memory_space<vmem>>, vector<16x32xf32>
    %c0_2 = arith.constant 0 : index
    %c0_3 = arith.constant 0 : index
    %c0_4 = arith.constant 0 : index
    %4 = vector.load %arg3[%c0_2, %c0_3, %c0_4] : memref<1x96x32xbf16, #tpu.memory_space<vmem>>, vector<1x96x32xbf16>
    %5 = vector.shape_cast %4 : vector<1x96x32xbf16> to vector<96x32xbf16>
    %6 = arith.truncf %3 : vector<16x32xf32> to vector<16x32xbf16>
    %cst = arith.constant dense<0.000000e+00> : vector<16x96xf32>
    %7 = tpu.matmul %6, %5, %cst {dimension_numbers = #tpu.dot_dimension_numbers<[1], [1], [0], [0], [0, 0, 1, 0], [], []>} : vector<16x32xbf16>, vector<96x32xbf16>, vector<16x96xf32> -> vector<16x96xf32>
    %c0_5 = arith.constant 0 : index
    %c0_6 = arith.constant 0 : index
    %c0_7 = arith.constant 0 : index
    %8 = vector.load %arg4[%c0_5, %c0_6, %c0_7] : memref<1x1x96xf32, #tpu.memory_space<vmem>>, vector<1x1x96xf32>
    %9 = vector.shape_cast %8 : vector<1x1x96xf32> to vector<1x96xf32>
    %10 = vector.broadcast %9 : vector<1x96xf32> to vector<16x96xf32>
    %11 = arith.addf %7, %10 : vector<16x96xf32>
    %c0_8 = arith.constant 0 : index
    %c0_9 = arith.constant 0 : index
    %c0_10 = arith.constant 0 : index
    %12 = vector.load %arg5[%c0_8, %c0_9, %c0_10] : memref<1x32x32xbf16, #tpu.memory_space<vmem>>, vector<1x32x32xbf16>
    %13 = vector.shape_cast %12 : vector<1x32x32xbf16> to vector<32x32xbf16>
    %14 = vector.extract_strided_slice %11 {offsets = [0, 0], sizes = [8, 32], strides = [1, 1]} : vector<16x96xf32> to vector<8x32xf32>
    %15 = vector.extract_strided_slice %11 {offsets = [0, 32], sizes = [8, 32], strides = [1, 1]} : vector<16x96xf32> to vector<8x32xf32>
    %16 = vector.extract_strided_slice %11 {offsets = [0, 64], sizes = [8, 32], strides = [1, 1]} : vector<16x96xf32> to vector<8x32xf32>
    %cst_11 = arith.constant 0.000000e+00 : f32
    %17 = vector.broadcast %cst_11 : f32 to vector<8x32xf32>
    %18 = vector.extract_strided_slice %14 {offsets = [0, 0], sizes = [8, 8], strides = [1, 1]} : vector<8x32xf32> to vector<8x8xf32>
    %cst_12 = arith.constant 0.353553385 : f32
    %19 = vector.broadcast %cst_12 : f32 to vector<8x8xf32>
    %20 = arith.mulf %18, %19 : vector<8x8xf32>
    %21 = vector.extract_strided_slice %15 {offsets = [0, 0], sizes = [8, 8], strides = [1, 1]} : vector<8x32xf32> to vector<8x8xf32>
    %22 = vector.extract_strided_slice %16 {offsets = [0, 0], sizes = [8, 8], strides = [1, 1]} : vector<8x32xf32> to vector<8x8xf32>
    %cst_13 = arith.constant dense<0.000000e+00> : vector<8x8xf32>
    %23 = tpu.matmul %20, %21, %cst_13 {dimension_numbers = #tpu.dot_dimension_numbers<[1], [1], [0], [0], [0, 0, 1, 0], [], []>} : vector<8x8xf32>, vector<8x8xf32>, vector<8x8xf32> -> vector<8x8xf32>
    %cst_14 = arith.constant dense<0xFF800000> : vector<8xf32>
    %24 = vector.multi_reduction <maximumf>, %23, %cst_14 [1] : vector<8x8xf32> to vector<8xf32>
    %25 = vector.shape_cast %24 : vector<8xf32> to vector<8x1xf32>
    %26 = vector.broadcast %25 : vector<8x1xf32> to vector<8x8xf32>
    %27 = arith.subf %23, %26 : vector<8x8xf32>
    %28 = math.exp %27 : vector<8x8xf32>
    %cst_15 = arith.constant dense<0.000000e+00> : vector<8xf32>
    %29 = vector.multi_reduction <add>, %28, %cst_15 [1] : vector<8x8xf32> to vector<8xf32>
    %30 = vector.shape_cast %29 : vector<8xf32> to vector<8x1xf32>
    %31 = tpu.reciprocal %30 {approx = true} : vector<8x1xf32> -> vector<8x1xf32>
    %32 = vector.broadcast %31 : vector<8x1xf32> to vector<8x8xf32>
    %33 = arith.mulf %28, %32 : vector<8x8xf32>
    %cst_16 = arith.constant dense<0.000000e+00> : vector<8x8xf32>
    %34 = tpu.matmul %33, %22, %cst_16 {dimension_numbers = #tpu.dot_dimension_numbers<[1], [0], [0], [1], [0, 0, 1, 1], [], []>} : vector<8x8xf32>, vector<8x8xf32>, vector<8x8xf32> -> vector<8x8xf32>
    %35 = vector.extract_strided_slice %13 {offsets = [0, 0], sizes = [32, 8], strides = [1, 1]} : vector<32x32xbf16> to vector<32x8xbf16>
    %36 = arith.truncf %34 : vector<8x8xf32> to vector<8x8xbf16>
    %cst_17 = arith.constant dense<0.000000e+00> : vector<8x32xf32>
    %37 = tpu.matmul %36, %35, %cst_17 {dimension_numbers = #tpu.dot_dimension_numbers<[1], [1], [0], [0], [0, 0, 1, 0], [], []>} : vector<8x8xbf16>, vector<32x8xbf16>, vector<8x32xf32> -> vector<8x32xf32>
    %38 = arith.addf %17, %37 : vector<8x32xf32>
    %39 = vector.extract_strided_slice %14 {offsets = [0, 8], sizes = [8, 8], strides = [1, 1]} : vector<8x32xf32> to vector<8x8xf32>
    %cst_18 = arith.constant 0.353553385 : f32
    %40 = vector.broadcast %cst_18 : f32 to vector<8x8xf32>
    %41 = arith.mulf %39, %40 : vector<8x8xf32>
    %42 = vector.extract_strided_slice %15 {offsets = [0, 8], sizes = [8, 8], strides = [1, 1]} : vector<8x32xf32> to vector<8x8xf32>
    %43 = vector.extract_strided_slice %16 {offsets = [0, 8], sizes = [8, 8], strides = [1, 1]} : vector<8x32xf32> to vector<8x8xf32>
    %cst_19 = arith.constant dense<0.000000e+00> : vector<8x8xf32>
    %44 = tpu.matmul %41, %42, %cst_19 {dimension_numbers = #tpu.dot_dimension_numbers<[1], [1], [0], [0], [0, 0, 1, 0], [], []>} : vector<8x8xf32>, vector<8x8xf32>, vector<8x8xf32> -> vector<8x8xf32>
    %cst_20 = arith.constant dense<0xFF800000> : vector<8xf32>
    %45 = vector.multi_reduction <maximumf>, %44, %cst_20 [1] : vector<8x8xf32> to vector<8xf32>
    %46 = vector.shape_cast %45 : vector<8xf32> to vector<8x1xf32>
    %47 = vector.broadcast %46 : vector<8x1xf32> to vector<8x8xf32>
    %48 = arith.subf %44, %47 : vector<8x8xf32>
    %49 = math.exp %48 : vector<8x8xf32>
    %cst_21 = arith.constant dense<0.000000e+00> : vector<8xf32>
    %50 = vector.multi_reduction <add>, %49, %cst_21 [1] : vector<8x8xf32> to vector<8xf32>
    %51 = vector.shape_cast %50 : vector<8xf32> to vector<8x1xf32>
    %52 = tpu.reciprocal %51 {approx = true} : vector<8x1xf32> -> vector<8x1xf32>
    %53 = vector.broadcast %52 : vector<8x1xf32> to vector<8x8xf32>
    %54 = arith.mulf %49, %53 : vector<8x8xf32>
    %cst_22 = arith.constant dense<0.000000e+00> : vector<8x8xf32>
    %55 = tpu.matmul %54, %43, %cst_22 {dimension_numbers = #tpu.dot_dimension_numbers<[1], [0], [0], [1], [0, 0, 1, 1], [], []>} : vector<8x8xf32>, vector<8x8xf32>, vector<8x8xf32> -> vector<8x8xf32>
    %56 = vector.extract_strided_slice %13 {offsets = [0, 8], sizes = [32, 8], strides = [1, 1]} : vector<32x32xbf16> to vector<32x8xbf16>
    %57 = arith.truncf %55 : vector<8x8xf32> to vector<8x8xbf16>
    %cst_23 = arith.constant dense<0.000000e+00> : vector<8x32xf32>
    %58 = tpu.matmul %57, %56, %cst_23 {dimension_numbers = #tpu.dot_dimension_numbers<[1], [1], [0], [0], [0, 0, 1, 0], [], []>} : vector<8x8xbf16>, vector<32x8xbf16>, vector<8x32xf32> -> vector<8x32xf32>
    %59 = arith.addf %38, %58 : vector<8x32xf32>
    %60 = vector.extract_strided_slice %14 {offsets = [0, 16], sizes = [8, 8], strides = [1, 1]} : vector<8x32xf32> to vector<8x8xf32>
    %cst_24 = arith.constant 0.353553385 : f32
    %61 = vector.broadcast %cst_24 : f32 to vector<8x8xf32>
    %62 = arith.mulf %60, %61 : vector<8x8xf32>
    %63 = vector.extract_strided_slice %15 {offsets = [0, 16], sizes = [8, 8], strides = [1, 1]} : vector<8x32xf32> to vector<8x8xf32>
    %64 = vector.extract_strided_slice %16 {offsets = [0, 16], sizes = [8, 8], strides = [1, 1]} : vector<8x32xf32> to vector<8x8xf32>
    %cst_25 = arith.constant dense<0.000000e+00> : vector<8x8xf32>
    %65 = tpu.matmul %62, %63, %cst_25 {dimension_numbers = #tpu.dot_dimension_numbers<[1], [1], [0], [0], [0, 0, 1, 0], [], []>} : vector<8x8xf32>, vector<8x8xf32>, vector<8x8xf32> -> vector<8x8xf32>
    %cst_26 = arith.constant dense<0xFF800000> : vector<8xf32>
    %66 = vector.multi_reduction <maximumf>, %65, %cst_26 [1] : vector<8x8xf32> to vector<8xf32>
    %67 = vector.shape_cast %66 : vector<8xf32> to vector<8x1xf32>
    %68 = vector.broadcast %67 : vector<8x1xf32> to vector<8x8xf32>
    %69 = arith.subf %65, %68 : vector<8x8xf32>
    %70 = math.exp %69 : vector<8x8xf32>
    %cst_27 = arith.constant dense<0.000000e+00> : vector<8xf32>
    %71 = vector.multi_reduction <add>, %70, %cst_27 [1] : vector<8x8xf32> to vector<8xf32>
    %72 = vector.shape_cast %71 : vector<8xf32> to vector<8x1xf32>
    %73 = tpu.reciprocal %72 {approx = true} : vector<8x1xf32> -> vector<8x1xf32>
    %74 = vector.broadcast %73 : vector<8x1xf32> to vector<8x8xf32>
    %75 = arith.mulf %70, %74 : vector<8x8xf32>
    %cst_28 = arith.constant dense<0.000000e+00> : vector<8x8xf32>
    %76 = tpu.matmul %75, %64, %cst_28 {dimension_numbers = #tpu.dot_dimension_numbers<[1], [0], [0], [1], [0, 0, 1, 1], [], []>} : vector<8x8xf32>, vector<8x8xf32>, vector<8x8xf32> -> vector<8x8xf32>
    %77 = vector.extract_strided_slice %13 {offsets = [0, 16], sizes = [32, 8], strides = [1, 1]} : vector<32x32xbf16> to vector<32x8xbf16>
    %78 = arith.truncf %76 : vector<8x8xf32> to vector<8x8xbf16>
    %cst_29 = arith.constant dense<0.000000e+00> : vector<8x32xf32>
    %79 = tpu.matmul %78, %77, %cst_29 {dimension_numbers = #tpu.dot_dimension_numbers<[1], [1], [0], [0], [0, 0, 1, 0], [], []>} : vector<8x8xbf16>, vector<32x8xbf16>, vector<8x32xf32> -> vector<8x32xf32>
    %80 = arith.addf %59, %79 : vector<8x32xf32>
    %81 = vector.extract_strided_slice %14 {offsets = [0, 24], sizes = [8, 8], strides = [1, 1]} : vector<8x32xf32> to vector<8x8xf32>
    %cst_30 = arith.constant 0.353553385 : f32
    %82 = vector.broadcast %cst_30 : f32 to vector<8x8xf32>
    %83 = arith.mulf %81, %82 : vector<8x8xf32>
    %84 = vector.extract_strided_slice %15 {offsets = [0, 24], sizes = [8, 8], strides = [1, 1]} : vector<8x32xf32> to vector<8x8xf32>
    %85 = vector.extract_strided_slice %16 {offsets = [0, 24], sizes = [8, 8], strides = [1, 1]} : vector<8x32xf32> to vector<8x8xf32>
    %cst_31 = arith.constant dense<0.000000e+00> : vector<8x8xf32>
    %86 = tpu.matmul %83, %84, %cst_31 {dimension_numbers = #tpu.dot_dimension_numbers<[1], [1], [0], [0], [0, 0, 1, 0], [], []>} : vector<8x8xf32>, vector<8x8xf32>, vector<8x8xf32> -> vector<8x8xf32>
    %cst_32 = arith.constant dense<0xFF800000> : vector<8xf32>
    %87 = vector.multi_reduction <maximumf>, %86, %cst_32 [1] : vector<8x8xf32> to vector<8xf32>
    %88 = vector.shape_cast %87 : vector<8xf32> to vector<8x1xf32>
    %89 = vector.broadcast %88 : vector<8x1xf32> to vector<8x8xf32>
    %90 = arith.subf %86, %89 : vector<8x8xf32>
    %91 = math.exp %90 : vector<8x8xf32>
    %cst_33 = arith.constant dense<0.000000e+00> : vector<8xf32>
    %92 = vector.multi_reduction <add>, %91, %cst_33 [1] : vector<8x8xf32> to vector<8xf32>
    %93 = vector.shape_cast %92 : vector<8xf32> to vector<8x1xf32>
    %94 = tpu.reciprocal %93 {approx = true} : vector<8x1xf32> -> vector<8x1xf32>
    %95 = vector.broadcast %94 : vector<8x1xf32> to vector<8x8xf32>
    %96 = arith.mulf %91, %95 : vector<8x8xf32>
    %cst_34 = arith.constant dense<0.000000e+00> : vector<8x8xf32>
    %97 = tpu.matmul %96, %85, %cst_34 {dimension_numbers = #tpu.dot_dimension_numbers<[1], [0], [0], [1], [0, 0, 1, 1], [], []>} : vector<8x8xf32>, vector<8x8xf32>, vector<8x8xf32> -> vector<8x8xf32>
    %98 = vector.extract_strided_slice %13 {offsets = [0, 24], sizes = [32, 8], strides = [1, 1]} : vector<32x32xbf16> to vector<32x8xbf16>
    %99 = arith.truncf %97 : vector<8x8xf32> to vector<8x8xbf16>
    %cst_35 = arith.constant dense<0.000000e+00> : vector<8x32xf32>
    %100 = tpu.matmul %99, %98, %cst_35 {dimension_numbers = #tpu.dot_dimension_numbers<[1], [1], [0], [0], [0, 0, 1, 0], [], []>} : vector<8x8xbf16>, vector<32x8xbf16>, vector<8x32xf32> -> vector<8x32xf32>
    %101 = arith.addf %80, %100 : vector<8x32xf32>
    %c0_36 = arith.constant 0 : index
    %c0_37 = arith.constant 0 : index
    %102 = vector.load %arg25[%c0_36, %c0_37] : memref<16x32xf32, #tpu.memory_space<vmem>>, vector<8x32xf32>
    tpu.vector_store %arg25[%c0_36, %c0_37], %101 {strides = array<i32>} : memref<16x32xf32, #tpu.memory_space<vmem>>, vector<8x32xf32>,
    %103 = vector.extract_strided_slice %11 {offsets = [8, 0], sizes = [8, 32], strides = [1, 1]} : vector<16x96xf32> to vector<8x32xf32>
    %104 = vector.extract_strided_slice %11 {offsets = [8, 32], sizes = [8, 32], strides = [1, 1]} : vector<16x96xf32> to vector<8x32xf32>
    %105 = vector.extract_strided_slice %11 {offsets = [8, 64], sizes = [8, 32], strides = [1, 1]} : vector<16x96xf32> to vector<8x32xf32>
    %cst_38 = arith.constant 0.000000e+00 : f32
    %106 = vector.broadcast %cst_38 : f32 to vector<8x32xf32>
    %107 = vector.extract_strided_slice %103 {offsets = [0, 0], sizes = [8, 8], strides = [1, 1]} : vector<8x32xf32> to vector<8x8xf32>
    %cst_39 = arith.constant 0.353553385 : f32
    %108 = vector.broadcast %cst_39 : f32 to vector<8x8xf32>
    %109 = arith.mulf %107, %108 : vector<8x8xf32>
    %110 = vector.extract_strided_slice %104 {offsets = [0, 0], sizes = [8, 8], strides = [1, 1]} : vector<8x32xf32> to vector<8x8xf32>
    %111 = vector.extract_strided_slice %105 {offsets = [0, 0], sizes = [8, 8], strides = [1, 1]} : vector<8x32xf32> to vector<8x8xf32>
    %cst_40 = arith.constant dense<0.000000e+00> : vector<8x8xf32>
    %112 = tpu.matmul %109, %110, %cst_40 {dimension_numbers = #tpu.dot_dimension_numbers<[1], [1], [0], [0], [0, 0, 1, 0], [], []>} : vector<8x8xf32>, vector<8x8xf32>, vector<8x8xf32> -> vector<8x8xf32>
    %cst_41 = arith.constant dense<0xFF800000> : vector<8xf32>
    %113 = vector.multi_reduction <maximumf>, %112, %cst_41 [1] : vector<8x8xf32> to vector<8xf32>
    %114 = vector.shape_cast %113 : vector<8xf32> to vector<8x1xf32>
    %115 = vector.broadcast %114 : vector<8x1xf32> to vector<8x8xf32>
    %116 = arith.subf %112, %115 : vector<8x8xf32>
    %117 = math.exp %116 : vector<8x8xf32>
    %cst_42 = arith.constant dense<0.000000e+00> : vector<8xf32>
    %118 = vector.multi_reduction <add>, %117, %cst_42 [1] : vector<8x8xf32> to vector<8xf32>
    %119 = vector.shape_cast %118 : vector<8xf32> to vector<8x1xf32>
    %120 = tpu.reciprocal %119 {approx = true} : vector<8x1xf32> -> vector<8x1xf32>
    %121 = vector.broadcast %120 : vector<8x1xf32> to vector<8x8xf32>
    %122 = arith.mulf %117, %121 : vector<8x8xf32>
    %cst_43 = arith.constant dense<0.000000e+00> : vector<8x8xf32>
    %123 = tpu.matmul %122, %111, %cst_43 {dimension_numbers = #tpu.dot_dimension_numbers<[1], [0], [0], [1], [0, 0, 1, 1], [], []>} : vector<8x8xf32>, vector<8x8xf32>, vector<8x8xf32> -> vector<8x8xf32>
    %124 = vector.extract_strided_slice %13 {offsets = [0, 0], sizes = [32, 8], strides = [1, 1]} : vector<32x32xbf16> to vector<32x8xbf16>
    %125 = arith.truncf %123 : vector<8x8xf32> to vector<8x8xbf16>
    %cst_44 = arith.constant dense<0.000000e+00> : vector<8x32xf32>
    %126 = tpu.matmul %125, %124, %cst_44 {dimension_numbers = #tpu.dot_dimension_numbers<[1], [1], [0], [0], [0, 0, 1, 0], [], []>} : vector<8x8xbf16>, vector<32x8xbf16>, vector<8x32xf32> -> vector<8x32xf32>
    %127 = arith.addf %106, %126 : vector<8x32xf32>
    %128 = vector.extract_strided_slice %103 {offsets = [0, 8], sizes = [8, 8], strides = [1, 1]} : vector<8x32xf32> to vector<8x8xf32>
    %cst_45 = arith.constant 0.353553385 : f32
    %129 = vector.broadcast %cst_45 : f32 to vector<8x8xf32>
    %130 = arith.mulf %128, %129 : vector<8x8xf32>
    %131 = vector.extract_strided_slice %104 {offsets = [0, 8], sizes = [8, 8], strides = [1, 1]} : vector<8x32xf32> to vector<8x8xf32>
    %132 = vector.extract_strided_slice %105 {offsets = [0, 8], sizes = [8, 8], strides = [1, 1]} : vector<8x32xf32> to vector<8x8xf32>
    %cst_46 = arith.constant dense<0.000000e+00> : vector<8x8xf32>
    %133 = tpu.matmul %130, %131, %cst_46 {dimension_numbers = #tpu.dot_dimension_numbers<[1], [1], [0], [0], [0, 0, 1, 0], [], []>} : vector<8x8xf32>, vector<8x8xf32>, vector<8x8xf32> -> vector<8x8xf32>
    %cst_47 = arith.constant dense<0xFF800000> : vector<8xf32>
    %134 = vector.multi_reduction <maximumf>, %133, %cst_47 [1] : vector<8x8xf32> to vector<8xf32>
    %135 = vector.shape_cast %134 : vector<8xf32> to vector<8x1xf32>
    %136 = vector.broadcast %135 : vector<8x1xf32> to vector<8x8xf32>
    %137 = arith.subf %133, %136 : vector<8x8xf32>
    %138 = math.exp %137 : vector<8x8xf32>
    %cst_48 = arith.constant dense<0.000000e+00> : vector<8xf32>
    %139 = vector.multi_reduction <add>, %138, %cst_48 [1] : vector<8x8xf32> to vector<8xf32>
    %140 = vector.shape_cast %139 : vector<8xf32> to vector<8x1xf32>
    %141 = tpu.reciprocal %140 {approx = true} : vector<8x1xf32> -> vector<8x1xf32>
    %142 = vector.broadcast %141 : vector<8x1xf32> to vector<8x8xf32>
    %143 = arith.mulf %138, %142 : vector<8x8xf32>
    %cst_49 = arith.constant dense<0.000000e+00> : vector<8x8xf32>
    %144 = tpu.matmul %143, %132, %cst_49 {dimension_numbers = #tpu.dot_dimension_numbers<[1], [0], [0], [1], [0, 0, 1, 1], [], []>} : vector<8x8xf32>, vector<8x8xf32>, vector<8x8xf32> -> vector<8x8xf32>
    %145 = vector.extract_strided_slice %13 {offsets = [0, 8], sizes = [32, 8], strides = [1, 1]} : vector<32x32xbf16> to vector<32x8xbf16>
    %146 = arith.truncf %144 : vector<8x8xf32> to vector<8x8xbf16>
    %cst_50 = arith.constant dense<0.000000e+00> : vector<8x32xf32>
    %147 = tpu.matmul %146, %145, %cst_50 {dimension_numbers = #tpu.dot_dimension_numbers<[1], [1], [0], [0], [0, 0, 1, 0], [], []>} : vector<8x8xbf16>, vector<32x8xbf16>, vector<8x32xf32> -> vector<8x32xf32>
    %148 = arith.addf %127, %147 : vector<8x32xf32>
    %149 = vector.extract_strided_slice %103 {offsets = [0, 16], sizes = [8, 8], strides = [1, 1]} : vector<8x32xf32> to vector<8x8xf32>
    %cst_51 = arith.constant 0.353553385 : f32
    %150 = vector.broadcast %cst_51 : f32 to vector<8x8xf32>
    %151 = arith.mulf %149, %150 : vector<8x8xf32>
    %152 = vector.extract_strided_slice %104 {offsets = [0, 16], sizes = [8, 8], strides = [1, 1]} : vector<8x32xf32> to vector<8x8xf32>
    %153 = vector.extract_strided_slice %105 {offsets = [0, 16], sizes = [8, 8], strides = [1, 1]} : vector<8x32xf32> to vector<8x8xf32>
    %cst_52 = arith.constant dense<0.000000e+00> : vector<8x8xf32>
    %154 = tpu.matmul %151, %152, %cst_52 {dimension_numbers = #tpu.dot_dimension_numbers<[1], [1], [0], [0], [0, 0, 1, 0], [], []>} : vector<8x8xf32>, vector<8x8xf32>, vector<8x8xf32> -> vector<8x8xf32>
    %cst_53 = arith.constant dense<0xFF800000> : vector<8xf32>
    %155 = vector.multi_reduction <maximumf>, %154, %cst_53 [1] : vector<8x8xf32> to vector<8xf32>
    %156 = vector.shape_cast %155 : vector<8xf32> to vector<8x1xf32>
    %157 = vector.broadcast %156 : vector<8x1xf32> to vector<8x8xf32>
    %158 = arith.subf %154, %157 : vector<8x8xf32>
    %159 = math.exp %158 : vector<8x8xf32>
    %cst_54 = arith.constant dense<0.000000e+00> : vector<8xf32>
    %160 = vector.multi_reduction <add>, %159, %cst_54 [1] : vector<8x8xf32> to vector<8xf32>
    %161 = vector.shape_cast %160 : vector<8xf32> to vector<8x1xf32>
    %162 = tpu.reciprocal %161 {approx = true} : vector<8x1xf32> -> vector<8x1xf32>
    %163 = vector.broadcast %162 : vector<8x1xf32> to vector<8x8xf32>
    %164 = arith.mulf %159, %163 : vector<8x8xf32>
    %cst_55 = arith.constant dense<0.000000e+00> : vector<8x8xf32>
    %165 = tpu.matmul %164, %153, %cst_55 {dimension_numbers = #tpu.dot_dimension_numbers<[1], [0], [0], [1], [0, 0, 1, 1], [], []>} : vector<8x8xf32>, vector<8x8xf32>, vector<8x8xf32> -> vector<8x8xf32>
    %166 = vector.extract_strided_slice %13 {offsets = [0, 16], sizes = [32, 8], strides = [1, 1]} : vector<32x32xbf16> to vector<32x8xbf16>
    %167 = arith.truncf %165 : vector<8x8xf32> to vector<8x8xbf16>
    %cst_56 = arith.constant dense<0.000000e+00> : vector<8x32xf32>
    %168 = tpu.matmul %167, %166, %cst_56 {dimension_numbers = #tpu.dot_dimension_numbers<[1], [1], [0], [0], [0, 0, 1, 0], [], []>} : vector<8x8xbf16>, vector<32x8xbf16>, vector<8x32xf32> -> vector<8x32xf32>
    %169 = arith.addf %148, %168 : vector<8x32xf32>
    %170 = vector.extract_strided_slice %103 {offsets = [0, 24], sizes = [8, 8], strides = [1, 1]} : vector<8x32xf32> to vector<8x8xf32>
    %cst_57 = arith.constant 0.353553385 : f32
    %171 = vector.broadcast %cst_57 : f32 to vector<8x8xf32>
    %172 = arith.mulf %170, %171 : vector<8x8xf32>
    %173 = vector.extract_strided_slice %104 {offsets = [0, 24], sizes = [8, 8], strides = [1, 1]} : vector<8x32xf32> to vector<8x8xf32>
    %174 = vector.extract_strided_slice %105 {offsets = [0, 24], sizes = [8, 8], strides = [1, 1]} : vector<8x32xf32> to vector<8x8xf32>
    %cst_58 = arith.constant dense<0.000000e+00> : vector<8x8xf32>
    %175 = tpu.matmul %172, %173, %cst_58 {dimension_numbers = #tpu.dot_dimension_numbers<[1], [1], [0], [0], [0, 0, 1, 0], [], []>} : vector<8x8xf32>, vector<8x8xf32>, vector<8x8xf32> -> vector<8x8xf32>
    %cst_59 = arith.constant dense<0xFF800000> : vector<8xf32>
    %176 = vector.multi_reduction <maximumf>, %175, %cst_59 [1] : vector<8x8xf32> to vector<8xf32>
    %177 = vector.shape_cast %176 : vector<8xf32> to vector<8x1xf32>
    %178 = vector.broadcast %177 : vector<8x1xf32> to vector<8x8xf32>
    %179 = arith.subf %175, %178 : vector<8x8xf32>
    %180 = math.exp %179 : vector<8x8xf32>
    %cst_60 = arith.constant dense<0.000000e+00> : vector<8xf32>
    %181 = vector.multi_reduction <add>, %180, %cst_60 [1] : vector<8x8xf32> to vector<8xf32>
    %182 = vector.shape_cast %181 : vector<8xf32> to vector<8x1xf32>
    %183 = tpu.reciprocal %182 {approx = true} : vector<8x1xf32> -> vector<8x1xf32>
    %184 = vector.broadcast %183 : vector<8x1xf32> to vector<8x8xf32>
    %185 = arith.mulf %180, %184 : vector<8x8xf32>
    %cst_61 = arith.constant dense<0.000000e+00> : vector<8x8xf32>
    %186 = tpu.matmul %185, %174, %cst_61 {dimension_numbers = #tpu.dot_dimension_numbers<[1], [0], [0], [1], [0, 0, 1, 1], [], []>} : vector<8x8xf32>, vector<8x8xf32>, vector<8x8xf32> -> vector<8x8xf32>
    %187 = vector.extract_strided_slice %13 {offsets = [0, 24], sizes = [32, 8], strides = [1, 1]} : vector<32x32xbf16> to vector<32x8xbf16>
    %188 = arith.truncf %186 : vector<8x8xf32> to vector<8x8xbf16>
    %cst_62 = arith.constant dense<0.000000e+00> : vector<8x32xf32>
    %189 = tpu.matmul %188, %187, %cst_62 {dimension_numbers = #tpu.dot_dimension_numbers<[1], [1], [0], [0], [0, 0, 1, 0], [], []>} : vector<8x8xbf16>, vector<32x8xbf16>, vector<8x32xf32> -> vector<8x32xf32>
    %190 = arith.addf %169, %189 : vector<8x32xf32>
    %c8 = arith.constant 8 : index
    %c0_63 = arith.constant 0 : index
    %191 = vector.load %arg25[%c8, %c0_63] : memref<16x32xf32, #tpu.memory_space<vmem>>, vector<8x32xf32>
    tpu.vector_store %arg25[%c8, %c0_63], %190 {strides = array<i32>} : memref<16x32xf32, #tpu.memory_space<vmem>>, vector<8x32xf32>,
    %c0_64 = arith.constant 0 : index
    %c0_65 = arith.constant 0 : index
    %192 = vector.load %arg25[%c0_64, %c0_65] : memref<16x32xf32, #tpu.memory_space<vmem>>, vector<16x32xf32>
    %c0_66 = arith.constant 0 : index
    %c0_67 = arith.constant 0 : index
    %c0_68 = arith.constant 0 : index
    %193 = vector.load %arg6[%c0_66, %c0_67, %c0_68] : memref<1x1x32xf32, #tpu.memory_space<vmem>>, vector<1x1x32xf32>
    %194 = vector.shape_cast %193 : vector<1x1x32xf32> to vector<1x32xf32>
    %195 = vector.broadcast %194 : vector<1x32xf32> to vector<16x32xf32>
    %196 = arith.addf %192, %195 : vector<16x32xf32>
    %197 = arith.addf %3, %196 : vector<16x32xf32>
    %cst_69 = arith.constant dense<0.000000e+00> : vector<16xf32>
    %198 = vector.multi_reduction <add>, %197, %cst_69 [1] : vector<16x32xf32> to vector<16xf32>
    %199 = vector.shape_cast %198 : vector<16xf32> to vector<16x1xf32>
    %cst_70 = arith.constant 3.200000e+01 : f32
    %200 = vector.broadcast %cst_70 : f32 to vector<16x1xf32>
    %201 = arith.divf %199, %200 : vector<16x1xf32>
    %202 = vector.broadcast %201 : vector<16x1xf32> to vector<16x32xf32>
    %203 = arith.subf %197, %202 : vector<16x32xf32>
    %204 = arith.mulf %203, %203 : vector<16x32xf32>
    %cst_71 = arith.constant dense<0.000000e+00> : vector<16xf32>
    %205 = vector.multi_reduction <add>, %204, %cst_71 [1] : vector<16x32xf32> to vector<16xf32>
    %206 = vector.shape_cast %205 : vector<16xf32> to vector<16x1xf32>
    %cst_72 = arith.constant 3.200000e+01 : f32
    %207 = vector.broadcast %cst_72 : f32 to vector<16x1xf32>
    %208 = arith.divf %206, %207 : vector<16x1xf32>
    %cst_73 = arith.constant 9.99999974E-6 : f32
    %209 = vector.broadcast %cst_73 : f32 to vector<16x1xf32>
    %210 = arith.addf %208, %209 : vector<16x1xf32>
    %211 = math.rsqrt %210 : vector<16x1xf32>
    %212 = vector.broadcast %211 : vector<16x1xf32> to vector<16x32xf32>
    %213 = arith.mulf %203, %212 : vector<16x32xf32>
    %c0_74 = arith.constant 0 : index
    %c0_75 = arith.constant 0 : index
    %c0_76 = arith.constant 0 : index
    %214 = vector.load %arg15[%c0_74, %c0_75, %c0_76] : memref<1x1x32xf32, #tpu.memory_space<vmem>>, vector<1x1x32xf32>
    %215 = vector.shape_cast %214 : vector<1x1x32xf32> to vector<1x32xf32>
    %216 = vector.broadcast %215 : vector<1x32xf32> to vector<16x32xf32>
    %217 = arith.mulf %213, %216 : vector<16x32xf32>
    %c0_77 = arith.constant 0 : index
    %c0_78 = arith.constant 0 : index
    %c0_79 = arith.constant 0 : index
    %218 = vector.load %arg16[%c0_77, %c0_78, %c0_79] : memref<1x1x32xf32, #tpu.memory_space<vmem>>, vector<1x1x32xf32>
    %219 = vector.shape_cast %218 : vector<1x1x32xf32> to vector<1x32xf32>
    %220 = vector.broadcast %219 : vector<1x32xf32> to vector<16x32xf32>
    %221 = arith.addf %217, %220 : vector<16x32xf32>
    %c0_80 = arith.constant 0 : index
    %c0_81 = arith.constant 0 : index
    %c0_82 = arith.constant 0 : index
    %222 = vector.load %arg7[%c0_80, %c0_81, %c0_82] : memref<1x96x32xbf16, #tpu.memory_space<vmem>>, vector<1x96x32xbf16>
    %223 = vector.shape_cast %222 : vector<1x96x32xbf16> to vector<96x32xbf16>
    %c0_83 = arith.constant 0 : index
    %c0_84 = arith.constant 0 : index
    %c0_85 = arith.constant 0 : index
    %224 = vector.load %arg8[%c0_83, %c0_84, %c0_85] : memref<1x1x96xf32, #tpu.memory_space<vmem>>, vector<1x1x96xf32>
    %225 = vector.shape_cast %224 : vector<1x1x96xf32> to vector<1x96xf32>
    %c0_86 = arith.constant 0 : index
    %c0_87 = arith.constant 0 : index
    %c0_88 = arith.constant 0 : index
    %226 = vector.load %arg9[%c0_86, %c0_87, %c0_88] : memref<1x32x32xbf16, #tpu.memory_space<vmem>>, vector<1x32x32xbf16>
    %227 = vector.shape_cast %226 : vector<1x32x32xbf16> to vector<32x32xbf16>
    %228 = vector.extract_strided_slice %223 {offsets = [0, 0], sizes = [32, 32], strides = [1, 1]} : vector<96x32xbf16> to vector<32x32xbf16>
    %229 = arith.truncf %221 : vector<16x32xf32> to vector<16x32xbf16>
    %cst_89 = arith.constant dense<0.000000e+00> : vector<16x32xf32>
    %230 = tpu.matmul %229, %228, %cst_89 {dimension_numbers = #tpu.dot_dimension_numbers<[1], [1], [0], [0], [0, 0, 1, 0], [], []>} : vector<16x32xbf16>, vector<32x32xbf16>, vector<16x32xf32> -> vector<16x32xf32>
    %231 = vector.extract_strided_slice %225 {offsets = [0, 0], sizes = [1, 32], strides = [1, 1]} : vector<1x96xf32> to vector<1x32xf32>
    %232 = vector.broadcast %231 : vector<1x32xf32> to vector<16x32xf32>
    %233 = arith.addf %230, %232 : vector<16x32xf32>
    %c0_90 = arith.constant 0 : index
    %c0_91 = arith.constant 0 : index
    %c0_92 = arith.constant 0 : index
    %234 = vector.load %arg2[%c0_90, %c0_91, %c0_92] : memref<2x10x32xf32, #tpu.memory_space<vmem>>, vector<1x10x32xf32>
    %235 = vector.shape_cast %234 : vector<1x10x32xf32> to vector<10x32xf32>
    %236 = vector.extract_strided_slice %223 {offsets = [32, 0], sizes = [64, 32], strides = [1, 1]} : vector<96x32xbf16> to vector<64x32xbf16>
    %237 = arith.truncf %235 : vector<10x32xf32> to vector<10x32xbf16>
    %cst_93 = arith.constant dense<0.000000e+00> : vector<10x64xf32>
    %238 = tpu.matmul %237, %236, %cst_93 {dimension_numbers = #tpu.dot_dimension_numbers<[1], [1], [0], [0], [0, 0, 1, 0], [], []>} : vector<10x32xbf16>, vector<64x32xbf16>, vector<10x64xf32> -> vector<10x64xf32>
    %239 = vector.extract_strided_slice %225 {offsets = [0, 32], sizes = [1, 64], strides = [1, 1]} : vector<1x96xf32> to vector<1x64xf32>
    %240 = vector.broadcast %239 : vector<1x64xf32> to vector<10x64xf32>
    %241 = arith.addf %238, %240 : vector<10x64xf32>
    %242 = vector.extract_strided_slice %233 {offsets = [0, 0], sizes = [8, 32], strides = [1, 1]} : vector<16x32xf32> to vector<8x32xf32>
    %243 = vector.extract_strided_slice %241 {offsets = [0, 0], sizes = [10, 32], strides = [1, 1]} : vector<10x64xf32> to vector<10x32xf32>
    %244 = vector.extract_strided_slice %241 {offsets = [0, 32], sizes = [10, 32], strides = [1, 1]} : vector<10x64xf32> to vector<10x32xf32>
    %cst_94 = arith.constant 0.000000e+00 : f32
    %245 = vector.broadcast %cst_94 : f32 to vector<8x32xf32>
    %246 = vector.extract_strided_slice %242 {offsets = [0, 0], sizes = [8, 8], strides = [1, 1]} : vector<8x32xf32> to vector<8x8xf32>
    %cst_95 = arith.constant 0.353553385 : f32
    %247 = vector.broadcast %cst_95 : f32 to vector<8x8xf32>
    %248 = arith.mulf %246, %247 : vector<8x8xf32>
    %249 = vector.extract_strided_slice %243 {offsets = [0, 0], sizes = [10, 8], strides = [1, 1]} : vector<10x32xf32> to vector<10x8xf32>
    %250 = vector.extract_strided_slice %244 {offsets = [0, 0], sizes = [10, 8], strides = [1, 1]} : vector<10x32xf32> to vector<10x8xf32>
    %cst_96 = arith.constant dense<0.000000e+00> : vector<8x10xf32>
    %251 = tpu.matmul %248, %249, %cst_96 {dimension_numbers = #tpu.dot_dimension_numbers<[1], [1], [0], [0], [0, 0, 1, 0], [], []>} : vector<8x8xf32>, vector<10x8xf32>, vector<8x10xf32> -> vector<8x10xf32>
    %cst_97 = arith.constant dense<0xFF800000> : vector<8xf32>
    %252 = vector.multi_reduction <maximumf>, %251, %cst_97 [1] : vector<8x10xf32> to vector<8xf32>
    %253 = vector.shape_cast %252 : vector<8xf32> to vector<8x1xf32>
    %254 = vector.broadcast %253 : vector<8x1xf32> to vector<8x10xf32>
    %255 = arith.subf %251, %254 : vector<8x10xf32>
    %256 = math.exp %255 : vector<8x10xf32>
    %cst_98 = arith.constant dense<0.000000e+00> : vector<8xf32>
    %257 = vector.multi_reduction <add>, %256, %cst_98 [1] : vector<8x10xf32> to vector<8xf32>
    %258 = vector.shape_cast %257 : vector<8xf32> to vector<8x1xf32>
    %259 = tpu.reciprocal %258 {approx = true} : vector<8x1xf32> -> vector<8x1xf32>
    %260 = vector.broadcast %259 : vector<8x1xf32> to vector<8x10xf32>
    %261 = arith.mulf %256, %260 : vector<8x10xf32>
    %cst_99 = arith.constant dense<0.000000e+00> : vector<8x8xf32>
    %262 = tpu.matmul %261, %250, %cst_99 {dimension_numbers = #tpu.dot_dimension_numbers<[1], [0], [0], [1], [0, 0, 1, 1], [], []>} : vector<8x10xf32>, vector<10x8xf32>, vector<8x8xf32> -> vector<8x8xf32>
    %263 = vector.extract_strided_slice %227 {offsets = [0, 0], sizes = [32, 8], strides = [1, 1]} : vector<32x32xbf16> to vector<32x8xbf16>
    %264 = arith.truncf %262 : vector<8x8xf32> to vector<8x8xbf16>
    %cst_100 = arith.constant dense<0.000000e+00> : vector<8x32xf32>
    %265 = tpu.matmul %264, %263, %cst_100 {dimension_numbers = #tpu.dot_dimension_numbers<[1], [1], [0], [0], [0, 0, 1, 0], [], []>} : vector<8x8xbf16>, vector<32x8xbf16>, vector<8x32xf32> -> vector<8x32xf32>
    %266 = arith.addf %245, %265 : vector<8x32xf32>
    %267 = vector.extract_strided_slice %242 {offsets = [0, 8], sizes = [8, 8], strides = [1, 1]} : vector<8x32xf32> to vector<8x8xf32>
    %cst_101 = arith.constant 0.353553385 : f32
    %268 = vector.broadcast %cst_101 : f32 to vector<8x8xf32>
    %269 = arith.mulf %267, %268 : vector<8x8xf32>
    %270 = vector.extract_strided_slice %243 {offsets = [0, 8], sizes = [10, 8], strides = [1, 1]} : vector<10x32xf32> to vector<10x8xf32>
    %271 = vector.extract_strided_slice %244 {offsets = [0, 8], sizes = [10, 8], strides = [1, 1]} : vector<10x32xf32> to vector<10x8xf32>
    %cst_102 = arith.constant dense<0.000000e+00> : vector<8x10xf32>
    %272 = tpu.matmul %269, %270, %cst_102 {dimension_numbers = #tpu.dot_dimension_numbers<[1], [1], [0], [0], [0, 0, 1, 0], [], []>} : vector<8x8xf32>, vector<10x8xf32>, vector<8x10xf32> -> vector<8x10xf32>
    %cst_103 = arith.constant dense<0xFF800000> : vector<8xf32>
    %273 = vector.multi_reduction <maximumf>, %272, %cst_103 [1] : vector<8x10xf32> to vector<8xf32>
    %274 = vector.shape_cast %273 : vector<8xf32> to vector<8x1xf32>
    %275 = vector.broadcast %274 : vector<8x1xf32> to vector<8x10xf32>
    %276 = arith.subf %272, %275 : vector<8x10xf32>
    %277 = math.exp %276 : vector<8x10xf32>
    %cst_104 = arith.constant dense<0.000000e+00> : vector<8xf32>
    %278 = vector.multi_reduction <add>, %277, %cst_104 [1] : vector<8x10xf32> to vector<8xf32>
    %279 = vector.shape_cast %278 : vector<8xf32> to vector<8x1xf32>
    %280 = tpu.reciprocal %279 {approx = true} : vector<8x1xf32> -> vector<8x1xf32>
    %281 = vector.broadcast %280 : vector<8x1xf32> to vector<8x10xf32>
    %282 = arith.mulf %277, %281 : vector<8x10xf32>
    %cst_105 = arith.constant dense<0.000000e+00> : vector<8x8xf32>
    %283 = tpu.matmul %282, %271, %cst_105 {dimension_numbers = #tpu.dot_dimension_numbers<[1], [0], [0], [1], [0, 0, 1, 1], [], []>} : vector<8x10xf32>, vector<10x8xf32>, vector<8x8xf32> -> vector<8x8xf32>
    %284 = vector.extract_strided_slice %227 {offsets = [0, 8], sizes = [32, 8], strides = [1, 1]} : vector<32x32xbf16> to vector<32x8xbf16>
    %285 = arith.truncf %283 : vector<8x8xf32> to vector<8x8xbf16>
    %cst_106 = arith.constant dense<0.000000e+00> : vector<8x32xf32>
    %286 = tpu.matmul %285, %284, %cst_106 {dimension_numbers = #tpu.dot_dimension_numbers<[1], [1], [0], [0], [0, 0, 1, 0], [], []>} : vector<8x8xbf16>, vector<32x8xbf16>, vector<8x32xf32> -> vector<8x32xf32>
    %287 = arith.addf %266, %286 : vector<8x32xf32>
    %288 = vector.extract_strided_slice %242 {offsets = [0, 16], sizes = [8, 8], strides = [1, 1]} : vector<8x32xf32> to vector<8x8xf32>
    %cst_107 = arith.constant 0.353553385 : f32
    %289 = vector.broadcast %cst_107 : f32 to vector<8x8xf32>
    %290 = arith.mulf %288, %289 : vector<8x8xf32>
    %291 = vector.extract_strided_slice %243 {offsets = [0, 16], sizes = [10, 8], strides = [1, 1]} : vector<10x32xf32> to vector<10x8xf32>
    %292 = vector.extract_strided_slice %244 {offsets = [0, 16], sizes = [10, 8], strides = [1, 1]} : vector<10x32xf32> to vector<10x8xf32>
    %cst_108 = arith.constant dense<0.000000e+00> : vector<8x10xf32>
    %293 = tpu.matmul %290, %291, %cst_108 {dimension_numbers = #tpu.dot_dimension_numbers<[1], [1], [0], [0], [0, 0, 1, 0], [], []>} : vector<8x8xf32>, vector<10x8xf32>, vector<8x10xf32> -> vector<8x10xf32>
    %cst_109 = arith.constant dense<0xFF800000> : vector<8xf32>
    %294 = vector.multi_reduction <maximumf>, %293, %cst_109 [1] : vector<8x10xf32> to vector<8xf32>
    %295 = vector.shape_cast %294 : vector<8xf32> to vector<8x1xf32>
    %296 = vector.broadcast %295 : vector<8x1xf32> to vector<8x10xf32>
    %297 = arith.subf %293, %296 : vector<8x10xf32>
    %298 = math.exp %297 : vector<8x10xf32>
    %cst_110 = arith.constant dense<0.000000e+00> : vector<8xf32>
    %299 = vector.multi_reduction <add>, %298, %cst_110 [1] : vector<8x10xf32> to vector<8xf32>
    %300 = vector.shape_cast %299 : vector<8xf32> to vector<8x1xf32>
    %301 = tpu.reciprocal %300 {approx = true} : vector<8x1xf32> -> vector<8x1xf32>
    %302 = vector.broadcast %301 : vector<8x1xf32> to vector<8x10xf32>
    %303 = arith.mulf %298, %302 : vector<8x10xf32>
    %cst_111 = arith.constant dense<0.000000e+00> : vector<8x8xf32>
    %304 = tpu.matmul %303, %292, %cst_111 {dimension_numbers = #tpu.dot_dimension_numbers<[1], [0], [0], [1], [0, 0, 1, 1], [], []>} : vector<8x10xf32>, vector<10x8xf32>, vector<8x8xf32> -> vector<8x8xf32>
    %305 = vector.extract_strided_slice %227 {offsets = [0, 16], sizes = [32, 8], strides = [1, 1]} : vector<32x32xbf16> to vector<32x8xbf16>
    %306 = arith.truncf %304 : vector<8x8xf32> to vector<8x8xbf16>
    %cst_112 = arith.constant dense<0.000000e+00> : vector<8x32xf32>
    %307 = tpu.matmul %306, %305, %cst_112 {dimension_numbers = #tpu.dot_dimension_numbers<[1], [1], [0], [0], [0, 0, 1, 0], [], []>} : vector<8x8xbf16>, vector<32x8xbf16>, vector<8x32xf32> -> vector<8x32xf32>
    %308 = arith.addf %287, %307 : vector<8x32xf32>
    %309 = vector.extract_strided_slice %242 {offsets = [0, 24], sizes = [8, 8], strides = [1, 1]} : vector<8x32xf32> to vector<8x8xf32>
    %cst_113 = arith.constant 0.353553385 : f32
    %310 = vector.broadcast %cst_113 : f32 to vector<8x8xf32>
    %311 = arith.mulf %309, %310 : vector<8x8xf32>
    %312 = vector.extract_strided_slice %243 {offsets = [0, 24], sizes = [10, 8], strides = [1, 1]} : vector<10x32xf32> to vector<10x8xf32>
    %313 = vector.extract_strided_slice %244 {offsets = [0, 24], sizes = [10, 8], strides = [1, 1]} : vector<10x32xf32> to vector<10x8xf32>
    %cst_114 = arith.constant dense<0.000000e+00> : vector<8x10xf32>
    %314 = tpu.matmul %311, %312, %cst_114 {dimension_numbers = #tpu.dot_dimension_numbers<[1], [1], [0], [0], [0, 0, 1, 0], [], []>} : vector<8x8xf32>, vector<10x8xf32>, vector<8x10xf32> -> vector<8x10xf32>
    %cst_115 = arith.constant dense<0xFF800000> : vector<8xf32>
    %315 = vector.multi_reduction <maximumf>, %314, %cst_115 [1] : vector<8x10xf32> to vector<8xf32>
    %316 = vector.shape_cast %315 : vector<8xf32> to vector<8x1xf32>
    %317 = vector.broadcast %316 : vector<8x1xf32> to vector<8x10xf32>
    %318 = arith.subf %314, %317 : vector<8x10xf32>
    %319 = math.exp %318 : vector<8x10xf32>
    %cst_116 = arith.constant dense<0.000000e+00> : vector<8xf32>
    %320 = vector.multi_reduction <add>, %319, %cst_116 [1] : vector<8x10xf32> to vector<8xf32>
    %321 = vector.shape_cast %320 : vector<8xf32> to vector<8x1xf32>
    %322 = tpu.reciprocal %321 {approx = true} : vector<8x1xf32> -> vector<8x1xf32>
    %323 = vector.broadcast %322 : vector<8x1xf32> to vector<8x10xf32>
    %324 = arith.mulf %319, %323 : vector<8x10xf32>
    %cst_117 = arith.constant dense<0.000000e+00> : vector<8x8xf32>
    %325 = tpu.matmul %324, %313, %cst_117 {dimension_numbers = #tpu.dot_dimension_numbers<[1], [0], [0], [1], [0, 0, 1, 1], [], []>} : vector<8x10xf32>, vector<10x8xf32>, vector<8x8xf32> -> vector<8x8xf32>
    %326 = vector.extract_strided_slice %227 {offsets = [0, 24], sizes = [32, 8], strides = [1, 1]} : vector<32x32xbf16> to vector<32x8xbf16>
    %327 = arith.truncf %325 : vector<8x8xf32> to vector<8x8xbf16>
    %cst_118 = arith.constant dense<0.000000e+00> : vector<8x32xf32>
    %328 = tpu.matmul %327, %326, %cst_118 {dimension_numbers = #tpu.dot_dimension_numbers<[1], [1], [0], [0], [0, 0, 1, 0], [], []>} : vector<8x8xbf16>, vector<32x8xbf16>, vector<8x32xf32> -> vector<8x32xf32>
    %329 = arith.addf %308, %328 : vector<8x32xf32>
    %c0_119 = arith.constant 0 : index
    %c0_120 = arith.constant 0 : index
    %330 = vector.load %arg25[%c0_119, %c0_120] : memref<16x32xf32, #tpu.memory_space<vmem>>, vector<8x32xf32>
    tpu.vector_store %arg25[%c0_119, %c0_120], %329 {strides = array<i32>} : memref<16x32xf32, #tpu.memory_space<vmem>>, vector<8x32xf32>,
    %c1 = arith.constant 1 : index
    %c0_121 = arith.constant 0 : index
    %c0_122 = arith.constant 0 : index
    %331 = vector.load %arg2[%c1, %c0_121, %c0_122] : memref<2x10x32xf32, #tpu.memory_space<vmem>>, vector<1x10x32xf32>
    %332 = vector.shape_cast %331 : vector<1x10x32xf32> to vector<10x32xf32>
    %333 = vector.extract_strided_slice %223 {offsets = [32, 0], sizes = [64, 32], strides = [1, 1]} : vector<96x32xbf16> to vector<64x32xbf16>
    %334 = arith.truncf %332 : vector<10x32xf32> to vector<10x32xbf16>
    %cst_123 = arith.constant dense<0.000000e+00> : vector<10x64xf32>
    %335 = tpu.matmul %334, %333, %cst_123 {dimension_numbers = #tpu.dot_dimension_numbers<[1], [1], [0], [0], [0, 0, 1, 0], [], []>} : vector<10x32xbf16>, vector<64x32xbf16>, vector<10x64xf32> -> vector<10x64xf32>
    %336 = vector.extract_strided_slice %225 {offsets = [0, 32], sizes = [1, 64], strides = [1, 1]} : vector<1x96xf32> to vector<1x64xf32>
    %337 = vector.broadcast %336 : vector<1x64xf32> to vector<10x64xf32>
    %338 = arith.addf %335, %337 : vector<10x64xf32>
    %339 = vector.extract_strided_slice %233 {offsets = [8, 0], sizes = [8, 32], strides = [1, 1]} : vector<16x32xf32> to vector<8x32xf32>
    %340 = vector.extract_strided_slice %338 {offsets = [0, 0], sizes = [10, 32], strides = [1, 1]} : vector<10x64xf32> to vector<10x32xf32>
    %341 = vector.extract_strided_slice %338 {offsets = [0, 32], sizes = [10, 32], strides = [1, 1]} : vector<10x64xf32> to vector<10x32xf32>
    %cst_124 = arith.constant 0.000000e+00 : f32
    %342 = vector.broadcast %cst_124 : f32 to vector<8x32xf32>
    %343 = vector.extract_strided_slice %339 {offsets = [0, 0], sizes = [8, 8], strides = [1, 1]} : vector<8x32xf32> to vector<8x8xf32>
    %cst_125 = arith.constant 0.353553385 : f32
    %344 = vector.broadcast %cst_125 : f32 to vector<8x8xf32>
    %345 = arith.mulf %343, %344 : vector<8x8xf32>
    %346 = vector.extract_strided_slice %340 {offsets = [0, 0], sizes = [10, 8], strides = [1, 1]} : vector<10x32xf32> to vector<10x8xf32>
    %347 = vector.extract_strided_slice %341 {offsets = [0, 0], sizes = [10, 8], strides = [1, 1]} : vector<10x32xf32> to vector<10x8xf32>
    %cst_126 = arith.constant dense<0.000000e+00> : vector<8x10xf32>
    %348 = tpu.matmul %345, %346, %cst_126 {dimension_numbers = #tpu.dot_dimension_numbers<[1], [1], [0], [0], [0, 0, 1, 0], [], []>} : vector<8x8xf32>, vector<10x8xf32>, vector<8x10xf32> -> vector<8x10xf32>
    %cst_127 = arith.constant dense<0xFF800000> : vector<8xf32>
    %349 = vector.multi_reduction <maximumf>, %348, %cst_127 [1] : vector<8x10xf32> to vector<8xf32>
    %350 = vector.shape_cast %349 : vector<8xf32> to vector<8x1xf32>
    %351 = vector.broadcast %350 : vector<8x1xf32> to vector<8x10xf32>
    %352 = arith.subf %348, %351 : vector<8x10xf32>
    %353 = math.exp %352 : vector<8x10xf32>
    %cst_128 = arith.constant dense<0.000000e+00> : vector<8xf32>
    %354 = vector.multi_reduction <add>, %353, %cst_128 [1] : vector<8x10xf32> to vector<8xf32>
    %355 = vector.shape_cast %354 : vector<8xf32> to vector<8x1xf32>
    %356 = tpu.reciprocal %355 {approx = true} : vector<8x1xf32> -> vector<8x1xf32>
    %357 = vector.broadcast %356 : vector<8x1xf32> to vector<8x10xf32>
    %358 = arith.mulf %353, %357 : vector<8x10xf32>
    %cst_129 = arith.constant dense<0.000000e+00> : vector<8x8xf32>
    %359 = tpu.matmul %358, %347, %cst_129 {dimension_numbers = #tpu.dot_dimension_numbers<[1], [0], [0], [1], [0, 0, 1, 1], [], []>} : vector<8x10xf32>, vector<10x8xf32>, vector<8x8xf32> -> vector<8x8xf32>
    %360 = vector.extract_strided_slice %227 {offsets = [0, 0], sizes = [32, 8], strides = [1, 1]} : vector<32x32xbf16> to vector<32x8xbf16>
    %361 = arith.truncf %359 : vector<8x8xf32> to vector<8x8xbf16>
    %cst_130 = arith.constant dense<0.000000e+00> : vector<8x32xf32>
    %362 = tpu.matmul %361, %360, %cst_130 {dimension_numbers = #tpu.dot_dimension_numbers<[1], [1], [0], [0], [0, 0, 1, 0], [], []>} : vector<8x8xbf16>, vector<32x8xbf16>, vector<8x32xf32> -> vector<8x32xf32>
    %363 = arith.addf %342, %362 : vector<8x32xf32>
    %364 = vector.extract_strided_slice %339 {offsets = [0, 8], sizes = [8, 8], strides = [1, 1]} : vector<8x32xf32> to vector<8x8xf32>
    %cst_131 = arith.constant 0.353553385 : f32
    %365 = vector.broadcast %cst_131 : f32 to vector<8x8xf32>
    %366 = arith.mulf %364, %365 : vector<8x8xf32>
    %367 = vector.extract_strided_slice %340 {offsets = [0, 8], sizes = [10, 8], strides = [1, 1]} : vector<10x32xf32> to vector<10x8xf32>
    %368 = vector.extract_strided_slice %341 {offsets = [0, 8], sizes = [10, 8], strides = [1, 1]} : vector<10x32xf32> to vector<10x8xf32>
    %cst_132 = arith.constant dense<0.000000e+00> : vector<8x10xf32>
    %369 = tpu.matmul %366, %367, %cst_132 {dimension_numbers = #tpu.dot_dimension_numbers<[1], [1], [0], [0], [0, 0, 1, 0], [], []>} : vector<8x8xf32>, vector<10x8xf32>, vector<8x10xf32> -> vector<8x10xf32>
    %cst_133 = arith.constant dense<0xFF800000> : vector<8xf32>
    %370 = vector.multi_reduction <maximumf>, %369, %cst_133 [1] : vector<8x10xf32> to vector<8xf32>
    %371 = vector.shape_cast %370 : vector<8xf32> to vector<8x1xf32>
    %372 = vector.broadcast %371 : vector<8x1xf32> to vector<8x10xf32>
    %373 = arith.subf %369, %372 : vector<8x10xf32>
    %374 = math.exp %373 : vector<8x10xf32>
    %cst_134 = arith.constant dense<0.000000e+00> : vector<8xf32>
    %375 = vector.multi_reduction <add>, %374, %cst_134 [1] : vector<8x10xf32> to vector<8xf32>
    %376 = vector.shape_cast %375 : vector<8xf32> to vector<8x1xf32>
    %377 = tpu.reciprocal %376 {approx = true} : vector<8x1xf32> -> vector<8x1xf32>
    %378 = vector.broadcast %377 : vector<8x1xf32> to vector<8x10xf32>
    %379 = arith.mulf %374, %378 : vector<8x10xf32>
    %cst_135 = arith.constant dense<0.000000e+00> : vector<8x8xf32>
    %380 = tpu.matmul %379, %368, %cst_135 {dimension_numbers = #tpu.dot_dimension_numbers<[1], [0], [0], [1], [0, 0, 1, 1], [], []>} : vector<8x10xf32>, vector<10x8xf32>, vector<8x8xf32> -> vector<8x8xf32>
    %381 = vector.extract_strided_slice %227 {offsets = [0, 8], sizes = [32, 8], strides = [1, 1]} : vector<32x32xbf16> to vector<32x8xbf16>
    %382 = arith.truncf %380 : vector<8x8xf32> to vector<8x8xbf16>
    %cst_136 = arith.constant dense<0.000000e+00> : vector<8x32xf32>
    %383 = tpu.matmul %382, %381, %cst_136 {dimension_numbers = #tpu.dot_dimension_numbers<[1], [1], [0], [0], [0, 0, 1, 0], [], []>} : vector<8x8xbf16>, vector<32x8xbf16>, vector<8x32xf32> -> vector<8x32xf32>
    %384 = arith.addf %363, %383 : vector<8x32xf32>
    %385 = vector.extract_strided_slice %339 {offsets = [0, 16], sizes = [8, 8], strides = [1, 1]} : vector<8x32xf32> to vector<8x8xf32>
    %cst_137 = arith.constant 0.353553385 : f32
    %386 = vector.broadcast %cst_137 : f32 to vector<8x8xf32>
    %387 = arith.mulf %385, %386 : vector<8x8xf32>
    %388 = vector.extract_strided_slice %340 {offsets = [0, 16], sizes = [10, 8], strides = [1, 1]} : vector<10x32xf32> to vector<10x8xf32>
    %389 = vector.extract_strided_slice %341 {offsets = [0, 16], sizes = [10, 8], strides = [1, 1]} : vector<10x32xf32> to vector<10x8xf32>
    %cst_138 = arith.constant dense<0.000000e+00> : vector<8x10xf32>
    %390 = tpu.matmul %387, %388, %cst_138 {dimension_numbers = #tpu.dot_dimension_numbers<[1], [1], [0], [0], [0, 0, 1, 0], [], []>} : vector<8x8xf32>, vector<10x8xf32>, vector<8x10xf32> -> vector<8x10xf32>
    %cst_139 = arith.constant dense<0xFF800000> : vector<8xf32>
    %391 = vector.multi_reduction <maximumf>, %390, %cst_139 [1] : vector<8x10xf32> to vector<8xf32>
    %392 = vector.shape_cast %391 : vector<8xf32> to vector<8x1xf32>
    %393 = vector.broadcast %392 : vector<8x1xf32> to vector<8x10xf32>
    %394 = arith.subf %390, %393 : vector<8x10xf32>
    %395 = math.exp %394 : vector<8x10xf32>
    %cst_140 = arith.constant dense<0.000000e+00> : vector<8xf32>
    %396 = vector.multi_reduction <add>, %395, %cst_140 [1] : vector<8x10xf32> to vector<8xf32>
    %397 = vector.shape_cast %396 : vector<8xf32> to vector<8x1xf32>
    %398 = tpu.reciprocal %397 {approx = true} : vector<8x1xf32> -> vector<8x1xf32>
    %399 = vector.broadcast %398 : vector<8x1xf32> to vector<8x10xf32>
    %400 = arith.mulf %395, %399 : vector<8x10xf32>
    %cst_141 = arith.constant dense<0.000000e+00> : vector<8x8xf32>
    %401 = tpu.matmul %400, %389, %cst_141 {dimension_numbers = #tpu.dot_dimension_numbers<[1], [0], [0], [1], [0, 0, 1, 1], [], []>} : vector<8x10xf32>, vector<10x8xf32>, vector<8x8xf32> -> vector<8x8xf32>
    %402 = vector.extract_strided_slice %227 {offsets = [0, 16], sizes = [32, 8], strides = [1, 1]} : vector<32x32xbf16> to vector<32x8xbf16>
    %403 = arith.truncf %401 : vector<8x8xf32> to vector<8x8xbf16>
    %cst_142 = arith.constant dense<0.000000e+00> : vector<8x32xf32>
    %404 = tpu.matmul %403, %402, %cst_142 {dimension_numbers = #tpu.dot_dimension_numbers<[1], [1], [0], [0], [0, 0, 1, 0], [], []>} : vector<8x8xbf16>, vector<32x8xbf16>, vector<8x32xf32> -> vector<8x32xf32>
    %405 = arith.addf %384, %404 : vector<8x32xf32>
    %406 = vector.extract_strided_slice %339 {offsets = [0, 24], sizes = [8, 8], strides = [1, 1]} : vector<8x32xf32> to vector<8x8xf32>
    %cst_143 = arith.constant 0.353553385 : f32
    %407 = vector.broadcast %cst_143 : f32 to vector<8x8xf32>
    %408 = arith.mulf %406, %407 : vector<8x8xf32>
    %409 = vector.extract_strided_slice %340 {offsets = [0, 24], sizes = [10, 8], strides = [1, 1]} : vector<10x32xf32> to vector<10x8xf32>
    %410 = vector.extract_strided_slice %341 {offsets = [0, 24], sizes = [10, 8], strides = [1, 1]} : vector<10x32xf32> to vector<10x8xf32>
    %cst_144 = arith.constant dense<0.000000e+00> : vector<8x10xf32>
    %411 = tpu.matmul %408, %409, %cst_144 {dimension_numbers = #tpu.dot_dimension_numbers<[1], [1], [0], [0], [0, 0, 1, 0], [], []>} : vector<8x8xf32>, vector<10x8xf32>, vector<8x10xf32> -> vector<8x10xf32>
    %cst_145 = arith.constant dense<0xFF800000> : vector<8xf32>
    %412 = vector.multi_reduction <maximumf>, %411, %cst_145 [1] : vector<8x10xf32> to vector<8xf32>
    %413 = vector.shape_cast %412 : vector<8xf32> to vector<8x1xf32>
    %414 = vector.broadcast %413 : vector<8x1xf32> to vector<8x10xf32>
    %415 = arith.subf %411, %414 : vector<8x10xf32>
    %416 = math.exp %415 : vector<8x10xf32>
    %cst_146 = arith.constant dense<0.000000e+00> : vector<8xf32>
    %417 = vector.multi_reduction <add>, %416, %cst_146 [1] : vector<8x10xf32> to vector<8xf32>
    %418 = vector.shape_cast %417 : vector<8xf32> to vector<8x1xf32>
    %419 = tpu.reciprocal %418 {approx = true} : vector<8x1xf32> -> vector<8x1xf32>
    %420 = vector.broadcast %419 : vector<8x1xf32> to vector<8x10xf32>
    %421 = arith.mulf %416, %420 : vector<8x10xf32>
    %cst_147 = arith.constant dense<0.000000e+00> : vector<8x8xf32>
    %422 = tpu.matmul %421, %410, %cst_147 {dimension_numbers = #tpu.dot_dimension_numbers<[1], [0], [0], [1], [0, 0, 1, 1], [], []>} : vector<8x10xf32>, vector<10x8xf32>, vector<8x8xf32> -> vector<8x8xf32>
    %423 = vector.extract_strided_slice %227 {offsets = [0, 24], sizes = [32, 8], strides = [1, 1]} : vector<32x32xbf16> to vector<32x8xbf16>
    %424 = arith.truncf %422 : vector<8x8xf32> to vector<8x8xbf16>
    %cst_148 = arith.constant dense<0.000000e+00> : vector<8x32xf32>
    %425 = tpu.matmul %424, %423, %cst_148 {dimension_numbers = #tpu.dot_dimension_numbers<[1], [1], [0], [0], [0, 0, 1, 0], [], []>} : vector<8x8xbf16>, vector<32x8xbf16>, vector<8x32xf32> -> vector<8x32xf32>
    %426 = arith.addf %405, %425 : vector<8x32xf32>
    %c8_149 = arith.constant 8 : index
    %c0_150 = arith.constant 0 : index
    %427 = vector.load %arg25[%c8_149, %c0_150] : memref<16x32xf32, #tpu.memory_space<vmem>>, vector<8x32xf32>
    tpu.vector_store %arg25[%c8_149, %c0_150], %426 {strides = array<i32>} : memref<16x32xf32, #tpu.memory_space<vmem>>, vector<8x32xf32>,
    %c0_151 = arith.constant 0 : index
    %c0_152 = arith.constant 0 : index
    %428 = vector.load %arg25[%c0_151, %c0_152] : memref<16x32xf32, #tpu.memory_space<vmem>>, vector<16x32xf32>
    %c0_153 = arith.constant 0 : index
    %c0_154 = arith.constant 0 : index
    %c0_155 = arith.constant 0 : index
    %429 = vector.load %arg10[%c0_153, %c0_154, %c0_155] : memref<1x1x32xf32, #tpu.memory_space<vmem>>, vector<1x1x32xf32>
    %430 = vector.shape_cast %429 : vector<1x1x32xf32> to vector<1x32xf32>
    %431 = vector.broadcast %430 : vector<1x32xf32> to vector<16x32xf32>
    %432 = arith.addf %428, %431 : vector<16x32xf32>
    %433 = arith.addf %221, %432 : vector<16x32xf32>
    %cst_156 = arith.constant dense<0.000000e+00> : vector<16xf32>
    %434 = vector.multi_reduction <add>, %433, %cst_156 [1] : vector<16x32xf32> to vector<16xf32>
    %435 = vector.shape_cast %434 : vector<16xf32> to vector<16x1xf32>
    %cst_157 = arith.constant 3.200000e+01 : f32
    %436 = vector.broadcast %cst_157 : f32 to vector<16x1xf32>
    %437 = arith.divf %435, %436 : vector<16x1xf32>
    %438 = vector.broadcast %437 : vector<16x1xf32> to vector<16x32xf32>
    %439 = arith.subf %433, %438 : vector<16x32xf32>
    %440 = arith.mulf %439, %439 : vector<16x32xf32>
    %cst_158 = arith.constant dense<0.000000e+00> : vector<16xf32>
    %441 = vector.multi_reduction <add>, %440, %cst_158 [1] : vector<16x32xf32> to vector<16xf32>
    %442 = vector.shape_cast %441 : vector<16xf32> to vector<16x1xf32>
    %cst_159 = arith.constant 3.200000e+01 : f32
    %443 = vector.broadcast %cst_159 : f32 to vector<16x1xf32>
    %444 = arith.divf %442, %443 : vector<16x1xf32>
    %cst_160 = arith.constant 9.99999974E-6 : f32
    %445 = vector.broadcast %cst_160 : f32 to vector<16x1xf32>
    %446 = arith.addf %444, %445 : vector<16x1xf32>
    %447 = math.rsqrt %446 : vector<16x1xf32>
    %448 = vector.broadcast %447 : vector<16x1xf32> to vector<16x32xf32>
    %449 = arith.mulf %439, %448 : vector<16x32xf32>
    %c0_161 = arith.constant 0 : index
    %c0_162 = arith.constant 0 : index
    %c0_163 = arith.constant 0 : index
    %450 = vector.load %arg17[%c0_161, %c0_162, %c0_163] : memref<1x1x32xf32, #tpu.memory_space<vmem>>, vector<1x1x32xf32>
    %451 = vector.shape_cast %450 : vector<1x1x32xf32> to vector<1x32xf32>
    %452 = vector.broadcast %451 : vector<1x32xf32> to vector<16x32xf32>
    %453 = arith.mulf %449, %452 : vector<16x32xf32>
    %c0_164 = arith.constant 0 : index
    %c0_165 = arith.constant 0 : index
    %c0_166 = arith.constant 0 : index
    %454 = vector.load %arg18[%c0_164, %c0_165, %c0_166] : memref<1x1x32xf32, #tpu.memory_space<vmem>>, vector<1x1x32xf32>
    %455 = vector.shape_cast %454 : vector<1x1x32xf32> to vector<1x32xf32>
    %456 = vector.broadcast %455 : vector<1x32xf32> to vector<16x32xf32>
    %457 = arith.addf %453, %456 : vector<16x32xf32>
    %c0_167 = arith.constant 0 : index
    %c0_168 = arith.constant 0 : index
    %c0_169 = arith.constant 0 : index
    %458 = vector.load %arg11[%c0_167, %c0_168, %c0_169] : memref<1x2048x32xbf16, #tpu.memory_space<vmem>>, vector<1x2048x32xbf16>
    %459 = vector.shape_cast %458 : vector<1x2048x32xbf16> to vector<2048x32xbf16>
    %460 = arith.truncf %457 : vector<16x32xf32> to vector<16x32xbf16>
    %cst_170 = arith.constant dense<0.000000e+00> : vector<16x2048xf32>
    %461 = tpu.matmul %460, %459, %cst_170 {dimension_numbers = #tpu.dot_dimension_numbers<[1], [1], [0], [0], [0, 0, 1, 0], [], []>} : vector<16x32xbf16>, vector<2048x32xbf16>, vector<16x2048xf32> -> vector<16x2048xf32>
    %c0_171 = arith.constant 0 : index
    %c0_172 = arith.constant 0 : index
    %c0_173 = arith.constant 0 : index
    %462 = vector.load %arg12[%c0_171, %c0_172, %c0_173] : memref<1x1x2048xf32, #tpu.memory_space<vmem>>, vector<1x1x2048xf32>
    %463 = vector.shape_cast %462 : vector<1x1x2048xf32> to vector<1x2048xf32>
    %464 = vector.broadcast %463 : vector<1x2048xf32> to vector<16x2048xf32>
    %465 = arith.addf %461, %464 : vector<16x2048xf32>
    %cst_174 = arith.constant 0.000000e+00 : f32
    %466 = vector.broadcast %cst_174 : f32 to vector<16x2048xf32>
    %467 = arith.maximumf %465, %466 : vector<16x2048xf32>
    %c0_175 = arith.constant 0 : index
    %c0_176 = arith.constant 0 : index
    %c0_177 = arith.constant 0 : index
    %468 = vector.load %arg13[%c0_175, %c0_176, %c0_177] : memref<1x32x2048xbf16, #tpu.memory_space<vmem>>, vector<1x32x2048xbf16>
    %469 = vector.shape_cast %468 : vector<1x32x2048xbf16> to vector<32x2048xbf16>
    %470 = arith.truncf %467 : vector<16x2048xf32> to vector<16x2048xbf16>
    %cst_178 = arith.constant dense<0.000000e+00> : vector<16x32xf32>
    %471 = tpu.matmul %470, %469, %cst_178 {dimension_numbers = #tpu.dot_dimension_numbers<[1], [1], [0], [0], [0, 0, 1, 0], [], []>} : vector<16x2048xbf16>, vector<32x2048xbf16>, vector<16x32xf32> -> vector<16x32xf32>
    %c0_179 = arith.constant 0 : index
    %c0_180 = arith.constant 0 : index
    %c0_181 = arith.constant 0 : index
    %472 = vector.load %arg14[%c0_179, %c0_180, %c0_181] : memref<1x1x32xf32, #tpu.memory_space<vmem>>, vector<1x1x32xf32>
    %473 = vector.shape_cast %472 : vector<1x1x32xf32> to vector<1x32xf32>
    %474 = vector.broadcast %473 : vector<1x32xf32> to vector<16x32xf32>
    %475 = arith.addf %471, %474 : vector<16x32xf32>
    %476 = arith.addf %457, %475 : vector<16x32xf32>
    %cst_182 = arith.constant dense<0.000000e+00> : vector<16xf32>
    %477 = vector.multi_reduction <add>, %476, %cst_182 [1] : vector<16x32xf32> to vector<16xf32>
    %478 = vector.shape_cast %477 : vector<16xf32> to vector<16x1xf32>
    %cst_183 = arith.constant 3.200000e+01 : f32
    %479 = vector.broadcast %cst_183 : f32 to vector<16x1xf32>
    %480 = arith.divf %478, %479 : vector<16x1xf32>
    %481 = vector.broadcast %480 : vector<16x1xf32> to vector<16x32xf32>
    %482 = arith.subf %476, %481 : vector<16x32xf32>
    %483 = arith.mulf %482, %482 : vector<16x32xf32>
    %cst_184 = arith.constant dense<0.000000e+00> : vector<16xf32>
    %484 = vector.multi_reduction <add>, %483, %cst_184 [1] : vector<16x32xf32> to vector<16xf32>
    %485 = vector.shape_cast %484 : vector<16xf32> to vector<16x1xf32>
    %cst_185 = arith.constant 3.200000e+01 : f32
    %486 = vector.broadcast %cst_185 : f32 to vector<16x1xf32>
    %487 = arith.divf %485, %486 : vector<16x1xf32>
    %cst_186 = arith.constant 9.99999974E-6 : f32
    %488 = vector.broadcast %cst_186 : f32 to vector<16x1xf32>
    %489 = arith.addf %487, %488 : vector<16x1xf32>
    %490 = math.rsqrt %489 : vector<16x1xf32>
    %491 = vector.broadcast %490 : vector<16x1xf32> to vector<16x32xf32>
    %492 = arith.mulf %482, %491 : vector<16x32xf32>
    %c0_187 = arith.constant 0 : index
    %c0_188 = arith.constant 0 : index
    %c0_189 = arith.constant 0 : index
    %493 = vector.load %arg19[%c0_187, %c0_188, %c0_189] : memref<1x1x32xf32, #tpu.memory_space<vmem>>, vector<1x1x32xf32>
    %494 = vector.shape_cast %493 : vector<1x1x32xf32> to vector<1x32xf32>
    %495 = vector.broadcast %494 : vector<1x32xf32> to vector<16x32xf32>
    %496 = arith.mulf %492, %495 : vector<16x32xf32>
    %c0_190 = arith.constant 0 : index
    %c0_191 = arith.constant 0 : index
    %c0_192 = arith.constant 0 : index
    %497 = vector.load %arg20[%c0_190, %c0_191, %c0_192] : memref<1x1x32xf32, #tpu.memory_space<vmem>>, vector<1x1x32xf32>
    %498 = vector.shape_cast %497 : vector<1x1x32xf32> to vector<1x32xf32>
    %499 = vector.broadcast %498 : vector<1x32xf32> to vector<16x32xf32>
    %500 = arith.addf %496, %499 : vector<16x32xf32>
    %c0_193 = arith.constant 0 : index
    %c0_194 = arith.constant 0 : index
    %501 = vector.load %arg24[%c0_193, %c0_194] : memref<16x32xf32, #tpu.memory_space<vmem>>, vector<16x32xf32>
    tpu.vector_store %arg24[%c0_193, %c0_194], %500 {strides = array<i32>} : memref<16x32xf32, #tpu.memory_space<vmem>>, vector<16x32xf32>,
    %c1_i32 = arith.constant 1 : i32
    %502 = arith.cmpi eq, %arg0, %c1_i32 : i32
    %503 = arith.extui %502 : i1 to i32
    %c0_i32_195 = arith.constant 0 : i32
    %504 = arith.cmpi ne, %503, %c0_i32_195 : i32
    scf.if %504 {
      %c0_196 = arith.constant 0 : index
      %c0_197 = arith.constant 0 : index
      %505 = vector.load %arg21[%c0_196, %c0_197] : memref<64x32xbf16, #tpu.memory_space<vmem>>, vector<64x32xbf16>
      %506 = arith.truncf %500 : vector<16x32xf32> to vector<16x32xbf16>
      %cst_198 = arith.constant dense<0.000000e+00> : vector<16x64xf32>
      %507 = tpu.matmul %506, %505, %cst_198 {dimension_numbers = #tpu.dot_dimension_numbers<[1], [1], [0], [0], [0, 0, 1, 0], [], []>} : vector<16x32xbf16>, vector<64x32xbf16>, vector<16x64xf32> -> vector<16x64xf32>
      %c0_199 = arith.constant 0 : index
      %c0_200 = arith.constant 0 : index
      %508 = vector.load %arg22[%c0_199, %c0_200] : memref<1x64xf32, #tpu.memory_space<vmem>>, vector<1x64xf32>
      %509 = vector.broadcast %508 : vector<1x64xf32> to vector<16x64xf32>
      %510 = arith.addf %507, %509 : vector<16x64xf32>
      %c0_201 = arith.constant 0 : index
      %c0_202 = arith.constant 0 : index
      %511 = vector.load %arg23[%c0_201, %c0_202] : memref<16x64xf32, #tpu.memory_space<vmem>>, vector<16x64xf32>
      tpu.vector_store %arg23[%c0_201, %c0_202], %510 {strides = array<i32>} : memref<16x64xf32, #tpu.memory_space<vmem>>, vector<16x64xf32>,
    } else {
    }
    return
  }
  func.func @transform_0(%arg0: i32) -> (i32, i32) {
    %c0_i32 = arith.constant 0 : i32
    %c0_i32_0 = arith.constant 0 : i32
    %c0_i32_1 = arith.constant 0 : i32
    return %c0_i32, %c0_i32_0 : i32, i32
  }
  func.func @transform_1(%arg0: i32) -> (i32, i32, i32) {
    %c0_i32 = arith.constant 0 : i32
    %c0_i32_0 = arith.constant 0 : i32
    %c0_i32_1 = arith.constant 0 : i32
    %c0_i32_2 = arith.constant 0 : i32
    return %c0_i32, %c0_i32_0, %c0_i32_1 : i32, i32, i32
  }
  func.func @transform_2(%arg0: i32) -> (i32, i32, i32) {
    %c0_i32 = arith.constant 0 : i32
    %c0_i32_0 = arith.constant 0 : i32
    %c0_i32_1 = arith.constant 0 : i32
    return %arg0, %c0_i32, %c0_i32_0 : i32, i32, i32
  }
  func.func @transform_3(%arg0: i32) -> (i32, i32, i32) {
    %c0_i32 = arith.constant 0 : i32
    %c0_i32_0 = arith.constant 0 : i32
    %c0_i32_1 = arith.constant 0 : i32
    return %arg0, %c0_i32, %c0_i32_0 : i32, i32, i32
  }
  func.func @transform_4(%arg0: i32) -> (i32, i32, i32) {
    %c0_i32 = arith.constant 0 : i32
    %c0_i32_0 = arith.constant 0 : i32
    %c0_i32_1 = arith.constant 0 : i32
    return %arg0, %c0_i32, %c0_i32_0 : i32, i32, i32
  }
  func.func @transform_5(%arg0: i32) -> (i32, i32, i32) {
    %c0_i32 = arith.constant 0 : i32
    %c0_i32_0 = arith.constant 0 : i32
    %c0_i32_1 = arith.constant 0 : i32
    return %arg0, %c0_i32, %c0_i32_0 : i32, i32, i32
  }
  func.func @transform_6(%arg0: i32) -> (i32, i32, i32) {
    %c0_i32 = arith.constant 0 : i32
    %c0_i32_0 = arith.constant 0 : i32
    %c0_i32_1 = arith.constant 0 : i32
    return %arg0, %c0_i32, %c0_i32_0 : i32, i32, i32
  }
  func.func @transform_7(%arg0: i32) -> (i32, i32, i32) {
    %c0_i32 = arith.constant 0 : i32
    %c0_i32_0 = arith.constant 0 : i32
    %c0_i32_1 = arith.constant 0 : i32
    return %arg0, %c0_i32, %c0_i32_0 : i32, i32, i32
  }
  func.func @transform_8(%arg0: i32) -> (i32, i32, i32) {
    %c0_i32 = arith.constant 0 : i32
    %c0_i32_0 = arith.constant 0 : i32
    %c0_i32_1 = arith.constant 0 : i32
    return %arg0, %c0_i32, %c0_i32_0 : i32, i32, i32
  }
  func.func @transform_9(%arg0: i32) -> (i32, i32, i32) {
    %c0_i32 = arith.constant 0 : i32
    %c0_i32_0 = arith.constant 0 : i32
    %c0_i32_1 = arith.constant 0 : i32
    return %arg0, %c0_i32, %c0_i32_0 : i32, i32, i32
  }
  func.func @transform_10(%arg0: i32) -> (i32, i32, i32) {
    %c0_i32 = arith.constant 0 : i32
    %c0_i32_0 = arith.constant 0 : i32
    %c0_i32_1 = arith.constant 0 : i32
    return %arg0, %c0_i32, %c0_i32_0 : i32, i32, i32
  }
  func.func @transform_11(%arg0: i32) -> (i32, i32, i32) {
    %c0_i32 = arith.constant 0 : i32
    %c0_i32_0 = arith.constant 0 : i32
    %c0_i32_1 = arith.constant 0 : i32
    return %arg0, %c0_i32, %c0_i32_0 : i32, i32, i32
  }
  func.func @transform_12(%arg0: i32) -> (i32, i32, i32) {
    %c0_i32 = arith.constant 0 : i32
    %c0_i32_0 = arith.constant 0 : i32
    %c0_i32_1 = arith.constant 0 : i32
    return %arg0, %c0_i32, %c0_i32_0 : i32, i32, i32
  }
  func.func @transform_13(%arg0: i32) -> (i32, i32, i32) {
    %c0_i32 = arith.constant 0 : i32
    %c0_i32_0 = arith.constant 0 : i32
    %c0_i32_1 = arith.constant 0 : i32
    return %arg0, %c0_i32, %c0_i32_0 : i32, i32, i32
  }
  func.func @transform_14(%arg0: i32) -> (i32, i32, i32) {
    %c0_i32 = arith.constant 0 : i32
    %c0_i32_0 = arith.constant 0 : i32
    %c0_i32_1 = arith.constant 0 : i32
    return %arg0, %c0_i32, %c0_i32_0 : i32, i32, i32
  }
  func.func @transform_15(%arg0: i32) -> (i32, i32, i32) {
    %c0_i32 = arith.constant 0 : i32
    %c0_i32_0 = arith.constant 0 : i32
    %c0_i32_1 = arith.constant 0 : i32
    return %arg0, %c0_i32, %c0_i32_0 : i32, i32, i32
  }
  func.func @transform_16(%arg0: i32) -> (i32, i32, i32) {
    %c0_i32 = arith.constant 0 : i32
    %c0_i32_0 = arith.constant 0 : i32
    %c0_i32_1 = arith.constant 0 : i32
    return %arg0, %c0_i32, %c0_i32_0 : i32, i32, i32
  }
  func.func @transform_17(%arg0: i32) -> (i32, i32, i32) {
    %c0_i32 = arith.constant 0 : i32
    %c0_i32_0 = arith.constant 0 : i32
    %c0_i32_1 = arith.constant 0 : i32
    return %arg0, %c0_i32, %c0_i32_0 : i32, i32, i32
  }
  func.func @transform_18(%arg0: i32) -> (i32, i32, i32) {
    %c0_i32 = arith.constant 0 : i32
    %c0_i32_0 = arith.constant 0 : i32
    %c0_i32_1 = arith.constant 0 : i32
    return %arg0, %c0_i32, %c0_i32_0 : i32, i32, i32
  }
  func.func @transform_19(%arg0: i32) -> (i32, i32, i32) {
    %c0_i32 = arith.constant 0 : i32
    %c0_i32_0 = arith.constant 0 : i32
    %c0_i32_1 = arith.constant 0 : i32
    return %arg0, %c0_i32, %c0_i32_0 : i32, i32, i32
  }
  func.func @transform_20(%arg0: i32) -> (i32, i32) {
    %c0_i32 = arith.constant 0 : i32
    %c0_i32_0 = arith.constant 0 : i32
    %c0_i32_1 = arith.constant 0 : i32
    return %c0_i32, %c0_i32_0 : i32, i32
  }
  func.func @transform_21(%arg0: i32) -> (i32, i32) {
    %c0_i32 = arith.constant 0 : i32
    %c0_i32_0 = arith.constant 0 : i32
    %c0_i32_1 = arith.constant 0 : i32
    return %c0_i32, %c0_i32_0 : i32, i32
  }
  func.func @transform_22(%arg0: i32) -> (i32, i32) {
    %c0_i32 = arith.constant 0 : i32
    %c0_i32_0 = arith.constant 0 : i32
    %c0_i32_1 = arith.constant 0 : i32
    return %c0_i32, %c0_i32_0 : i32, i32
  }
}

</mosaic_0001>

<bundles_post_ra>
// kernel: transformer_decoder.1
= control target key start
LH: loop header
LB: loop body
LE: loop exit
PB: predicated region body
PF: predicated region fallthrough
CT: control target
= control target key end

     0   :  { %s10258_s0 = inlined_call_operand.vmem [shape: f32[16,32], index: 0, kind: input, shape index: {}]   ;;  %s10259_s1 = inlined_call_operand.vmem [shape: f32[2,10,32], index: 1, kind: input, shape index: {}]   ;;  %s10260_s2 = inlined_call_operand.vmem [shape: bf16[2,96,32], index: 2, kind: input, shape index: {}]   ;;  %s10261_s3 = inlined_call_operand.vmem [shape: f32[2,1,96], index: 3, kind: input, shape index: {}]   ;;  %s10262_s4 = inlined_call_operand.vmem [shape: bf16[2,32,32], index: 4, kind: input, shape index: {}]   ;;  %s10263_s5 = inlined_call_operand.vmem [shape: f32[2,1,32], index: 5, kind: input, shape index: {}]   ;;  %s10264_s6 = inlined_call_operand.vmem [shape: bf16[2,96,32], index: 6, kind: input, shape index: {}]   ;;  %s10265_s7 = inlined_call_operand.vmem [shape: f32[2,1,96], index: 7, kind: input, shape index: {}]   ;;  %s10266_s8 = inlined_call_operand.vmem [shape: bf16[2,32,32], index: 8, kind: input, shape index: {}]   ;;  %s10267_s9 = inlined_call_operand.vmem [shape: f32[2,1,32], index: 9, kind: input, shape index: {}]   ;;  %s10268_s10 = inlined_call_operand.vmem [shape: bf16[2,2048,32], index: 10, kind: input, shape index: {}]   ;;  %s10269_s11 = inlined_call_operand.vmem [shape: f32[2,1,2048], index: 11, kind: input, shape index: {}]   ;;  %s10270_s12 = inlined_call_operand.vmem [shape: bf16[2,32,2048], index: 12, kind: input, shape index: {}]   ;;  %s10271_s13 = inlined_call_operand.vmem [shape: f32[2,1,32], index: 13, kind: input, shape index: {}]   ;;  %s10272_s14 = inlined_call_operand.vmem [shape: f32[2,1,32], index: 14, kind: input, shape index: {}]   ;;  %s10273_s15 = inlined_call_operand.vmem [shape: f32[2,1,32], index: 15, kind: input, shape index: {}]   ;;  %s10274_s16 = inlined_call_operand.vmem [shape: f32[2,1,32], index: 16, kind: input, shape index: {}]   ;;  %s10275_s17 = inlined_call_operand.vmem [shape: f32[2,1,32], index: 17, kind: input, shape index: {}]   ;;  %s10276_s18 = inlined_call_operand.vmem [shape: f32[2,1,32], index: 18, kind: input, shape index: {}]   ;;  %s10277_s19 = inlined_call_operand.vmem [shape: f32[2,1,32], index: 19, kind: input, shape index: {}]   ;;  %s10278_s20 = inlined_call_operand.vmem [shape: bf16[64,32], index: 20, kind: input, shape index: {}]   ;;  %s10279_s21 = inlined_call_operand.vmem [shape: f32[1,64], index: 21, kind: input, shape index: {}]   ;;  %s10280_s22 = inlined_call_operand.vmem [shape: f32[16,64], index: 22, kind: output, shape index: {}]  }
   0x1   :  { %10289 = sst [smem:[#allocation8_spill]] %s10258_s0 }
   0x2   :  { %10290 = sst [smem:[#allocation9_spill]] %s10259_s1 }
   0x3   :  { %10291 = sst [smem:[#allocation10_spill]] %s10260_s2 }
   0x4   :  { %10292 = sst [smem:[#allocation11_spill]] %s10261_s3  ;;  %s8983_s3 = smov 0  }
   0x5   :  { %10293 = sst [smem:[#allocation12_spill]] %s10262_s4 }
   0x6   :  { %10294 = sst [smem:[#allocation13_spill]] %s10263_s5 }
   0x7   :  { %10295 = sst [smem:[#allocation14_spill]] %s10264_s6 }
   0x8   :  { %10296 = sst [smem:[#allocation15_spill]] %s10266_s8 }
   0x9   :  { %10297 = sst [smem:[#allocation16_spill]] %s10268_s10 }
   0xa   :  { %10298 = sst [smem:[#allocation17_spill]] %s10269_s11 }
   0xb   :  { %10299 = sst [smem:[#allocation18_spill]] %s10270_s12 }
   0xc   :  { %10300 = sst [smem:[#allocation19_spill]] %s10277_s19 }
   0xd   :  { %10301 = sst [smem:[#allocation20_spill]] %s10278_s20 }
   0xe   :  { %10302 = sst [smem:[#allocation21_spill]] %s10279_s21 }
   0xf   :  { %10303 = sst [smem:[#allocation22_spill]] %s10280_s22 }
  0x10 LB: > { %10304 = sst [smem:[#allocation4_spill]] %s8851_s3  ;;  %s8989_s28 = sadd.s32 4294967295, %s8851_s3   ;;  %s8851_s3 = sphi %s8983_s3, %s32_s3  }
  0x11   : > { %10305 = sst [smem:[#allocation5_spill]] %s8989_s28  ;;  %p7547_p0 = scmp.ge.s32.totalorder %s8851_s3, 1 }
  0x12   : > { %p754_p1 = scmp.lt.s32.totalorder %s8851_s3, 3 }
  0x14   : > { %p755_p2 = pnand %p7547_p0, %p754_p1 }
  0x16   : > { %758 = sbr.rel (%p755_p2) target bundleno = 11539 (0x2d13), region = 108 }
  0x1b   : > { %p873_p3 = scmp.lt.s32.totalorder %s8989_s28, 1  ;;  %s10308_s3 = sld [smem:[#allocation10_spill]] }
  0x1c   : > { %s10312_s1 = sld [smem:[#allocation14_spill]] }
  0x1d   : > { %s8995_s29 = scalar_select %p873_p3, %s8989_s28, 1 }
  0x1e   : > { %s10310_s28 = sld [smem:[#allocation12_spill]] }
  0x1f   : > { %s8595_s30 = smul.u32 48, %s8995_s29  ;;  %s7850_s5 = sshll.u32 %s8995_s29, 4 }
  0x20   : > { %s10313_s8 = sld [smem:[#allocation15_spill]]  ;;  %s7853_s24 = sshll.u32 %s8995_s29, 8 }
  0x21   : > { %s9010_s22 = scalar_lea.vmem %s10308_s3, %s8595_s30  ;;  %s10314_s11 = sld [smem:[#allocation17_spill]] }
  0x22   : > { %10309 = sst [smem:[#allocation6_spill]] %s9010_s22  ;;  %s9020_s19 = scalar_lea.vmem %s10312_s1, %s8595_s30 }
  0x23   : > { %s10315_s10 = sld [smem:[#allocation16_spill]]  ;;  %s936_s25 = scalar_lea.vmem %s10276_s18, %s8995_s29 }
  0x24   : > { %s9015_s4 = scalar_lea.vmem %s10310_s28, %s7850_s5  ;;  %s7852_s28 = sshll.u32 %s8995_s29, 10 }
  0x25   : > { %10311 = sst [smem:[#allocation7_spill]] %s9015_s4 }
  0x26   : > { %s9029_s3 = scalar_lea.vmem %s10313_s8, %s7850_s5  ;;  %s10316_s12 = sld [smem:[#allocation18_spill]] }
  0x27   : > { %s9039_s0 = scalar_lea.vmem %s10314_s11, %s7850_s5  ;;  %s10318_s22 = sld [smem:[#allocation5_spill]] }
  0x29   : > { %s9044_s23 = scalar_lea.vmem %s10315_s10, %s7852_s28  ;;  %s930_s10 = scalar_lea.vmem %s10274_s16, %s8995_s29 }
  0x2c   : > { %s9050_s27 = scalar_lea.vmem %s10316_s12, %s7853_s24  ;;  %s933_s24 = scalar_lea.vmem %s10275_s17, %s8995_s29 }
  0x2d   : > { %p7559_p4 = scmp.ne.s32.totalorder %s10318_s22, 0 }
  0x2e   : > { %s10319_s30 = sld [smem:[#allocation8_spill]] (!%p7559_p4) }
  0x2f   : > { %944 = sbr.rel (%p7559_p4) target bundleno = 54 (0x36), region = 112 }
  0x34   : > { %v945_v0 = vld [vmem:[%s10319_s30] sm:$0xff]  ;;  %vm947_vm0 = vcmask 261120   ;;  %v946_v1 = vld [vmem:[%s10319_s30 + $0x8] sm:$0xff] }
  0x35   : > { %948 = vst.msk [vmem:[#allocation2] sm:$0xff] %vm947_vm0, %v945_v0  ;;  %949 = vst.msk [vmem:[#allocation2 + $0x8] sm:$0xff] %vm947_vm0, %v946_v1 }
  0x36 PF: > { %s10320_s11 = sld [smem:[#allocation6_spill]]  ;;  %v8853_v3 = vmov 0.0   ;;  %vm1002_vm1 = vcmask 261120   ;;  %vm8854_vm2 = vmmov 0   ;;  %s8855_s2 = smov 64   ;;  %vm1073_vm3 = vcmask 64512  }
  0x37   : > { %8151 = vmatprep.subr.bf16.mxu0 %v8853_v3  ;;  %8167 = vmatprep.subr.mxu1 %v8853_v3  ;;  %s10321_s22 = sld [smem:[#allocation11_spill]]  ;;  %s8856_s26 = smov 96   ;;  %vm3120_vm4 = vcmask 1041408   ;;  %vm3100_vm5 = vcmask 80896  }
  0x38   : > { %8163 = vmatprep.mubr.msk.bf16.mxu0 %vm8854_vm2, %v8853_v3  ;;  %8169 = vmatprep.mubr.msk.f32.mxu1 %vm8854_vm2, %v8853_v3  ;;  %s8857_s8 = smov 88   ;;  %s8858_s5 = smov 120  }
  0x39   : > { %s8859_s4 = smov 80   ;;  %s8860_s28 = smov 112  }
  0x3a   : > { %s10323_s1 = sld [smem:[#allocation7_spill]]  ;;  %s8862_s12 = smov 48  }
  0x3b   : > { %s8863_s20 = smov 72   ;;  %s10329_s21 = scalar_lea.vmem %s10273_s15, %s8995_s29 }
  0x3c   : > { %v8619_v2 = vld [vmem:[%s10320_s11 + $0x28] sm:$0xff]   ;;  %v8620_v4 = vld [vmem:[%s10320_s11 + $0x20] sm:$0xff]   ;;  %v8621_v6 = vld [vmem:[%s10320_s11 + $0x18] sm:$0xff]  }
  0x3d   : > { %v1022_v5 = vsel %vm1002_vm1, %v8619_v2, 0  ;;  %v8622_v7 = vld [vmem:[%s10320_s11 + $0x10] sm:$0xff]   ;;  %v8623_v8 = vld [vmem:[%s10320_s11 + $0x8] sm:$0xff]   ;;  %v8624_v9 = vld [vmem:[%s10320_s11] sm:$0xff]   ;;  %v1019_v10 = vsel %vm1002_vm1, %v8620_v4, 0  ;;  %v1016_v11 = vsel %vm1002_vm1, %v8621_v6, 0  ;;  %s10322_s6 = scalar_lea.vmem %s10321_s22, %s8995_s29 }
  0x3e   : > { %8152 = vmatpush3.bf16.xpose.msra.mxu0 %v1022_v5  ;;  %v1013_v12 = vsel %vm1002_vm1, %v8622_v7, 0  ;;  %v1010_v13 = vsel %vm1002_vm1, %v8623_v8, 0  ;;  %v1007_v14 = vsel %vm1002_vm1, %v8624_v9, 0  ;;  %v950_v15 = vld [vmem:[#allocation2] sm:$0xff]  ;;  %v951_v16 = vld [vmem:[#allocation2 + $0x8] sm:$0xff]  ;;  %s8861_s11 = smov 56  }
  0x3f   : > { %8153 = vmatprep.subr.bf16.mxu0 %v8853_v3  ;;  %v964_v17 = vpack.c.bf16 %v951_v16, %v950_v15  ;;  %v7560_v18 = vld [vmem:[%s10322_s6] ss:$0 sm:$0xff]  ;;  %s8864_s22 = smov 104   ;;  %s8865_s6 = smov 40  }
  0x40   : > { %v9169_v57 = vld [vmem:[%s10323_s1 + $0x8] sm:$0xff]   ;;  %v9174_v58 = vld [vmem:[%s10323_s1] sm:$0xff]   ;;  %s10326_s1 = sld [smem:[#allocation9_spill]] }
  0x46   : > { %8154 = vmatpush3.bf16.xpose.msra.mxu0 %v1019_v10  ;;  %v9202_v10 = vsel %vm1073_vm3, %v9169_v57, 0 }
  0x47   : > { %8155 = vmatprep.subr.bf16.mxu0 %v8853_v3 }
  0x4e   : > { %8156 = vmatpush3.bf16.xpose.msra.mxu0 %v1016_v11 }
  0x4f   : > { %8157 = vmatprep.subr.bf16.mxu0 %v8853_v3 }
  0x56   : > { %8158 = vmatpush3.bf16.xpose.msra.mxu0 %v1013_v12 }
  0x57   : > { %8159 = vmatprep.subr.bf16.mxu0 %v8853_v3 }
  0x5e   : > { %8160 = vmatpush3.bf16.xpose.msra.mxu0 %v1010_v13  ;;  %v9211_v13 = vsel %vm1073_vm3, %v9174_v58, 0 }
  0x5f   : > { %8161 = vmatprep.subr.bf16.mxu0 %v8853_v3 }
  0x66   : > { %8162 = vmatpush3.bf16.xpose.msra.mxu0 %v1007_v14 }
  0x67   : > { %8203 = vmatprep.subr.mxu0 %v8853_v3 }
  0x6d   : > { %8164 = vmatmul.mubr.msk.bf16.vlgmr.msra.gmra.mxu0 %vm1002_vm1, %v964_v17 }
  0x6e   : > { %8205 = vmatprep.mubr.msk.f32.mxu0 %vm8854_vm2, %v8853_v3 }
 0x12d   : > { %v1058_v19 = vpop.f32.mrf.mxu0 }
 0x12e   : > { %v9119_v20 = vadd.f32 %v7560_v18, %v1058_v19 }
 0x12f   : > { %v8165_v21 = vpop.f32.mrf.mxu0 }
 0x130   : > { %1160 = vrot.lane.b32.xlu1 %v9119_v20, %s8855_s2  ;;  %1071 = vrot.lane.b32.xlu0 %v9119_v20, %s8856_s26  ;;  %v9131_v26 = vmul.f32 0.35355338, %v9119_v20 }
 0x131   : > { %v1061_v22 = vpop.f32.mrf.mxu0 }
 0x132   : > { %v9125_v23 = vadd.f32 %v7560_v18, %v1061_v22 }
 0x133   : > { %v8166_v24 = vpop.f32.mrf.mxu0 }
 0x134   : > { %1239 = vrot.lane.b32.xlu1 %v9119_v20, %s8857_s8 }
 0x1a2   : > { %v1072_v25 = vpop.permute.xlu0 %1071  ;;  %v1161_v27 = vpop.permute.xlu1 %1160 }
 0x1a3   : > { %8168 = vmatpush3.xpose.msk.msra.mxu1 %vm1073_vm3, %v1072_v25 }
 0x1a4   : > { %8172 = vmatprep.subr.mxu1 %v8853_v3 }
 0x1a6   : > { %8170 = vmatmul.mubr.msk.f32.vlgmr.msra.gmra.mxu1 %vm1073_vm3, %v9131_v26  ;;  %v1240_v36 = vpop.permute.xlu1 %1239 }
 0x1a7   : > { %8173 = vmatpush3.msra.mxu1 %v1161_v27  ;;  %8174 = vmatprep.mubr.msk.f32.mxu1 %vm8854_vm2, %v8853_v3 }
 0x1a8   : > { %8177 = vmatprep.subr.mxu1 %v8853_v3 }
 0x266   : > { %v1145_v28 = vpop.f32.mrf.mxu1 }
 0x267   : > { %v1149_v29 = vsel %vm1073_vm3, %v1145_v28, -inf }
 0x268   : > { %1150 = vmax.xlane.f32.xlu0 %v1149_v29  ;;  %v8171_v30 = vpop.f32.mrf.mxu1 }
 0x2f1   : > { %v1151_v31 = vpop.xlane.xlu0 %1150 }
 0x2f2   : > { %v1152_v32 = vsub.f32 %v1145_v28, %v1151_v31 }
 0x2f4   : > { %v1153_v33 = vmul.f32 1.442695, %v1152_v32 }
 0x2f6   : > { %8763 = vpow2.f32 %v1153_v33 }
 0x303   : > { %v8764_v34 = vpop.eup %8763 }
 0x304   : > { %v1155_v35 = vsel %vm1073_vm3, %v8764_v34, 0.0 }
 0x305   : > { %1156 = vadd.xlane.f32.xlu1 %v1155_v35 }
 0x316   : > { %1237 = vrot.lane.b32.xlu1 %v9131_v26, %s8858_s5 }
 0x31a   : > { %1517 = vrot.lane.b32.xlu1 %v9119_v20, %s8859_s4 }
 0x31e   : > { %1515 = vrot.lane.b32.xlu1 %v9131_v26, %s8860_s28 }
 0x38e   : > { %v1157_v37 = vpop.xlane.xlu1 %1156 }
 0x38f   : > { %8765 = vrcp.f32 %v1157_v37 }
 0x392   : > { %v1238_v38 = vpop.permute.xlu1 %1237 }
 0x396   : > { %v1518_v39 = vpop.permute.xlu1 %1517 }
 0x397   : > { %8204 = vmatpush3.xpose.msk.msra.mxu0 %vm1073_vm3, %v1518_v39 }
 0x398   : > { %8213 = vmatprep.subr.bf16.mxu0 %v8853_v3 }
 0x39a   : > { %v1516_v40 = vpop.permute.xlu1 %1515 }
 0x39b   : > { %8206 = vmatmul.mubr.msk.f32.vlgmr.msra.gmra.mxu0 %vm1073_vm3, %v1516_v40 }
 0x39c   : > { %v8766_v41 = vpop.eup %8765  ;;  %8217 = vmatprep.mubr.msk.bf16.mxu0 %vm8854_vm2, %v8853_v3 }
 0x39d   : > { %v1159_v42 = vmul.f32 %v8766_v41, %v8764_v34 }
 0x39f   : > { %8175 = vmatmul.mubr.msk.f32.vlgmr.msra.gmra.mxu1 %vm1073_vm3, %v1159_v42 }
 0x3a0   : > { %8178 = vmatpush3.xpose.msk.msra.mxu1 %vm1073_vm3, %v1240_v36  ;;  %8179 = vmatprep.mubr.msk.f32.mxu1 %vm8854_vm2, %v8853_v3 }
 0x3a1   : > { %8182 = vmatprep.subr.mxu1 %v8853_v3 }
 0x3a3   : > { %8180 = vmatmul.mubr.msk.f32.vlgmr.msra.gmra.mxu1 %vm1073_vm3, %v1238_v38  ;;  %v9240_v38 = vmul.f32 0.35355338, %v9125_v23 }
 0x3a4   : > { %8184 = vmatprep.mubr.msk.f32.mxu1 %vm8854_vm2, %v8853_v3 }
 0x45b   : > { %v1589_v43 = vpop.f32.mrf.mxu0 }
 0x45c   : > { %v1593_v50 = vsel %vm1073_vm3, %v1589_v43, -inf }
 0x45d   : > { %v8207_v44 = vpop.f32.mrf.mxu0 }
 0x45f   : > { %v9160_v45 = vpop.f32.mrf.mxu1 }
 0x460   : > { %v1236_v14 = vpack.c.bf16 %v9160_v45, %v9160_v45 }
 0x461   : > { %v8176_v46 = vpop.f32.mrf.mxu1 }
 0x463   : > { %v1311_v47 = vpop.f32.mrf.mxu1 }
 0x464   : > { %v1315_v48 = vsel %vm1073_vm3, %v1311_v47, -inf }
 0x465   : > { %1316 = vmax.xlane.f32.xlu0 %v1315_v48  ;;  %v8181_v49 = vpop.f32.mrf.mxu1 }
 0x47b   : > { %1326 = vrot.lane.b32.xlu0 %v9119_v20, %s8861_s11 }
 0x49a   : > { %1594 = vmax.xlane.f32.xlu0 %v1593_v50 }
 0x4ee   : > { %v1317_v51 = vpop.xlane.xlu0 %1316 }
 0x4ef   : > { %v1318_v52 = vsub.f32 %v1311_v47, %v1317_v51 }
 0x4f1   : > { %v1319_v53 = vmul.f32 1.442695, %v1318_v52 }
 0x4f2   : > { %v1327_v54 = vpop.permute.xlu0 %1326 }
 0x4f3   : > { %8767 = vpow2.f32 %v1319_v53  ;;  %8183 = vmatpush3.msra.mxu1 %v1327_v54 }
 0x4f4   : > { %8187 = vmatprep.subr.bf16.mxu1 %v8853_v3 }
 0x500   : > { %v8768_v55 = vpop.eup %8767 }
 0x501   : > { %v1321_v56 = vsel %vm1073_vm3, %v8768_v55, 0.0 }
 0x502   : > { %1322 = vadd.xlane.f32.xlu1 %v1321_v56 }
 0x513   : > { %1415 = vrot.lane.b32.xlu1 %v9169_v57, %s8858_s5 }
 0x517   : > { %1413 = vrot.lane.b32.xlu1 %v9174_v58, %s8858_s5 }
 0x51b   : > { %1604 = vrot.lane.b32.xlu1 %v9119_v20, %s8862_s12 }
 0x51f   : > { %1681 = vrot.lane.b32.xlu1 %v9174_v58, %s8860_s28 }
 0x523   : > { %1958 = vrot.lane.b32.xlu1 %v9125_v23, %s8856_s26  ;;  %v1595_v59 = vpop.xlane.xlu0 %1594 }
 0x524   : > { %v1596_v60 = vsub.f32 %v1589_v43, %v1595_v59 }
 0x526   : > { %v1597_v61 = vmul.f32 1.442695, %v1596_v60 }
 0x528   : > { %8769 = vpow2.f32 %v1597_v61 }
 0x535   : > { %v8770_v62 = vpop.eup %8769 }
 0x536   : > { %v1599_v63 = vsel %vm1073_vm3, %v8770_v62, 0.0 }
 0x537   : > { %1600 = vadd.xlane.f32.xlu0 %v1599_v63 }
 0x54d   : > { %1683 = vrot.lane.b32.xlu0 %v9169_v57, %s8860_s28 }
 0x58b   : > { %v1323_v0 = vpop.xlane.xlu1 %1322 }
 0x58c   : > { %8771 = vrcp.f32 %v1323_v0 }
 0x58f   : > { %v1416_v2 = vpop.permute.xlu1 %1415 }
 0x590   : > { %v9188_v4 = vsel %vm1073_vm3, %v1416_v2, 0 }
 0x593   : > { %v1414_v6 = vpop.permute.xlu1 %1413 }
 0x594   : > { %v9196_v7 = vsel %vm1073_vm3, %v1414_v6, 0 }
 0x597   : > { %v1605_v15 = vpop.permute.xlu1 %1604 }
 0x599   : > { %v8772_v1 = vpop.eup %8771 }
 0x59a   : > { %v1325_v5 = vmul.f32 %v8772_v1, %v8768_v55 }
 0x59b   : > { %v1682_v21 = vpop.permute.xlu1 %1681 }
 0x59c   : > { %8185 = vmatmul.mubr.msk.f32.vlgmr.msra.gmra.mxu1 %vm1073_vm3, %v1325_v5  ;;  %v9230_v22 = vsel %vm1073_vm3, %v1682_v21, 0 }
 0x59d   : > { %8188 = vmatpush3.bf16.xpose.msra.mxu1 %v9188_v4  ;;  %8191 = vmatprep.mubr.msk.bf16.mxu1 %vm8854_vm2, %v8853_v3 }
 0x59e   : > { %8189 = vmatprep.subr.bf16.mxu1 %v8853_v3 }
 0x59f   : > { %v1959_v37 = vpop.permute.xlu1 %1958 }
 0x5a5   : > { %8190 = vmatpush3.bf16.xpose.msra.mxu1 %v9196_v7 }
 0x5a6   : > { %8195 = vmatprep.subr.bf16.mxu1 %v8853_v3 }
 0x5c0   : > { %v1601_v12 = vpop.xlane.xlu0 %1600 }
 0x5c1   : > { %8773 = vrcp.f32 %v1601_v12 }
 0x5c4   : > { %v1684_v18 = vpop.permute.xlu0 %1683 }
 0x5c5   : > { %v9225_v19 = vsel %vm1073_vm3, %v1684_v18, 0 }
 0x5c6   : > { %8214 = vmatpush3.bf16.xpose.msra.mxu0 %v9225_v19 }
 0x5c7   : > { %8215 = vmatprep.subr.bf16.mxu0 %v8853_v3 }
 0x5ce   : > { %v8774_v16 = vpop.eup %8773  ;;  %8216 = vmatpush3.bf16.xpose.msra.mxu0 %v9230_v22 }
 0x5cf   : > { %v1603_v17 = vmul.f32 %v8774_v16, %v8770_v62  ;;  %8239 = vmatprep.subr.mxu0 %v8853_v3 }
 0x65c   : > { %v1398_v8 = vpop.f32.mrf.mxu1 }
 0x65d   : > { %v1402_v9 = vpack.c.bf16 %v1398_v8, %v1398_v8 }
 0x65e   : > { %v8186_v11 = vpop.f32.mrf.mxu1 }
 0x65f   : > { %8192 = vmatmul.mubr.msk.bf16.vlgmr.msra.gmra.mxu1 %vm1073_vm3, %v1402_v9 }
 0x660   : > { %8196 = vmatpush3.bf16.xpose.msra.mxu1 %v9202_v10  ;;  %8199 = vmatprep.mubr.msk.bf16.mxu1 %vm8854_vm2, %v8853_v3 }
 0x661   : > { %8197 = vmatprep.subr.bf16.mxu1 %v8853_v3 }
 0x668   : > { %8198 = vmatpush3.bf16.xpose.msra.mxu1 %v9211_v13 }
 0x669   : > { %8208 = vmatprep.subr.mxu1 %v8853_v3 }
 0x66f   : > { %8200 = vmatmul.mubr.msk.bf16.vlgmr.msra.gmra.mxu1 %vm1073_vm3, %v1236_v14 }
 0x670   : > { %8209 = vmatpush3.msra.mxu1 %v1605_v15  ;;  %8210 = vmatprep.mubr.msk.f32.mxu1 %vm8854_vm2, %v8853_v3 }
 0x671   : > { %8221 = vmatprep.subr.mxu1 %v8853_v3 }
 0x677   : > { %8211 = vmatmul.mubr.msk.f32.vlgmr.msra.gmra.mxu1 %vm1073_vm3, %v1603_v17 }
 0x678   : > { %8223 = vmatprep.mubr.msk.f32.mxu1 %vm8854_vm2, %v8853_v3 }
 0x71f   : > { %v1460_v24 = vpop.f32.mrf.mxu1 }
 0x721   : > { %v8193_v25 = vpop.f32.mrf.mxu1 }
 0x723   : > { %v1463_v27 = vpop.f32.mrf.mxu1 }
 0x725   : > { %v8194_v28 = vpop.f32.mrf.mxu1 }
 0x72f   : > { %v1509_v29 = vpop.f32.mrf.mxu1 }
 0x730   : > { %v1510_v30 = vadd.f32 %v1509_v29, %v1460_v24 }
 0x731   : > { %v8201_v31 = vpop.f32.mrf.mxu1 }
 0x733   : > { %v1512_v32 = vpop.f32.mrf.mxu1 }
 0x735   : > { %v8202_v33 = vpop.f32.mrf.mxu1 }
 0x737   : > { %v1676_v34 = vpop.f32.mrf.mxu1 }
 0x738   : > { %v1680_v35 = vpack.c.bf16 %v1676_v34, %v1676_v34 }
 0x739   : > { %v8212_v36 = vpop.f32.mrf.mxu1 }
 0x73a   : > { %8218 = vmatmul.mubr.msk.bf16.vlgmr.msra.gmra.mxu0 %vm1073_vm3, %v1680_v35 }
 0x73b   : > { %8240 = vmatpush3.xpose.msk.msra.mxu0 %vm1073_vm3, %v1959_v37  ;;  %8241 = vmatprep.mubr.msk.f32.mxu0 %vm8854_vm2, %v8853_v3 }
 0x73c   : > { %8244 = vmatprep.subr.mxu0 %v8853_v3 }
 0x742   : > { %8242 = vmatmul.mubr.msk.f32.vlgmr.msra.gmra.mxu0 %vm1073_vm3, %v9240_v38 }
 0x743   : > { %8246 = vmatprep.mubr.msk.f32.mxu0 %vm8854_vm2, %v8853_v3 }
 0x7fa   : > { %v1728_v39 = vpop.f32.mrf.mxu0 }
 0x7fb   : > { %v9246_v40 = vadd.f32 %v1728_v39, %v1510_v30 }
 0x7fc   : > { %v8219_v41 = vpop.f32.mrf.mxu0 }
 0x7fe   : > { %v1731_v42 = vpop.f32.mrf.mxu0 }
 0x800   : > { %v8220_v43 = vpop.f32.mrf.mxu0 }
 0x802   : > { %v2031_v44 = vpop.f32.mrf.mxu0 }
 0x803   : > { %v2035_v45 = vsel %vm1073_vm3, %v2031_v44, -inf }
 0x804   : > { %2036 = vmax.xlane.f32.xlu1 %v2035_v45  ;;  %v8243_v46 = vpop.f32.mrf.mxu0 }
 0x815   : > { %2046 = vrot.lane.b32.xlu1 %v9125_v23, %s8855_s2 }
 0x819   : > { %2123 = vrot.lane.b32.xlu1 %v9240_v38, %s8858_s5 }
 0x88d   : > { %v2037_v47 = vpop.xlane.xlu1 %2036 }
 0x88e   : > { %v2038_v48 = vsub.f32 %v2031_v44, %v2037_v47 }
 0x890   : > { %v2039_v49 = vmul.f32 1.442695, %v2038_v48 }
 0x891   : > { %v2047_v50 = vpop.permute.xlu1 %2046 }
 0x892   : > { %8775 = vpow2.f32 %v2039_v49  ;;  %8245 = vmatpush3.msra.mxu0 %v2047_v50 }
 0x893   : > { %8249 = vmatprep.subr.mxu0 %v8853_v3 }
 0x895   : > { %v2124_v59 = vpop.permute.xlu1 %2123 }
 0x89f   : > { %v8776_v51 = vpop.eup %8775 }
 0x8a0   : > { %v2041_v52 = vsel %vm1073_vm3, %v8776_v51, 0.0 }
 0x8a1   : > { %2042 = vadd.xlane.f32.xlu0 %v2041_v52 }
 0x8b7   : > { %2125 = vrot.lane.b32.xlu0 %v9125_v23, %s8857_s8 }
 0x92a   : > { %v2043_v53 = vpop.xlane.xlu0 %2042 }
 0x92b   : > { %8777 = vrcp.f32 %v2043_v53 }
 0x92e   : > { %v2126_v56 = vpop.permute.xlu0 %2125 }
 0x938   : > { %v8778_v54 = vpop.eup %8777 }
 0x939   : > { %v2045_v55 = vmul.f32 %v8778_v54, %v8776_v51 }
 0x93b   : > { %8247 = vmatmul.mubr.msk.f32.vlgmr.msra.gmra.mxu0 %vm1073_vm3, %v2045_v55 }
 0x93c   : > { %8250 = vmatpush3.xpose.msk.msra.mxu0 %vm1073_vm3, %v2126_v56  ;;  %8251 = vmatprep.mubr.msk.f32.mxu0 %vm8854_vm2, %v8853_v3 }
 0x93d   : > { %8254 = vmatprep.subr.mxu0 %v8853_v3 }
 0x93f   : > { %8252 = vmatmul.mubr.msk.f32.vlgmr.msra.gmra.mxu0 %vm1073_vm3, %v2124_v59 }
 0x940   : > { %8256 = vmatprep.mubr.msk.f32.mxu0 %vm8854_vm2, %v8853_v3 }
 0x9fb   : > { %v9265_v60 = vpop.f32.mrf.mxu0 }
 0x9fc   : > { %v2122_v52 = vpack.c.bf16 %v9265_v60, %v9265_v60 }
 0x9fd   : > { %v8248_v61 = vpop.f32.mrf.mxu0 }
 0x9ff   : > { %v2197_v62 = vpop.f32.mrf.mxu0 }
 0xa00   : > { %v2201_v63 = vsel %vm1073_vm3, %v2197_v62, -inf }
 0xa01   : > { %2202 = vmax.xlane.f32.xlu1 %v2201_v63  ;;  %v8253_v0 = vpop.f32.mrf.mxu0 }
 0xa12   : > { %1737 = vrot.lane.b32.xlu1 %v9119_v20, %s8863_s20 }
 0xa16   : > { %2212 = vrot.lane.b32.xlu1 %v9125_v23, %s8861_s11  ;;  %s10324_s11 = sld [smem:[#allocation13_spill]] }
 0xa1a   : > { %2377 = vrot.lane.b32.xlu1 %v9125_v23, %s8859_s4 }
 0xa8a   : > { %v2203_v1 = vpop.xlane.xlu1 %2202 }
 0xa8b   : > { %v2204_v2 = vsub.f32 %v2197_v62, %v2203_v1 }
 0xa8d   : > { %v2205_v5 = vmul.f32 1.442695, %v2204_v2 }
 0xa8e   : > { %v1738_v6 = vpop.permute.xlu1 %1737 }
 0xa8f   : > { %8779 = vpow2.f32 %v2205_v5  ;;  %8222 = vmatpush3.xpose.msk.msra.mxu1 %vm1073_vm3, %v1738_v6 }
 0xa90   : > { %8226 = vmatprep.subr.mxu1 %v8853_v3 }
 0xa92   : > { %v2213_v8 = vpop.permute.xlu1 %2212 }
 0xa93   : > { %8255 = vmatpush3.msra.mxu0 %v2213_v8 }
 0xa94   : > { %8259 = vmatprep.subr.bf16.mxu0 %v8853_v3 }
 0xa96   : > { %v2378_v27 = vpop.permute.xlu1 %2377 }
 0xa9c   : > { %v8780_v9 = vpop.eup %8779 }
 0xa9d   : > { %v2207_v11 = vsel %vm1073_vm3, %v8780_v9, 0.0 }
 0xa9e   : > { %2208 = vadd.xlane.f32.xlu0 %v2207_v11 }
 0xab4   : > { %1735 = vrot.lane.b32.xlu0 %v9131_v26, %s8864_s22 }
 0xab8   : > { %2375 = vrot.lane.b32.xlu0 %v9240_v38, %s8860_s28 }
 0xb27   : > { %v2209_v12 = vpop.xlane.xlu0 %2208 }
 0xb28   : > { %8781 = vrcp.f32 %v2209_v12 }
 0xb2b   : > { %v1736_v14 = vpop.permute.xlu0 %1735 }
 0xb2c   : > { %8224 = vmatmul.mubr.msk.f32.vlgmr.msra.gmra.mxu1 %vm1073_vm3, %v1736_v14 }
 0xb2d   : > { %8228 = vmatprep.mubr.msk.f32.mxu1 %vm8854_vm2, %v8853_v3 }
 0xb35   : > { %v8782_v15 = vpop.eup %8781 }
 0xb36   : > { %v2211_v16 = vmul.f32 %v8782_v15, %v8780_v9  ;;  %v8839_v15 = vld [vmem:[#allocation2] sm:$0xff] }
 0xb38   : > { %8257 = vmatmul.mubr.msk.f32.vlgmr.msra.gmra.mxu0 %vm1073_vm3, %v2211_v16 }
 0xb39   : > { %8260 = vmatpush3.bf16.xpose.msra.mxu0 %v9188_v4  ;;  %8263 = vmatprep.mubr.msk.bf16.mxu0 %vm8854_vm2, %v8853_v3  ;;  %v2376_v4 = vpop.permute.xlu0 %2375 }
 0xb3a   : > { %8261 = vmatprep.subr.bf16.mxu0 %v8853_v3 }
 0xb41   : > { %8262 = vmatpush3.bf16.xpose.msra.mxu0 %v9196_v7 }
 0xb42   : > { %8275 = vmatprep.subr.mxu0 %v8853_v3 }
 0xbec   : > { %v1809_v26 = vpop.f32.mrf.mxu1 }
 0xbed   : > { %v1813_v17 = vsel %vm1073_vm3, %v1809_v26, -inf }
 0xbee   : > { %1814 = vmax.xlane.f32.xlu1 %v1813_v17  ;;  %v8225_v18 = vpop.f32.mrf.mxu1 }
 0xbf8   : > { %v2284_v21 = vpop.f32.mrf.mxu0 }
 0xbf9   : > { %v2288_v24 = vpack.c.bf16 %v2284_v21, %v2284_v21 }
 0xbfa   : > { %v8258_v25 = vpop.f32.mrf.mxu0 }
 0xbfb   : > { %8264 = vmatmul.mubr.msk.bf16.vlgmr.msra.gmra.mxu0 %vm1073_vm3, %v2288_v24 }
 0xbfc   : > { %8276 = vmatpush3.xpose.msk.msra.mxu0 %vm1073_vm3, %v2378_v27  ;;  %8277 = vmatprep.mubr.msk.f32.mxu0 %vm8854_vm2, %v8853_v3 }
 0xbfd   : > { %8285 = vmatprep.subr.bf16.mxu0 %v8853_v3 }
 0xc03   : > { %8278 = vmatmul.mubr.msk.f32.vlgmr.msra.gmra.mxu0 %vm1073_vm3, %v2376_v4 }
 0xc04   : > { %8286 = vmatpush3.bf16.xpose.msra.mxu0 %v9225_v19  ;;  %8289 = vmatprep.mubr.msk.bf16.mxu0 %vm8854_vm2, %v8853_v3 }
 0xc05   : > { %8287 = vmatprep.subr.bf16.mxu0 %v8853_v3 }
 0xc0c   : > { %8288 = vmatpush3.bf16.xpose.msra.mxu0 %v9230_v22 }
 0xc0d   : > { %8311 = vmatprep.subr.bf16.mxu0 %v8853_v3 }
 0xc77   : > { %v1815_v7 = vpop.xlane.xlu1 %1814 }
 0xc78   : > { %v1816_v28 = vsub.f32 %v1809_v26, %v1815_v7 }
 0xc7a   : > { %v1817_v29 = vmul.f32 1.442695, %v1816_v28 }
 0xc7c   : > { %8783 = vpow2.f32 %v1817_v29 }
 0xc89   : > { %v8784_v30 = vpop.eup %8783 }
 0xc8a   : > { %v1819_v31 = vsel %vm1073_vm3, %v8784_v30, 0.0 }
 0xc8b   : > { %1820 = vadd.xlane.f32.xlu0 %v1819_v31 }
 0xca1   : > { %1824 = vrot.lane.b32.xlu0 %v9119_v20, %s8865_s6 }
 0xca5   : > { %1901 = vrot.lane.b32.xlu0 %v9174_v58, %s8864_s22 }
 0xca9   : > { %2464 = vrot.lane.b32.xlu0 %v9125_v23, %s8862_s12  ;;  %s10325_s12 = scalar_lea.vmem %s10324_s11, %s8995_s29  ;;  %s10327_s11 = scalar_lea.vmem %s10265_s7, %s8995_s29 }
 0xcaa   : > { %v7602_v6 = vld [vmem:[%s10325_s12] ss:$0 sm:$0xff] }
 0xcad   : > { %2587 = vrot.lane.b32.xlu0 %v9125_v23, %s8863_s20 }
 0xcb1   : > { %2585 = vrot.lane.b32.xlu0 %v9240_v38, %s8864_s22 }
 0xcbb   : > { %v9316_v19 = vpop.f32.mrf.mxu0 }
 0xcbd   : > { %v8265_v22 = vpop.f32.mrf.mxu0 }
 0xcbf   : > { %v2329_v32 = vpop.f32.mrf.mxu0 }
 0xcc1   : > { %v8266_v33 = vpop.f32.mrf.mxu0 }
 0xcc3   : > { %v2449_v34 = vpop.f32.mrf.mxu0 }
 0xcc4   : > { %v2453_v20 = vsel %vm1073_vm3, %v2449_v34, -inf }
 0xcc5   : > { %2454 = vmax.xlane.f32.xlu1 %v2453_v20  ;;  %v8279_v35 = vpop.f32.mrf.mxu0 }
 0xcd6   : > { %1903 = vrot.lane.b32.xlu1 %v9169_v57, %s8864_s22 }
 0xd14   : > { %v1821_v58 = vpop.xlane.xlu0 %1820 }
 0xd15   : > { %8785 = vrcp.f32 %v1821_v58 }
 0xd18   : > { %v1825_v36 = vpop.permute.xlu0 %1824 }
 0xd19   : > { %8227 = vmatpush3.msra.mxu1 %v1825_v36 }
 0xd1a   : > { %8231 = vmatprep.subr.bf16.mxu1 %v8853_v3 }
 0xd1c   : > { %v1902_v44 = vpop.permute.xlu0 %1901 }
 0xd1d   : > { %v9331_v45 = vsel %vm1073_vm3, %v1902_v44, 0  ;;  %v8840_v44 = vld [vmem:[#allocation2 + $0x8] sm:$0xff] }
 0xd20   : > { %v2465_v53 = vpop.permute.xlu0 %2464 }
 0xd22   : > { %v8786_v37 = vpop.eup %8785 }
 0xd23   : > { %v1823_v38 = vmul.f32 %v8786_v37, %v8784_v30 }
 0xd24   : > { %v2588_v54 = vpop.permute.xlu0 %2587 }
 0xd25   : > { %8229 = vmatmul.mubr.msk.f32.vlgmr.msra.gmra.mxu1 %vm1073_vm3, %v1823_v38 }
 0xd26   : > { %8235 = vmatprep.mubr.msk.bf16.mxu1 %vm8854_vm2, %v8853_v3 }
 0xd4e   : > { %v2455_v39 = vpop.xlane.xlu1 %2454 }
 0xd4f   : > { %v2456_v41 = vsub.f32 %v2449_v34, %v2455_v39 }
 0xd51   : > { %v2457_v42 = vmul.f32 1.442695, %v2456_v41 }
 0xd52   : > { %v1904_v43 = vpop.permute.xlu1 %1903 }
 0xd53   : > { %8787 = vpow2.f32 %v2457_v42  ;;  %v9326_v57 = vsel %vm1073_vm3, %v1904_v43, 0 }
 0xd54   : > { %8232 = vmatpush3.bf16.xpose.msra.mxu1 %v9326_v57 }
 0xd55   : > { %8233 = vmatprep.subr.bf16.mxu1 %v8853_v3 }
 0xd5c   : > { %8234 = vmatpush3.bf16.xpose.msra.mxu1 %v9331_v45 }
 0xd5d   : > { %8267 = vmatprep.subr.bf16.mxu1 %v8853_v3 }
 0xd60   : > { %v8788_v46 = vpop.eup %8787 }
 0xd61   : > { %v2459_v47 = vsel %vm1073_vm3, %v8788_v46, 0.0 }
 0xd62   : > { %2460 = vadd.xlane.f32.xlu1 %v2459_v47 }
 0xde5   : > { %v1896_v48 = vpop.f32.mrf.mxu1 }
 0xde6   : > { %v1900_v49 = vpack.c.bf16 %v1896_v48, %v1896_v48 }
 0xde7   : > { %v8230_v50 = vpop.f32.mrf.mxu1 }
 0xde8   : > { %8236 = vmatmul.mubr.msk.bf16.vlgmr.msra.gmra.mxu1 %vm1073_vm3, %v1900_v49  ;;  %v8627_v49 = vld [vmem:[%s9020_s19 + $0x28] sm:$0xff]  }
 0xde9   : > { %8268 = vmatpush3.bf16.xpose.msra.mxu1 %v9202_v10  ;;  %8271 = vmatprep.mubr.msk.bf16.mxu1 %vm8854_vm2, %v8853_v3  ;;  %v9389_v50 = vsel %vm1002_vm1, %v8627_v49, 0  ;;  %v9503_v49 = vld [vmem:[%s9029_s3] sm:$0xff]  }
 0xdea   : > { %8269 = vmatprep.subr.bf16.mxu1 %v8853_v3 }
 0xdeb   : > { %v2461_v51 = vpop.xlane.xlu1 %2460 }
 0xdec   : > { %8789 = vrcp.f32 %v2461_v51  ;;  %v8628_v51 = vld [vmem:[%s9020_s19 + $0x20] sm:$0xff]  }
 0xdf1   : > { %8270 = vmatpush3.bf16.xpose.msra.mxu1 %v9211_v13  ;;  %v2586_v13 = vpop.permute.xlu0 %2585 }
 0xdf2   : > { %8280 = vmatprep.subr.mxu1 %v8853_v3 }
 0xdf8   : > { %8272 = vmatmul.mubr.msk.bf16.vlgmr.msra.gmra.mxu1 %vm1073_vm3, %v2122_v52  ;;  %v9395_v52 = vsel %vm1002_vm1, %v8628_v51, 0  ;;  %v9507_v51 = vsel %vm1073_vm3, %v9503_v49, 0 }
 0xdf9   : > { %8281 = vmatpush3.msra.mxu1 %v2465_v53  ;;  %8282 = vmatprep.mubr.msk.f32.mxu1 %vm8854_vm2, %v8853_v3  ;;  %v8790_v10 = vpop.eup %8789  ;;  %v8629_v53 = vld [vmem:[%s9020_s19 + $0x18] sm:$0xff]  }
 0xdfa   : > { %8293 = vmatprep.subr.mxu1 %v8853_v3  ;;  %v2463_v55 = vmul.f32 %v8790_v10, %v8788_v46  ;;  %v9401_v10 = vsel %vm1002_vm1, %v8629_v53, 0 }
 0xe00   : > { %8283 = vmatmul.mubr.msk.f32.vlgmr.msra.gmra.mxu1 %vm1073_vm3, %v2463_v55 }
 0xe01   : > { %8294 = vmatpush3.xpose.msk.msra.mxu1 %vm1073_vm3, %v2588_v54  ;;  %8295 = vmatprep.mubr.msk.f32.mxu1 %vm8854_vm2, %v8853_v3  ;;  %v8630_v54 = vld [vmem:[%s9020_s19 + $0x10] sm:$0xff]  }
 0xe02   : > { %8298 = vmatprep.subr.mxu1 %v8853_v3  ;;  %v9407_v55 = vsel %vm1002_vm1, %v8630_v54, 0 }
 0xe04   : > { %8296 = vmatmul.mubr.msk.f32.vlgmr.msra.gmra.mxu1 %vm1073_vm3, %v2586_v13 }
 0xe05   : > { %8300 = vmatprep.mubr.msk.f32.mxu1 %vm8854_vm2, %v8853_v3 }
 0xea8   : > { %v1948_v56 = vpop.f32.mrf.mxu1 }
 0xea9   : > { %v1954_v59 = vadd.f32 %v1948_v56, %v9246_v40 }
 0xeaa   : > { %v8237_v60 = vpop.f32.mrf.mxu1 }
 0xeab   : > { %1955 = vst.msk [vmem:[#allocation3] sm:$0xff] %vm1002_vm1, %v1954_v59 }
 0xeac   : > { %v1951_v61 = vpop.f32.mrf.mxu1 }
 0xeae   : > { %v8238_v62 = vpop.f32.mrf.mxu1 }
 0xeaf   : > { %v2938_v62 = vld [vmem:[%s10326_s1] sm:$0xff] }
 0xeb2   : > { %v2796_v5 = vld [vmem:[#allocation3] sm:$0xff] }
 0xeb3   : > { %v2805_v11 = vadd.f32 %v7602_v6, %v2796_v5  ;;  %v8632_v5 = vld [vmem:[%s9020_s19] sm:$0xff]  }
 0xeb5   : > { %v2807_v16 = vadd.f32 %v8839_v15, %v2805_v11 }
 0xeb7   : > { %v2809_v17 = vsel %vm1002_vm1, %v2807_v16, 0.0 }
 0xeb8   : > { %v2369_v63 = vpop.f32.mrf.mxu1 }
 0xeb9   : > { %v2370_v4 = vadd.f32 %v2369_v63, %v9316_v19  ;;  %v2939_v63 = vld [vmem:[%s10326_s1 + $0x8] sm:$0x3] }
 0xeba   : > { %v8273_v0 = vpop.f32.mrf.mxu1 }
 0xebb   : > { %v2940_v0 = vpack.c.bf16 %v2939_v63, %v2938_v62 }
 0xebc   : > { %v2372_v1 = vpop.f32.mrf.mxu1 }
 0xebd   : > { %v8631_v1 = vld [vmem:[%s9020_s19 + $0x8] sm:$0xff]  }
 0xebe   : > { %v8274_v2 = vpop.f32.mrf.mxu1 }
 0xebf   : > { %v2895_v2 = vsel %vm1002_vm1, %v8631_v1, 0 }
 0xec0   : > { %v2536_v8 = vpop.f32.mrf.mxu1 }
 0xec1   : > { %v2540_v9 = vpack.c.bf16 %v2536_v8, %v2536_v8  ;;  %v9432_v8 = vld [vmem:[%s10327_s11] ss:$0 sm:$0xff]  ;;  %s10332_s11 = sld [smem:[#allocation19_spill]] }
 0xec2   : > { %v8284_v12 = vpop.f32.mrf.mxu1 }
 0xec3   : > { %8290 = vmatmul.mubr.msk.bf16.vlgmr.msra.gmra.mxu0 %vm1073_vm3, %v2540_v9 }
 0xec4   : > { %v2659_v40 = vpop.f32.mrf.mxu1  ;;  %8315 = vmatprep.mubr.msk.bf16.mxu0 %vm8854_vm2, %v8853_v3  ;;  %8312 = vmatpush3.bf16.xpose.msra.mxu0 %v2895_v2 }
 0xec5   : > { %v2663_v14 = vsel %vm1073_vm3, %v2659_v40, -inf  ;;  %8313 = vmatprep.subr.bf16.mxu0 %v8853_v3 }
 0xec6   : > { %2664 = vmax.xlane.f32.xlu0 %v2663_v14  ;;  %v8297_v26 = vpop.f32.mrf.mxu1 }
 0xeca   : > { %2810 = vadd.xlane.f32.xlu0 %v2809_v17 }
 0xf4f   : > { %v2665_v18 = vpop.xlane.xlu0 %2664 }
 0xf50   : > { %v2666_v21 = vsub.f32 %v2659_v40, %v2665_v18 }
 0xf52   : > { %v2667_v24 = vmul.f32 1.442695, %v2666_v21 }
 0xf53   : > { %v2811_v37 = vpop.xlane.xlu0 %2810 }
 0xf54   : > { %8791 = vpow2.f32 %v2667_v24  ;;  %v2816_v41 = vmul.f32 0.03125, %v2811_v37 }
 0xf56   : > { %v2818_v43 = vsub.f32 %v2807_v16, %v2816_v41 }
 0xf58   : > { %v2820_v47 = vmul.f32 %v2818_v43, %v2818_v43 }
 0xf5a   : > { %v2822_v48 = vsel %vm1002_vm1, %v2820_v47, 0.0  ;;  %v9494_v47 = vld [vmem:[%s9029_s3 + $0x8] sm:$0xff]   ;;  %s10333_s3 = scalar_lea.vmem %s10332_s11, %s8995_s29 }
 0xf61   : > { %v8792_v25 = vpop.eup %8791 }
 0xf62   : > { %v2669_v27 = vsel %vm1073_vm3, %v8792_v25, 0.0 }
 0xf63   : > { %2670 = vadd.xlane.f32.xlu1 %v2669_v27 }
 0xf74   : > { %2674 = vrot.lane.b32.xlu1 %v9125_v23, %s8865_s6  ;;  %s10328_s6 = scalar_lea.vmem %s10272_s14, %s8995_s29 }
 0xf75   : > { %v7603_v17 = vld [vmem:[%s10328_s6] ss:$0 sm:$0xff] }
 0xf83   : > { %v2578_v7 = vpop.f32.mrf.mxu0 }
 0xf84   : > { %v2584_v28 = vadd.f32 %v2578_v7, %v2370_v4 }
 0xf85   : > { %v8291_v29 = vpop.f32.mrf.mxu0 }
 0xf87   : > { %v2581_v30 = vpop.f32.mrf.mxu0 }
 0xf89   : > { %v8292_v31 = vpop.f32.mrf.mxu0 }
 0xfec   : > { %v2671_v22 = vpop.xlane.xlu1 %2670 }
 0xfed   : > { %8793 = vrcp.f32 %v2671_v22 }
 0xff0   : > { %v2675_v32 = vpop.permute.xlu1 %2674 }
 0xff1   : > { %8299 = vmatpush3.msra.mxu1 %v2675_v32 }
 0xff2   : > { %8303 = vmatprep.subr.bf16.mxu1 %v8853_v3 }
 0xffa   : > { %v8794_v33 = vpop.eup %8793 }
 0xffb   : > { %v2673_v34 = vmul.f32 %v8794_v33, %v8792_v25  ;;  %v7604_v25 = vld [vmem:[%s10329_s21] ss:$0 sm:$0xff]  ;;  %s10334_s21 = sld [smem:[#allocation5_spill]] }
 0xffd   : > { %8301 = vmatmul.mubr.msk.f32.vlgmr.msra.gmra.mxu1 %vm1073_vm3, %v2673_v34 }
 0xffe   : > { %8304 = vmatpush3.bf16.xpose.msra.mxu1 %v9326_v57  ;;  %8307 = vmatprep.mubr.msk.bf16.mxu1 %vm8854_vm2, %v8853_v3 }
 0xfff   : > { %8305 = vmatprep.subr.bf16.mxu1 %v8853_v3 }
0x1001   : > { %p7841_p5 = scmp.ne.s32.totalorder %s10334_s21, 1 }
0x1002   : > { %s10335_s12 = sld [smem:[#allocation20_spill]] (!%p7841_p5) }
0x1006   : > { %8306 = vmatpush3.bf16.xpose.msra.mxu1 %v9331_v45 }
0x1007   : > { %8319 = vmatprep.subr.bf16.mxu1 %v8853_v3 }
0x10bd   : > { %v2746_v23 = vpop.f32.mrf.mxu1 }
0x10be   : > { %v2750_v19 = vpack.c.bf16 %v2746_v23, %v2746_v23 }
0x10bf   : > { %v8302_v20 = vpop.f32.mrf.mxu1 }
0x10c0   : > { %8308 = vmatmul.mubr.msk.bf16.vlgmr.msra.gmra.mxu1 %vm1073_vm3, %v2750_v19 }
0x10c1   : > { %8327 = vmatprep.mubr.msk.bf16.mxu1 %vm8854_vm2, %v8853_v3  ;;  %8320 = vmatpush3.bf16.xpose.msra.mxu1 %v9389_v50 }
0x10c2   : > { %8321 = vmatprep.subr.bf16.mxu1 %v8853_v3 }
0x10c9   : > { %8322 = vmatpush3.bf16.xpose.msra.mxu1 %v9395_v52 }
0x10ca   : > { %8323 = vmatprep.subr.bf16.mxu1 %v8853_v3 }
0x10d1   : > { %8324 = vmatpush3.bf16.xpose.msra.mxu1 %v9401_v10 }
0x10d2   : > { %8325 = vmatprep.subr.bf16.mxu1 %v8853_v3 }
0x10d9   : > { %8326 = vmatpush3.bf16.xpose.msra.mxu1 %v9407_v55 }
0x10da   : > { %8367 = vmatprep.subr.bf16.mxu1 %v8853_v3 }
0x10e0   : > { %8328 = vmatmul.mubr.msk.bf16.vlgmr.msra.gmra.mxu1 %vm1002_vm1, %v2940_v0 }
0x10e1   : > { %8371 = vmatprep.mubr.msk.bf16.mxu1 %vm8854_vm2, %v8853_v3 }
0x1180   : > { %v2788_v35 = vpop.f32.mrf.mxu1 }
0x1181   : > { %v2794_v58 = vadd.f32 %v2788_v35, %v2584_v28 }
0x1182   : > { %v8309_v36 = vpop.f32.mrf.mxu1 }
0x1183   : > { %2795 = vst.msk [vmem:[#allocation3 + $0x8] sm:$0xff] %vm1002_vm1, %v2794_v58 }
0x1184   : > { %v2791_v38 = vpop.f32.mrf.mxu1 }
0x1186   : > { %v8310_v39 = vpop.f32.mrf.mxu1 }
0x118a   : > { %v2797_v42 = vld [vmem:[#allocation3 + $0x8] sm:$0xff] }
0x118b   : > { %v2806_v57 = vadd.f32 %v7602_v6, %v2797_v42  ;;  %v2892_v6 = vsel %vm1002_vm1, %v8632_v5, 0 }
0x118c   : > { %8314 = vmatpush3.bf16.xpose.msra.mxu0 %v2892_v6 }
0x118d   : > { %v2808_v45 = vadd.f32 %v8840_v44, %v2806_v57  ;;  %8331 = vmatprep.subr.mxu0 %v8853_v3 }
0x118f   : > { %v2812_v46 = vsel %vm1002_vm1, %v2808_v45, 0.0 }
0x1190   : > { %2813 = vadd.xlane.f32.xlu0 %v2812_v46 }
0x1194   : > { %2823 = vadd.xlane.f32.xlu0 %v2822_v48  ;;  %v9498_v48 = vsel %vm1073_vm3, %v9494_v47, 0 }
0x1195   : > { %8368 = vmatpush3.bf16.xpose.msra.mxu1 %v9498_v48 }
0x1196   : > { %8369 = vmatprep.subr.bf16.mxu1 %v8853_v3 }
0x119d   : > { %8370 = vmatpush3.bf16.xpose.msra.mxu1 %v9507_v51 }
0x119e   : > { %8382 = vmatprep.subr.mxu1 %v8853_v3 }
0x11a0   : > { %v3013_v29 = vpop.f32.mrf.mxu1 }
0x11a2   : > { %v8329_v30 = vpop.f32.mrf.mxu1 }
0x11a4   : > { %v3016_v22 = vpop.f32.mrf.mxu1 }
0x11a6   : > { %v8330_v33 = vpop.f32.mrf.mxu1 }
0x11aa   : > { %2961 = vrot.lane.b32.xlu0 %v9432_v8, %s8856_s26 }
0x1219   : > { %v2814_v13 = vpop.xlane.xlu0 %2813 }
0x121a   : > { %v2817_v56 = vmul.f32 0.03125, %v2814_v13 }
0x121c   : > { %v2819_v59 = vsub.f32 %v2808_v45, %v2817_v56 }
0x121d   : > { %v2824_v9 = vpop.xlane.xlu0 %2823 }
0x121e   : > { %v2821_v60 = vmul.f32 %v2819_v59, %v2819_v59  ;;  %v2828_v11 = vmul.f32 0.03125, %v2824_v9 }
0x1220   : > { %v2825_v61 = vsel %vm1002_vm1, %v2821_v60, 0.0  ;;  %v2830_v12 = vadd.f32 1e-05, %v2828_v11 }
0x1221   : > { %2826 = vadd.xlane.f32.xlu1 %v2825_v61  ;;  %v9455_v31 = vpop.permute.xlu0 %2961 }
0x1222   : > { %8795 = vrsqrt.f32 %v2830_v12  ;;  %v9458_v32 = vadd.f32 %v3016_v22, %v9455_v31  ;;  %v9461_v34 = vadd.f32 %v3013_v29, %v9455_v31 }
0x122f   : > { %v8796_v16 = vpop.eup %8795 }
0x1230   : > { %v2834_v26 = vmul.f32 %v8796_v16, %v2818_v43 }
0x1232   : > { %v2843_v24 = vmul.f32 %v7603_v17, %v2834_v26  ;;  %3114 = vrot.lane.b32.xlu1 %v9458_v32, %s8856_s26 }
0x1234   : > { %v9446_v4 = vadd.f32 %v7604_v25, %v2843_v24 }
0x1236   : > { %3198 = vrot.lane.b32.xlu1 %v9458_v32, %s8858_s5 }
0x123a   : > { %3196 = vrot.lane.b32.xlu1 %v9461_v34, %s8858_s5 }
0x12aa   : > { %v2827_v40 = vpop.xlane.xlu1 %2826 }
0x12ab   : > { %v2829_v14 = vmul.f32 0.03125, %v2827_v40 }
0x12ad   : > { %v2831_v15 = vadd.f32 1e-05, %v2829_v14 }
0x12ae   : > { %v3115_v36 = vpop.permute.xlu1 %3114 }
0x12af   : > { %8797 = vrsqrt.f32 %v2831_v15 }
0x12b2   : > { %v3199_v53 = vpop.permute.xlu1 %3198 }
0x12b6   : > { %v3197_v54 = vpop.permute.xlu1 %3196 }
0x12bc   : > { %v8798_v18 = vpop.eup %8797 }
0x12bd   : > { %v2835_v21 = vmul.f32 %v8798_v18, %v2819_v59 }
0x12bf   : > { %v2844_v27 = vmul.f32 %v7603_v17, %v2835_v21 }
0x12c1   : > { %v9448_v7 = vadd.f32 %v7604_v25, %v2844_v27 }
0x12c3   : > { %v2871_v28 = vpack.c.bf16 %v9448_v7, %v9446_v4 }
0x12c5   : > { %8316 = vmatmul.mubr.msk.bf16.vlgmr.msra.gmra.mxu0 %vm1002_vm1, %v2871_v28 }
0x12c6   : > { %8335 = vmatprep.mubr.msk.f32.mxu0 %vm8854_vm2, %v8853_v3  ;;  %8332 = vmatpush3.xpose.msk.msra.mxu0 %vm1073_vm3, %v9458_v32 }
0x12c7   : > { %8333 = vmatprep.subr.mxu0 %v8853_v3 }
0x12ca   : > { %8334 = vmatpush3.xpose.msk.msra.mxu0 %vm1073_vm3, %v9461_v34 }
0x12cb   : > { %8338 = vmatprep.subr.mxu0 %v8853_v3 }
0x1385   : > { %v2931_v23 = vpop.f32.mrf.mxu0 }
0x1386   : > { %v2932_v19 = vadd.f32 %v9432_v8, %v2931_v23 }
0x1387   : > { %v8317_v20 = vpop.f32.mrf.mxu0 }
0x1388   : > { %v9476_v35 = vmul.f32 0.35355338, %v2932_v19 }
0x1389   : > { %v9478_v58 = vpop.f32.mrf.mxu0 }
0x138a   : > { %8336 = vmatmul.mubr.msk.f32.vlgmr.msra.gmra.mxu0 %vm1073_vm3, %v9476_v35 }
0x138b   : > { %v8318_v37 = vpop.f32.mrf.mxu0  ;;  %8339 = vmatpush3.msk.msra.mxu0 %vm3120_vm4, %v3115_v36  ;;  %8342 = vmatprep.mubr.msk.f32.mxu0 %vm8854_vm2, %v8853_v3 }
0x138c   : > { %8340 = vmatprep.subr.mxu0 %v8853_v3 }
0x144a   : > { %v3096_v38 = vpop.f32.mrf.mxu0 }
0x144b   : > { %v3101_v39 = vsel %vm3100_vm5, %v3096_v38, -inf }
0x144c   : > { %3102 = vmax.xlane.f32.xlu0 %v3101_v39  ;;  %v8337_v41 = vpop.f32.mrf.mxu0 }
0x1462   : > { %3112 = vrot.lane.b32.xlu0 %v9461_v34, %s8856_s26 }
0x14d5   : > { %v3103_v42 = vpop.xlane.xlu0 %3102 }
0x14d6   : > { %v3104_v43 = vsub.f32 %v3096_v38, %v3103_v42 }
0x14d8   : > { %v3105_v57 = vmul.f32 1.442695, %v3104_v43 }
0x14d9   : > { %v3113_v44 = vpop.permute.xlu0 %3112 }
0x14da   : > { %8799 = vpow2.f32 %v3105_v57  ;;  %8341 = vmatpush3.msra.mxu0 %v3113_v44 }
0x14db   : > { %8345 = vmatprep.subr.mxu0 %v8853_v3 }
0x14e7   : > { %v8800_v45 = vpop.eup %8799 }
0x14e8   : > { %v3107_v46 = vsel %vm3100_vm5, %v8800_v45, 0.0 }
0x14e9   : > { %3108 = vadd.xlane.f32.xlu1 %v3107_v46 }
0x14fa   : > { %3194 = vrot.lane.b32.xlu1 %v9476_v35, %s8858_s5 }
0x1572   : > { %v3109_v13 = vpop.xlane.xlu1 %3108 }
0x1573   : > { %8801 = vrcp.f32 %v3109_v13 }
0x1576   : > { %v3195_v60 = vpop.permute.xlu1 %3194 }
0x1580   : > { %v8802_v56 = vpop.eup %8801 }
0x1581   : > { %v3111_v59 = vmul.f32 %v8802_v56, %v8800_v45 }
0x1583   : > { %8343 = vmatmul.mubr.msk.f32.vlgmr.msra.gmra.mxu0 %vm3100_vm5, %v3111_v59 }
0x1584   : > { %8346 = vmatpush3.xpose.msk.msra.mxu0 %vm1073_vm3, %v3199_v53  ;;  %8349 = vmatprep.mubr.msk.f32.mxu0 %vm8854_vm2, %v8853_v3 }
0x1585   : > { %8347 = vmatprep.subr.mxu0 %v8853_v3 }
0x1588   : > { %8348 = vmatpush3.xpose.msk.msra.mxu0 %vm1073_vm3, %v3197_v54 }
0x1589   : > { %8352 = vmatprep.subr.mxu0 %v8853_v3 }
0x158b   : > { %8350 = vmatmul.mubr.msk.f32.vlgmr.msra.gmra.mxu0 %vm1073_vm3, %v3195_v60 }
0x158c   : > { %8356 = vmatprep.mubr.msk.f32.mxu0 %vm8854_vm2, %v8853_v3 }
0x1643   : > { %v3189_v61 = vpop.f32.mrf.mxu0 }
0x1644   : > { %v3193_v62 = vpack.c.bf16 %v3189_v61, %v3189_v61 }
0x1645   : > { %v8344_v63 = vpop.f32.mrf.mxu0 }
0x1646   : > { %8372 = vmatmul.mubr.msk.bf16.vlgmr.msra.gmra.mxu1 %vm1073_vm3, %v3193_v62 }
0x1647   : > { %8386 = vmatprep.mubr.msk.f32.mxu1 %vm8854_vm2, %v8853_v3 }
0x164b   : > { %v3272_v0 = vpop.f32.mrf.mxu0 }
0x164c   : > { %v3276_v1 = vsel %vm3100_vm5, %v3272_v0, -inf }
0x164d   : > { %3277 = vmax.xlane.f32.xlu1 %v3276_v1  ;;  %v8351_v2 = vpop.f32.mrf.mxu0 }
0x165e   : > { %3289 = vrot.lane.b32.xlu1 %v9458_v32, %s8857_s8 }
0x1662   : > { %3380 = vrot.lane.b32.xlu1 %v9494_v47, %s8858_s5 }
0x1666   : > { %3378 = vrot.lane.b32.xlu1 %v9503_v49, %s8858_s5 }
0x166a   : > { %3482 = vrot.lane.b32.xlu1 %v9461_v34, %s8860_s28 }
0x16d6   : > { %v3278_v5 = vpop.xlane.xlu1 %3277 }
0x16d7   : > { %v3279_v6 = vsub.f32 %v3272_v0, %v3278_v5 }
0x16d9   : > { %v3280_v9 = vmul.f32 1.442695, %v3279_v6 }
0x16da   : > { %v3290_v11 = vpop.permute.xlu1 %3289 }
0x16db   : > { %8803 = vpow2.f32 %v3280_v9  ;;  %8353 = vmatpush3.msk.msra.mxu0 %vm3120_vm4, %v3290_v11 }
0x16dc   : > { %8354 = vmatprep.subr.mxu0 %v8853_v3 }
0x16de   : > { %v3381_v24 = vpop.permute.xlu1 %3380 }
0x16df   : > { %v9546_v25 = vsel %vm1073_vm3, %v3381_v24, 0 }
0x16e2   : > { %v3379_v28 = vpop.permute.xlu1 %3378 }
0x16e3   : > { %v9554_v29 = vsel %vm1073_vm3, %v3379_v28, 0 }
0x16e6   : > { %v3483_v19 = vpop.permute.xlu1 %3482 }
0x16e8   : > { %v8804_v12 = vpop.eup %8803 }
0x16e9   : > { %v3282_v40 = vsel %vm3100_vm5, %v8804_v12, 0.0 }
0x16ea   : > { %3283 = vadd.xlane.f32.xlu0 %v3282_v40 }
0x1700   : > { %3287 = vrot.lane.b32.xlu0 %v9461_v34, %s8857_s8 }
0x1704   : > { %3484 = vrot.lane.b32.xlu0 %v9458_v32, %s8860_s28 }
0x1706   : > { %v9540_v14 = vpop.f32.mrf.mxu1 }
0x1708   : > { %3480 = vrot.lane.b32.xlu0 %v9476_v35, %s8860_s28  ;;  %v8373_v15 = vpop.f32.mrf.mxu1 }
0x1709   : > { %v7641_v15 = vld [vmem:[%s10326_s1 + $0x18] sm:$0x3] }
0x170a   : > { %v3477_v16 = vpop.f32.mrf.mxu1 }
0x170c   : > { %v8374_v26 = vpop.f32.mrf.mxu1 }
0x1773   : > { %v3284_v17 = vpop.xlane.xlu0 %3283 }
0x1774   : > { %8805 = vrcp.f32 %v3284_v17 }
0x1777   : > { %v3288_v18 = vpop.permute.xlu0 %3287 }
0x1778   : > { %8355 = vmatpush3.msra.mxu0 %v3288_v18 }
0x1779   : > { %8359 = vmatprep.subr.bf16.mxu0 %v8853_v3 }
0x177b   : > { %v3485_v23 = vpop.permute.xlu0 %3484 }
0x177f   : > { %v3481_v20 = vpop.permute.xlu0 %3480 }
0x1781   : > { %v8806_v21 = vpop.eup %8805 }
0x1782   : > { %v3286_v27 = vmul.f32 %v8806_v21, %v8804_v12 }
0x1784   : > { %8357 = vmatmul.mubr.msk.f32.vlgmr.msra.gmra.mxu0 %vm3100_vm5, %v3286_v27 }
0x1785   : > { %8360 = vmatpush3.bf16.xpose.msra.mxu0 %v9546_v25  ;;  %8363 = vmatprep.mubr.msk.bf16.mxu0 %vm8854_vm2, %v8853_v3 }
0x1786   : > { %8361 = vmatprep.subr.bf16.mxu0 %v8853_v3 }
0x178d   : > { %8362 = vmatpush3.bf16.xpose.msra.mxu0 %v9554_v29 }
0x178e   : > { %8375 = vmatprep.subr.mxu0 %v8853_v3 }
0x1844   : > { %v3363_v30 = vpop.f32.mrf.mxu0 }
0x1845   : > { %v3367_v22 = vpack.c.bf16 %v3363_v30, %v3363_v30 }
0x1846   : > { %v8358_v33 = vpop.f32.mrf.mxu0 }
0x1847   : > { %8364 = vmatmul.mubr.msk.bf16.vlgmr.msra.gmra.mxu0 %vm1073_vm3, %v3367_v22 }
0x1848   : > { %8376 = vmatpush3.xpose.msk.msra.mxu0 %vm1073_vm3, %v3485_v23  ;;  %8379 = vmatprep.mubr.msk.f32.mxu0 %vm8854_vm2, %v8853_v3 }
0x1849   : > { %8377 = vmatprep.subr.mxu0 %v8853_v3 }
0x184c   : > { %8378 = vmatpush3.xpose.msk.msra.mxu0 %vm1073_vm3, %v3483_v19 }
0x184d   : > { %8389 = vmatprep.subr.bf16.mxu0 %v8853_v3 }
0x184f   : > { %8380 = vmatmul.mubr.msk.f32.vlgmr.msra.gmra.mxu0 %vm1073_vm3, %v3481_v20 }
0x1850   : > { %8393 = vmatprep.mubr.msk.bf16.mxu0 %vm8854_vm2, %v8853_v3 }
0x1907   : > { %v9568_v36 = vpop.f32.mrf.mxu0 }
0x1909   : > { %v8365_v37 = vpop.f32.mrf.mxu0 }
0x190b   : > { %v3428_v38 = vpop.f32.mrf.mxu0 }
0x190d   : > { %v8366_v39 = vpop.f32.mrf.mxu0 }
0x190f   : > { %v3558_v41 = vpop.f32.mrf.mxu0 }
0x1910   : > { %v3562_v42 = vsel %vm3100_vm5, %v3558_v41, -inf }
0x1911   : > { %3563 = vmax.xlane.f32.xlu1 %v3562_v42  ;;  %v8381_v43 = vpop.f32.mrf.mxu0 }
0x1912   : > { %v2935_v43 = vadd.f32 %v9432_v8, %v9478_v58 }
0x1922   : > { %3573 = vrot.lane.b32.xlu1 %v9461_v34, %s8859_s4 }
0x1926   : > { %3712 = vrot.lane.b32.xlu1 %v9458_v32, %s8864_s22 }
0x192a   : > { %3708 = vrot.lane.b32.xlu1 %v9476_v35, %s8864_s22 }
0x192e   : > { %3656 = vrot.lane.b32.xlu1 %v9494_v47, %s8860_s28 }
0x1932   : > { %3654 = vrot.lane.b32.xlu1 %v9503_v49, %s8860_s28 }
0x199a   : > { %v3564_v57 = vpop.xlane.xlu1 %3563 }
0x199b   : > { %v3565_v44 = vsub.f32 %v3558_v41, %v3564_v57  ;;  %v9679_v57 = vmul.f32 0.35355338, %v2935_v43 }
0x199d   : > { %v3566_v45 = vmul.f32 1.442695, %v3565_v44 }
0x199e   : > { %v3574_v54 = vpop.permute.xlu1 %3573 }
0x199f   : > { %8807 = vpow2.f32 %v3566_v45 }
0x19a2   : > { %v3713_v13 = vpop.permute.xlu1 %3712 }
0x19a6   : > { %v3709_v35 = vpop.permute.xlu1 %3708 }
0x19aa   : > { %v3657_v56 = vpop.permute.xlu1 %3656 }
0x19ab   : > { %v9587_v59 = vsel %vm1073_vm3, %v3657_v56, 0 }
0x19ac   : > { %v8808_v46 = vpop.eup %8807  ;;  %8390 = vmatpush3.bf16.xpose.msra.mxu0 %v9587_v59 }
0x19ad   : > { %v3568_v53 = vsel %vm3100_vm5, %v8808_v46, 0.0  ;;  %8391 = vmatprep.subr.bf16.mxu0 %v8853_v3 }
0x19ae   : > { %3569 = vadd.xlane.f32.xlu0 %v3568_v53  ;;  %v3655_v60 = vpop.permute.xlu1 %3654 }
0x19af   : > { %v9592_v61 = vsel %vm1073_vm3, %v3655_v60, 0 }
0x19b4   : > { %8392 = vmatpush3.bf16.xpose.msra.mxu0 %v9592_v61 }
0x19b5   : > { %8419 = vmatprep.subr.bf16.mxu0 %v8853_v3 }
0x19c4   : > { %3575 = vrot.lane.b32.xlu0 %v9458_v32, %s8859_s4 }
0x19c8   : > { %3710 = vrot.lane.b32.xlu0 %v9461_v34, %s8864_s22 }
0x1a37   : > { %v3570_v62 = vpop.xlane.xlu0 %3569 }
0x1a38   : > { %8809 = vrcp.f32 %v3570_v62 }
0x1a3b   : > { %v3576_v63 = vpop.permute.xlu0 %3575 }
0x1a3c   : > { %8383 = vmatpush3.msk.msra.mxu1 %vm3120_vm4, %v3576_v63 }
0x1a3d   : > { %8384 = vmatprep.subr.mxu1 %v8853_v3 }
0x1a3e   : > { %8385 = vmatpush3.msra.mxu1 %v3574_v54 }
0x1a3f   : > { %8397 = vmatprep.subr.mxu1 %v8853_v3  ;;  %v3711_v2 = vpop.permute.xlu0 %3710 }
0x1a45   : > { %v8810_v0 = vpop.eup %8809 }
0x1a46   : > { %v3572_v1 = vmul.f32 %v8810_v0, %v8808_v46 }
0x1a48   : > { %8387 = vmatmul.mubr.msk.f32.vlgmr.msra.gmra.mxu1 %vm3100_vm5, %v3572_v1 }
0x1a49   : > { %8398 = vmatpush3.xpose.msk.msra.mxu1 %vm1073_vm3, %v3713_v13  ;;  %8401 = vmatprep.mubr.msk.f32.mxu1 %vm8854_vm2, %v8853_v3 }
0x1a4a   : > { %8399 = vmatprep.subr.mxu1 %v8853_v3 }
0x1a4d   : > { %8400 = vmatpush3.xpose.msk.msra.mxu1 %vm1073_vm3, %v3711_v2 }
0x1a4e   : > { %8404 = vmatprep.subr.mxu1 %v8853_v3 }
0x1a50   : > { %8402 = vmatmul.mubr.msk.f32.vlgmr.msra.gmra.mxu1 %vm1073_vm3, %v3709_v35 }
0x1a51   : > { %8408 = vmatprep.mubr.msk.f32.mxu1 %vm8854_vm2, %v8853_v3 }
0x1b08   : > { %v3649_v5 = vpop.f32.mrf.mxu1 }
0x1b09   : > { %v3653_v6 = vpack.c.bf16 %v3649_v5, %v3649_v5 }
0x1b0a   : > { %v8388_v9 = vpop.f32.mrf.mxu1 }
0x1b0b   : > { %8394 = vmatmul.mubr.msk.bf16.vlgmr.msra.gmra.mxu0 %vm1073_vm3, %v3653_v6 }
0x1b0c   : > { %8420 = vmatpush3.bf16.xpose.msra.mxu0 %v9389_v50  ;;  %8427 = vmatprep.mubr.msk.bf16.mxu0 %vm8854_vm2, %v8853_v3  ;;  %v7640_v50 = vld [vmem:[%s10326_s1 + $0x10] sm:$0xff] }
0x1b0d   : > { %8421 = vmatprep.subr.bf16.mxu0 %v8853_v3  ;;  %v3940_v16 = vpack.c.bf16 %v7641_v15, %v7640_v50 }
0x1b10   : > { %v3786_v11 = vpop.f32.mrf.mxu1 }
0x1b11   : > { %v3790_v12 = vsel %vm3100_vm5, %v3786_v11, -inf }
0x1b12   : > { %3791 = vmax.xlane.f32.xlu0 %v3790_v12  ;;  %v8403_v40 = vpop.f32.mrf.mxu1 }
0x1b14   : > { %8422 = vmatpush3.bf16.xpose.msra.mxu0 %v9395_v52 }
0x1b15   : > { %8423 = vmatprep.subr.bf16.mxu0 %v8853_v3 }
0x1b1c   : > { %8424 = vmatpush3.bf16.xpose.msra.mxu0 %v9401_v10 }
0x1b1d   : > { %8425 = vmatprep.subr.bf16.mxu0 %v8853_v3 }
0x1b24   : > { %8426 = vmatpush3.bf16.xpose.msra.mxu0 %v9407_v55 }
0x1b25   : > { %8459 = vmatprep.subr.bf16.mxu0 %v8853_v3 }
0x1b28   : > { %3803 = vrot.lane.b32.xlu0 %v9458_v32, %s8863_s20 }
0x1b2b   : > { %8428 = vmatmul.mubr.msk.bf16.vlgmr.msra.gmra.mxu0 %vm1002_vm1, %v3940_v16 }
0x1b2c   : > { %8460 = vmatpush3.bf16.xpose.msra.mxu0 %v9546_v25  ;;  %3884 = vrot.lane.b32.xlu0 %v9494_v47, %s8864_s22 }
0x1b2d   : > { %8461 = vmatprep.subr.bf16.mxu0 %v8853_v3  ;;  %8463 = vmatprep.mubr.msk.bf16.mxu0 %vm8854_vm2, %v8853_v3 }
0x1b30   : > { %3882 = vrot.lane.b32.xlu0 %v9503_v49, %s8864_s22  ;;  %v3475_v49 = vadd.f32 %v9540_v14, %v9568_v36 }
0x1b34   : > { %8462 = vmatpush3.bf16.xpose.msra.mxu0 %v9554_v29 }
0x1b35   : > { %8475 = vmatprep.subr.mxu0 %v8853_v3 }
0x1b9b   : > { %v3792_v52 = vpop.xlane.xlu0 %3791 }
0x1b9c   : > { %v3793_v10 = vsub.f32 %v3786_v11, %v3792_v52 }
0x1b9e   : > { %v3794_v55 = vmul.f32 1.442695, %v3793_v10 }
0x1b9f   : > { %v3804_v32 = vpop.permute.xlu0 %3803 }
0x1ba0   : > { %8811 = vpow2.f32 %v3794_v55  ;;  %8405 = vmatpush3.msk.msra.mxu1 %vm3120_vm4, %v3804_v32 }
0x1ba1   : > { %8406 = vmatprep.subr.mxu1 %v8853_v3 }
0x1ba3   : > { %v3885_v14 = vpop.permute.xlu0 %3884 }
0x1ba4   : > { %v9654_v20 = vsel %vm1073_vm3, %v3885_v14, 0 }
0x1ba7   : > { %v3883_v36 = vpop.permute.xlu0 %3882 }
0x1ba8   : > { %v9662_v37 = vsel %vm1073_vm3, %v3883_v36, 0 }
0x1bad   : > { %v8812_v47 = vpop.eup %8811 }
0x1bae   : > { %v3796_v26 = vsel %vm3100_vm5, %v8812_v47, 0.0 }
0x1baf   : > { %3797 = vadd.xlane.f32.xlu1 %v3796_v26 }
0x1bc0   : > { %3801 = vrot.lane.b32.xlu1 %v9461_v34, %s8863_s20 }
0x1bcb   : > { %v3701_v17 = vpop.f32.mrf.mxu0 }
0x1bcc   : > { %v3707_v18 = vadd.f32 %v3701_v17, %v3475_v49 }
0x1bcd   : > { %v8395_v21 = vpop.f32.mrf.mxu0 }
0x1bcf   : > { %v3704_v24 = vpop.f32.mrf.mxu0 }
0x1bd1   : > { %v8396_v25 = vpop.f32.mrf.mxu0 }
0x1beb   : > { %v3978_v27 = vpop.f32.mrf.mxu0 }
0x1bec   : > { %v9648_v28 = vadd.f32 %v3978_v27, %v9455_v31 }
0x1bed   : > { %v8429_v29 = vpop.f32.mrf.mxu0 }
0x1bee   : > { %4076 = vrot.lane.b32.xlu1 %v9648_v28, %s8856_s26 }
0x1bef   : > { %v3981_v30 = vpop.f32.mrf.mxu0 }
0x1bf0   : > { %v9667_v41 = vadd.f32 %v3981_v30, %v9455_v31 }
0x1bf1   : > { %v8430_v22 = vpop.f32.mrf.mxu0 }
0x1c38   : > { %v3798_v33 = vpop.xlane.xlu1 %3797 }
0x1c39   : > { %8813 = vrcp.f32 %v3798_v33 }
0x1c3c   : > { %v3802_v34 = vpop.permute.xlu1 %3801 }
0x1c3d   : > { %8407 = vmatpush3.msra.mxu1 %v3802_v34 }
0x1c3e   : > { %8411 = vmatprep.subr.bf16.mxu1 %v8853_v3 }
0x1c46   : > { %v8814_v23 = vpop.eup %8813 }
0x1c47   : > { %v3800_v19 = vmul.f32 %v8814_v23, %v8812_v47 }
0x1c49   : > { %8409 = vmatmul.mubr.msk.f32.vlgmr.msra.gmra.mxu1 %vm3100_vm5, %v3800_v19 }
0x1c4a   : > { %8412 = vmatpush3.bf16.xpose.msra.mxu1 %v9654_v20  ;;  %8415 = vmatprep.mubr.msk.bf16.mxu1 %vm8854_vm2, %v8853_v3 }
0x1c4b   : > { %8413 = vmatprep.subr.bf16.mxu1 %v8853_v3 }
0x1c52   : > { %8414 = vmatpush3.bf16.xpose.msra.mxu1 %v9662_v37 }
0x1c53   : > { %8431 = vmatprep.subr.mxu1 %v8853_v3 }
0x1c60   : > { %v4077_v62 = vpop.permute.xlu1 %4076 }
0x1d09   : > { %v3877_v38 = vpop.f32.mrf.mxu1 }
0x1d0a   : > { %v3881_v39 = vpack.c.bf16 %v3877_v38, %v3877_v38 }
0x1d0b   : > { %v8410_v42 = vpop.f32.mrf.mxu1 }
0x1d0c   : > { %8416 = vmatmul.mubr.msk.bf16.vlgmr.msra.gmra.mxu1 %vm1073_vm3, %v3881_v39 }
0x1d0d   : > { %8432 = vmatpush3.xpose.msk.msra.mxu1 %vm1073_vm3, %v9667_v41  ;;  %8435 = vmatprep.mubr.msk.f32.mxu1 %vm8854_vm2, %v8853_v3 }
0x1d0e   : > { %8433 = vmatprep.subr.mxu1 %v8853_v3 }
0x1d11   : > { %8434 = vmatpush3.xpose.msk.msra.mxu1 %vm1073_vm3, %v9648_v28 }
0x1d12   : > { %8438 = vmatprep.subr.mxu1 %v8853_v3 }
0x1d14   : > { %8436 = vmatmul.mubr.msk.f32.vlgmr.msra.gmra.mxu1 %vm1073_vm3, %v9679_v57 }
0x1d15   : > { %8442 = vmatprep.mubr.msk.f32.mxu1 %vm8854_vm2, %v8853_v3 }
0x1dcc   : > { %v3929_v31 = vpop.f32.mrf.mxu1 }
0x1dcd   : > { %v3935_v44 = vadd.f32 %v3929_v31, %v3707_v18 }
0x1dce   : > { %v8417_v45 = vpop.f32.mrf.mxu1 }
0x1dcf   : > { %3936 = vst.msk [vmem:[#allocation3] sm:$0xff] %vm1002_vm1, %v3935_v44 }
0x1dd0   : > { %v3932_v8 = vpop.f32.mrf.mxu1 }
0x1dd2   : > { %v8418_v58 = vpop.f32.mrf.mxu1 }
0x1dd4   : > { %v4061_v46 = vpop.f32.mrf.mxu1 }
0x1dd5   : > { %v4065_v53 = vsel %vm3100_vm5, %v4061_v46, -inf }
0x1dd6   : > { %4066 = vmax.xlane.f32.xlu0 %v4065_v53  ;;  %v8437_v54 = vpop.f32.mrf.mxu1 }
0x1dec   : > { %4078 = vrot.lane.b32.xlu0 %v9667_v41, %s8856_s26 }
0x1df0   : > { %4161 = vrot.lane.b32.xlu0 %v9667_v41, %s8858_s5 }
0x1df4   : > { %4157 = vrot.lane.b32.xlu0 %v9679_v57, %s8858_s5 }
0x1e5f   : > { %v4067_v13 = vpop.xlane.xlu0 %4066 }
0x1e60   : > { %v4068_v35 = vsub.f32 %v4061_v46, %v4067_v13 }
0x1e62   : > { %v4069_v56 = vmul.f32 1.442695, %v4068_v35 }
0x1e63   : > { %v4079_v60 = vpop.permute.xlu0 %4078 }
0x1e64   : > { %8815 = vpow2.f32 %v4069_v56  ;;  %8439 = vmatpush3.msk.msra.mxu1 %vm3120_vm4, %v4079_v60 }
0x1e65   : > { %8440 = vmatprep.subr.mxu1 %v8853_v3 }
0x1e66   : > { %8441 = vmatpush3.msra.mxu1 %v4077_v62 }
0x1e67   : > { %8445 = vmatprep.subr.mxu1 %v8853_v3  ;;  %v4162_v6 = vpop.permute.xlu0 %4161 }
0x1e6b   : > { %v4158_v11 = vpop.permute.xlu0 %4157 }
0x1e71   : > { %v8816_v63 = vpop.eup %8815 }
0x1e72   : > { %v4071_v0 = vsel %vm3100_vm5, %v8816_v63, 0.0 }
0x1e73   : > { %4072 = vadd.xlane.f32.xlu1 %v4071_v0 }
0x1e84   : > { %4159 = vrot.lane.b32.xlu1 %v9648_v28, %s8858_s5  ;;  %s10330_s5 = scalar_lea.vmem %s10267_s9, %s8995_s29 }
0x1efc   : > { %v4073_v1 = vpop.xlane.xlu1 %4072 }
0x1efd   : > { %8817 = vrcp.f32 %v4073_v1 }
0x1f00   : > { %v4160_v9 = vpop.permute.xlu1 %4159 }
0x1f0a   : > { %v8818_v2 = vpop.eup %8817 }
0x1f0b   : > { %v4075_v5 = vmul.f32 %v8818_v2, %v8816_v63  ;;  %v4854_v2 = vld [vmem:[#allocation3] sm:$0xff] }
0x1f0d   : > { %8443 = vmatmul.mubr.msk.f32.vlgmr.msra.gmra.mxu1 %vm3100_vm5, %v4075_v5 }
0x1f0e   : > { %8446 = vmatpush3.xpose.msk.msra.mxu1 %vm1073_vm3, %v4162_v6  ;;  %8449 = vmatprep.mubr.msk.f32.mxu1 %vm8854_vm2, %v8853_v3 }
0x1f0f   : > { %8447 = vmatprep.subr.mxu1 %v8853_v3 }
0x1f12   : > { %8448 = vmatpush3.xpose.msk.msra.mxu1 %vm1073_vm3, %v4160_v9 }
0x1f13   : > { %8452 = vmatprep.subr.mxu1 %v8853_v3 }
0x1f15   : > { %8450 = vmatmul.mubr.msk.f32.vlgmr.msra.gmra.mxu1 %vm1073_vm3, %v4158_v11 }
0x1f16   : > { %8456 = vmatprep.mubr.msk.f32.mxu1 %vm8854_vm2, %v8853_v3 }
0x1fcd   : > { %v4152_v12 = vpop.f32.mrf.mxu1 }
0x1fce   : > { %v4156_v24 = vpack.c.bf16 %v4152_v12, %v4152_v12 }
0x1fcf   : > { %v8444_v40 = vpop.f32.mrf.mxu1 }
0x1fd5   : > { %v4235_v50 = vpop.f32.mrf.mxu1 }
0x1fd6   : > { %v4239_v15 = vsel %vm3100_vm5, %v4235_v50, -inf }
0x1fd7   : > { %4240 = vmax.xlane.f32.xlu1 %v4239_v15  ;;  %v8451_v16 = vpop.f32.mrf.mxu1 }
0x1fe8   : > { %4250 = vrot.lane.b32.xlu1 %v9648_v28, %s8857_s8 }
0x1fec   : > { %4421 = vrot.lane.b32.xlu1 %v9667_v41, %s8860_s28 }
0x1ff0   : > { %4417 = vrot.lane.b32.xlu1 %v9679_v57, %s8860_s28 }
0x1ff4   : > { %4510 = vrot.lane.b32.xlu1 %v9648_v28, %s8859_s4 }
0x2060   : > { %v4241_v52 = vpop.xlane.xlu1 %4240 }
0x2061   : > { %v4242_v10 = vsub.f32 %v4235_v50, %v4241_v52 }
0x2063   : > { %v4243_v55 = vmul.f32 1.442695, %v4242_v10 }
0x2064   : > { %v4251_v17 = vpop.permute.xlu1 %4250 }
0x2065   : > { %8819 = vpow2.f32 %v4243_v55 }
0x2072   : > { %v8820_v32 = vpop.eup %8819 }
0x2073   : > { %v4245_v47 = vsel %vm3100_vm5, %v8820_v32, 0.0 }
0x2074   : > { %4246 = vadd.xlane.f32.xlu0 %v4245_v47 }
0x208a   : > { %4252 = vrot.lane.b32.xlu0 %v9667_v41, %s8857_s8 }
0x208e   : > { %4419 = vrot.lane.b32.xlu0 %v9648_v28, %s8860_s28 }
0x20fd   : > { %v4247_v26 = vpop.xlane.xlu0 %4246 }
0x20fe   : > { %8821 = vrcp.f32 %v4247_v26 }
0x2101   : > { %v4253_v49 = vpop.permute.xlu0 %4252 }
0x2102   : > { %8453 = vmatpush3.msk.msra.mxu1 %vm3120_vm4, %v4253_v49 }
0x2103   : > { %8454 = vmatprep.subr.mxu1 %v8853_v3 }
0x2104   : > { %8455 = vmatpush3.msra.mxu1 %v4251_v17 }
0x2105   : > { %8467 = vmatprep.subr.bf16.mxu1 %v8853_v3 }
0x210b   : > { %v8822_v18 = vpop.eup %8821 }
0x210c   : > { %v4249_v21 = vmul.f32 %v8822_v18, %v8820_v32 }
0x210e   : > { %8457 = vmatmul.mubr.msk.f32.vlgmr.msra.gmra.mxu1 %vm3100_vm5, %v4249_v21 }
0x210f   : > { %8468 = vmatpush3.bf16.xpose.msra.mxu1 %v9498_v48  ;;  %8471 = vmatprep.mubr.msk.bf16.mxu1 %vm8854_vm2, %v8853_v3 }
0x2110   : > { %8469 = vmatprep.subr.bf16.mxu1 %v8853_v3 }
0x2117   : > { %8470 = vmatpush3.bf16.xpose.msra.mxu1 %v9507_v51  ;;  %v4422_v51 = vpop.permute.xlu1 %4421 }
0x2118   : > { %8489 = vmatprep.subr.bf16.mxu1 %v8853_v3 }
0x211e   : > { %8472 = vmatmul.mubr.msk.bf16.vlgmr.msra.gmra.mxu1 %vm1073_vm3, %v4156_v24 }
0x211f   : > { %8490 = vmatpush3.bf16.xpose.msra.mxu1 %v9587_v59  ;;  %8493 = vmatprep.mubr.msk.bf16.mxu1 %vm8854_vm2, %v8853_v3  ;;  %v4420_v59 = vpop.permute.xlu0 %4419 }
0x2120   : > { %8491 = vmatprep.subr.bf16.mxu1 %v8853_v3 }
0x2127   : > { %8492 = vmatpush3.bf16.xpose.msra.mxu1 %v9592_v61  ;;  %v4418_v61 = vpop.permute.xlu1 %4417 }
0x2128   : > { %8511 = vmatprep.subr.bf16.mxu1 %v8853_v3 }
0x212b   : > { %v4511_v45 = vpop.permute.xlu1 %4510 }
0x21ce   : > { %v4326_v48 = vpop.f32.mrf.mxu1 }
0x21cf   : > { %v4330_v25 = vpack.c.bf16 %v4326_v48, %v4326_v48 }
0x21d0   : > { %v8458_v27 = vpop.f32.mrf.mxu1 }
0x21d1   : > { %8464 = vmatmul.mubr.msk.bf16.vlgmr.msra.gmra.mxu0 %vm1073_vm3, %v4330_v25 }
0x21d2   : > { %8476 = vmatpush3.xpose.msk.msra.mxu0 %vm1073_vm3, %v4422_v51  ;;  %8479 = vmatprep.mubr.msk.f32.mxu0 %vm8854_vm2, %v8853_v3 }
0x21d3   : > { %8477 = vmatprep.subr.mxu0 %v8853_v3 }
0x21d6   : > { %8478 = vmatpush3.xpose.msk.msra.mxu0 %vm1073_vm3, %v4420_v59 }
0x21d7   : > { %8482 = vmatprep.subr.mxu0 %v8853_v3 }
0x21d9   : > { %8480 = vmatmul.mubr.msk.f32.vlgmr.msra.gmra.mxu0 %vm1073_vm3, %v4418_v61 }
0x21da   : > { %8486 = vmatprep.mubr.msk.f32.mxu0 %vm8854_vm2, %v8853_v3 }
0x21de   : > { %v9751_v29 = vpop.f32.mrf.mxu1 }
0x21e0   : > { %v8473_v30 = vpop.f32.mrf.mxu1 }
0x21e2   : > { %v4414_v22 = vpop.f32.mrf.mxu1 }
0x21e4   : > { %v8474_v33 = vpop.f32.mrf.mxu1 }
0x2291   : > { %v9753_v34 = vpop.f32.mrf.mxu0 }
0x2293   : > { %v8465_v14 = vpop.f32.mrf.mxu0 }
0x2294   : > { %v8635_v14 = vld [vmem:[%s9044_s23 + $0x78] sm:$0xff]  }
0x2295   : > { %v4371_v23 = vpop.f32.mrf.mxu0 }
0x2296   : > { %v8636_v23 = vld [vmem:[%s9044_s23 + $0xf8] sm:$0xff]  }
0x2297   : > { %v8466_v19 = vpop.f32.mrf.mxu0 }
0x2298   : > { %v8637_v19 = vld [vmem:[%s9044_s23 + $0x38] sm:$0xff]  }
0x2299   : > { %v4495_v36 = vpop.f32.mrf.mxu0 }
0x229a   : > { %v4499_v38 = vsel %vm3100_vm5, %v4495_v36, -inf }
0x229b   : > { %4500 = vmax.xlane.f32.xlu0 %v4499_v38  ;;  %v8481_v39 = vpop.f32.mrf.mxu0  ;;  %v8639_v38 = vld [vmem:[%s9044_s23 + $0x70] sm:$0xff]  }
0x229c   : > { %v8640_v39 = vld [vmem:[%s9044_s23 + $0xf0] sm:$0xff]  }
0x22b1   : > { %4512 = vrot.lane.b32.xlu0 %v9667_v41, %s8859_s4 }
0x22b5   : > { %4639 = vrot.lane.b32.xlu0 %v9667_v41, %s8864_s22 }
0x22b9   : > { %4635 = vrot.lane.b32.xlu0 %v9679_v57, %s8864_s22 }
0x2324   : > { %v4501_v42 = vpop.xlane.xlu0 %4500 }
0x2325   : > { %v4502_v43 = vsub.f32 %v4495_v36, %v4501_v42  ;;  %v8638_v36 = vld [vmem:[%s9044_s23 + $0xb8] sm:$0xff]  }
0x2326   : > { %v5965_v42 = vsel %vm1002_vm1, %v8638_v36, 0 }
0x2327   : > { %v4503_v31 = vmul.f32 1.442695, %v4502_v43  ;;  %v8641_v43 = vld [vmem:[%s9044_s23 + $0x30] sm:$0xff]  }
0x2328   : > { %v4513_v44 = vpop.permute.xlu0 %4512 }
0x2329   : > { %8823 = vpow2.f32 %v4503_v31  ;;  %8483 = vmatpush3.msk.msra.mxu0 %vm3120_vm4, %v4513_v44  ;;  %v8642_v31 = vld [vmem:[%s9044_s23 + $0xb0] sm:$0xff]   ;;  %v5914_v44 = vsel %vm1002_vm1, %v8641_v43, 0 }
0x232a   : > { %8484 = vmatprep.subr.mxu0 %v8853_v3 }
0x232b   : > { %8485 = vmatpush3.msra.mxu0 %v4511_v45  ;;  %v8643_v45 = vld [vmem:[%s9044_s23 + $0x68] sm:$0xff]  }
0x232c   : > { %8497 = vmatprep.subr.mxu0 %v8853_v3  ;;  %v4640_v54 = vpop.permute.xlu0 %4639 }
0x2330   : > { %v4636_v35 = vpop.permute.xlu0 %4635 }
0x2336   : > { %v8824_v8 = vpop.eup %8823 }
0x2337   : > { %v4505_v58 = vsel %vm3100_vm5, %v8824_v8, 0.0 }
0x2338   : > { %4506 = vadd.xlane.f32.xlu1 %v4505_v58  ;;  %v8644_v58 = vld [vmem:[%s9044_s23 + $0xe8] sm:$0xff]  }
0x2349   : > { %4637 = vrot.lane.b32.xlu1 %v9648_v28, %s8864_s22 }
0x23c1   : > { %v4507_v57 = vpop.xlane.xlu1 %4506 }
0x23c2   : > { %8825 = vrcp.f32 %v4507_v57  ;;  %v8645_v57 = vld [vmem:[%s9044_s23 + $0x28] sm:$0xff]  }
0x23c5   : > { %v4638_v13 = vpop.permute.xlu1 %4637 }
0x23cf   : > { %v8826_v46 = vpop.eup %8825 }
0x23d0   : > { %v4509_v53 = vmul.f32 %v8826_v46, %v8824_v8  ;;  %v5962_v8 = vsel %vm1002_vm1, %v8642_v31, 0  ;;  %v8646_v46 = vld [vmem:[%s9044_s23 + $0xa8] sm:$0xff]  }
0x23d2   : > { %8487 = vmatmul.mubr.msk.f32.vlgmr.msra.gmra.mxu0 %vm3100_vm5, %v4509_v53  ;;  %v5911_v53 = vsel %vm1002_vm1, %v8645_v57, 0  ;;  %v8673_v57 = vld [vmem:[%s9044_s23 + $0x130] sm:$0xff]  }
0x23d3   : > { %8498 = vmatpush3.xpose.msk.msra.mxu0 %vm1073_vm3, %v4640_v54  ;;  %8501 = vmatprep.mubr.msk.f32.mxu0 %vm8854_vm2, %v8853_v3  ;;  %v8647_v54 = vld [vmem:[%s9044_s23 + $0x60] sm:$0xff]  }
0x23d4   : > { %8499 = vmatprep.subr.mxu0 %v8853_v3 }
0x23d7   : > { %8500 = vmatpush3.xpose.msk.msra.mxu0 %vm1073_vm3, %v4638_v13  ;;  %v5959_v13 = vsel %vm1002_vm1, %v8646_v46, 0  ;;  %v8674_v46 = vld [vmem:[%s9044_s23 + $0x1b0] sm:$0xff]  }
0x23d8   : > { %8504 = vmatprep.subr.mxu0 %v8853_v3 }
0x23da   : > { %8502 = vmatmul.mubr.msk.f32.vlgmr.msra.gmra.mxu0 %vm1073_vm3, %v4636_v35  ;;  %v8648_v35 = vld [vmem:[%s9044_s23 + $0xe0] sm:$0xff]  }
0x23db   : > { %8508 = vmatprep.mubr.msk.f32.mxu0 %vm8854_vm2, %v8853_v3 }
0x2492   : > { %v4586_v56 = vpop.f32.mrf.mxu0 }
0x2493   : > { %v4590_v60 = vpack.c.bf16 %v4586_v56, %v4586_v56  ;;  %v8649_v56 = vld [vmem:[%s9044_s23 + $0x20] sm:$0xff]  }
0x2494   : > { %v8488_v62 = vpop.f32.mrf.mxu0 }
0x2495   : > { %8494 = vmatmul.mubr.msk.bf16.vlgmr.msra.gmra.mxu1 %vm1073_vm3, %v4590_v60  ;;  %v8650_v60 = vld [vmem:[%s9044_s23 + $0xa0] sm:$0xff]   ;;  %v5908_v62 = vsel %vm1002_vm1, %v8649_v56, 0  ;;  %v8677_v56 = vld [vmem:[%s9044_s23 + $0x128] sm:$0xff]  }
0x2496   : > { %8512 = vmatpush3.bf16.xpose.msra.mxu1 %v9654_v20  ;;  %8515 = vmatprep.mubr.msk.bf16.mxu1 %vm8854_vm2, %v8853_v3  ;;  %v7667_v20 = vld [vmem:[%s10330_s5] ss:$0 sm:$0xff] }
0x2497   : > { %8513 = vmatprep.subr.bf16.mxu1 %v8853_v3  ;;  %v4863_v5 = vadd.f32 %v7667_v20, %v4854_v2  ;;  %v8653_v2 = vld [vmem:[%s9044_s23 + $0x18] sm:$0xff]  }
0x2499   : > { %v4865_v6 = vadd.f32 %v4863_v5, %v9446_v4  ;;  %v5905_v5 = vsel %vm1002_vm1, %v8653_v2, 0  ;;  %v8681_v2 = vld [vmem:[%s9044_s23 + $0x120] sm:$0xff]  }
0x249a   : > { %v4713_v63 = vpop.f32.mrf.mxu0 }
0x249b   : > { %v4717_v0 = vsel %vm3100_vm5, %v4713_v63, -inf  ;;  %v4867_v9 = vsel %vm1002_vm1, %v4865_v6, 0.0 }
0x249c   : > { %4718 = vmax.xlane.f32.xlu1 %v4717_v0  ;;  %v8503_v1 = vpop.f32.mrf.mxu0  ;;  %v5956_v0 = vsel %vm1002_vm1, %v8650_v60, 0  ;;  %v8678_v60 = vld [vmem:[%s9044_s23 + $0x1a8] sm:$0xff]  }
0x249d   : > { %v8652_v1 = vld [vmem:[%s9044_s23 + $0xd8] sm:$0xff]  }
0x249e   : > { %8514 = vmatpush3.bf16.xpose.msra.mxu1 %v9662_v37 }
0x249f   : > { %8539 = vmatprep.subr.msk.bf16.mxu1 %vm1002_vm1, %v8636_v23 }
0x24ad   : > { %4728 = vrot.lane.b32.xlu1 %v9648_v28, %s8863_s20  ;;  %v4412_v28 = vadd.f32 %v9751_v29, %v9753_v34 }
0x24d1   : > { %4868 = vadd.xlane.f32.xlu1 %v4867_v9 }
0x2525   : > { %v4719_v11 = vpop.xlane.xlu1 %4718 }
0x2526   : > { %v4720_v12 = vsub.f32 %v4713_v63, %v4719_v11  ;;  %v8651_v63 = vld [vmem:[%s9044_s23 + $0x58] sm:$0xff]  }
0x2528   : > { %v4721_v40 = vmul.f32 1.442695, %v4720_v12 }
0x2529   : > { %v4729_v47 = vpop.permute.xlu1 %4728 }
0x252a   : > { %8827 = vpow2.f32 %v4721_v40 }
0x2537   : > { %v8828_v37 = vpop.eup %8827 }
0x2538   : > { %v4723_v50 = vsel %vm3100_vm5, %v8828_v37, 0.0 }
0x2539   : > { %4724 = vadd.xlane.f32.xlu0 %v4723_v50  ;;  %v8655_v50 = vld [vmem:[%s9044_s23 + $0x50] sm:$0xff]  }
0x254f   : > { %4730 = vrot.lane.b32.xlu0 %v9667_v41, %s8863_s20 }
0x2555   : > { %v4628_v15 = vpop.f32.mrf.mxu1 }
0x2556   : > { %v4634_v16 = vadd.f32 %v4628_v15, %v4412_v28  ;;  %v8656_v28 = vld [vmem:[%s9044_s23 + $0xd0] sm:$0xff]  }
0x2557   : > { %v8495_v4 = vpop.f32.mrf.mxu1  ;;  %v8657_v15 = vld [vmem:[%s9044_s23 + $0x10] sm:$0xff]  }
0x2558   : > { %v5902_v4 = vsel %vm1002_vm1, %v8657_v15, 0  ;;  %v8688_v15 = vld [vmem:[%s9044_s23 + $0x1d0] sm:$0xff]  }
0x2559   : > { %v4631_v52 = vpop.f32.mrf.mxu1 }
0x255a   : > { %v4869_v25 = vpop.xlane.xlu1 %4868 }
0x255b   : > { %v8496_v10 = vpop.f32.mrf.mxu1  ;;  %v4873_v51 = vmul.f32 0.03125, %v4869_v25  ;;  %v8667_v25 = vld [vmem:[%s9044_s23 + $0x178] sm:$0xff]  }
0x255c   : > { %v8659_v10 = vld [vmem:[%s9044_s23 + $0x48] sm:$0xff]  }
0x255d   : > { %v9804_v61 = vsub.f32 %v4865_v6, %v4873_v51 }
0x255f   : > { %v4877_v33 = vmul.f32 %v9804_v61, %v9804_v61 }
0x2561   : > { %v4879_v34 = vsel %vm1002_vm1, %v4877_v33, 0.0 }
0x25c2   : > { %v4725_v55 = vpop.xlane.xlu0 %4724 }
0x25c3   : > { %8829 = vrcp.f32 %v4725_v55  ;;  %v8660_v55 = vld [vmem:[%s9044_s23 + $0xc8] sm:$0xff]  }
0x25c6   : > { %v4731_v32 = vpop.permute.xlu0 %4730 }
0x25c7   : > { %8505 = vmatpush3.msk.msra.mxu0 %vm3120_vm4, %v4731_v32  ;;  %v8661_v32 = vld [vmem:[%s9044_s23 + $0x8] sm:$0xff]  }
0x25c8   : > { %8506 = vmatprep.subr.mxu0 %v8853_v3 }
0x25c9   : > { %8507 = vmatpush3.msra.mxu0 %v4729_v47  ;;  %v8662_v47 = vld [vmem:[%s9044_s23 + $0x88] sm:$0xff]  }
0x25ca   : > { %8531 = vmatprep.subr.msk.bf16.mxu0 %vm1002_vm1, %v8635_v14  ;;  %v7668_v14 = vld [vmem:[%s930_s10] ss:$0 sm:$0xff]  ;;  %s10336_s10 = sld [smem:[#allocation21_spill]] (!%p7841_p5) }
0x25d0   : > { %v8830_v26 = vpop.eup %8829 }
0x25d1   : > { %v4727_v49 = vmul.f32 %v8830_v26, %v8828_v37  ;;  %v5899_v26 = vsel %vm1002_vm1, %v8661_v32, 0  ;;  %v8692_v32 = vld [vmem:[%s9044_s23 + $0x1c8] sm:$0xff]  }
0x25d3   : > { %8509 = vmatmul.mubr.msk.f32.vlgmr.msra.gmra.mxu0 %vm3100_vm5, %v4727_v49  ;;  %v5947_v49 = vsel %vm1002_vm1, %v8662_v47, 0  ;;  %v8693_v47 = vld [vmem:[%s9044_s23 + $0x108] sm:$0xff]  }
0x2693   : > { %v4804_v41 = vpop.f32.mrf.mxu0 }
0x2694   : > { %v4808_v17 = vpack.c.bf16 %v4804_v41, %v4804_v41  ;;  %v8663_v41 = vld [vmem:[%s9044_s23 + $0x40] sm:$0xff]  }
0x2695   : > { %v8510_v18 = vpop.f32.mrf.mxu0 }
0x2696   : > { %8516 = vmatmul.mubr.msk.bf16.vlgmr.msra.gmra.mxu1 %vm1073_vm3, %v4808_v17  ;;  %v8664_v17 = vld [vmem:[%s9044_s23 + $0xc0] sm:$0xff]  }
0x2697   : > { %8021 = vmatpush3.bf16.xpose.msra.mxu1 %v5965_v42  ;;  %v8665_v18 = vld [vmem:[%s9044_s23] sm:$0xff]   ;;  %v8670_v42 = vld [vmem:[%s9044_s23 + $0x1b8] sm:$0xff]  }
0x2698   : > { %8540 = vmatprep.subr.msk.bf16.mxu1 %vm1002_vm1, %v8640_v39 }
0x269f   : > { %8023 = vmatpush3.bf16.xpose.msra.mxu1 %v5962_v8  ;;  %v8671_v8 = vld [vmem:[%s9044_s23 + $0x170] sm:$0xff]  }
0x26a0   : > { %8541 = vmatprep.subr.msk.bf16.mxu1 %vm1002_vm1, %v8644_v58  ;;  %v8672_v58 = vld [vmem:[%s9044_s23 + $0x1f0] sm:$0xff]  }
0x26a7   : > { %8025 = vmatpush3.bf16.xpose.msra.mxu1 %v5959_v13  ;;  %v8675_v13 = vld [vmem:[%s9044_s23 + $0x168] sm:$0xff]  }
0x26a8   : > { %8542 = vmatprep.subr.msk.bf16.mxu1 %vm1002_vm1, %v8648_v35  ;;  %v8676_v35 = vld [vmem:[%s9044_s23 + $0x1e8] sm:$0xff]  }
0x26af   : > { %8027 = vmatpush3.bf16.xpose.msra.mxu1 %v5956_v0  ;;  %v8679_v0 = vld [vmem:[%s9044_s23 + $0x160] sm:$0xff]  }
0x26b0   : > { %8543 = vmatprep.subr.msk.bf16.mxu1 %vm1002_vm1, %v8652_v1  ;;  %v8680_v1 = vld [vmem:[%s9044_s23 + $0x1e0] sm:$0xff]  }
0x2756   : > { %v4846_v21 = vpop.f32.mrf.mxu1 }
0x2757   : > { %v4852_v24 = vadd.f32 %v4846_v21, %v4634_v16  ;;  %v8658_v16 = vld [vmem:[%s9044_s23 + $0x90] sm:$0xff]   ;;  %v8666_v21 = vld [vmem:[%s9044_s23 + $0x80] sm:$0xff]  }
0x2758   : > { %v8517_v48 = vpop.f32.mrf.mxu1  ;;  %v5950_v52 = vsel %vm1002_vm1, %v8658_v16, 0  ;;  %v8689_v16 = vld [vmem:[%s9044_s23 + $0x110] sm:$0xff]  }
0x2759   : > { %4853 = vst.msk [vmem:[#allocation3 + $0x8] sm:$0xff] %vm1002_vm1, %v4852_v24  ;;  %v5896_v24 = vsel %vm1002_vm1, %v8665_v18, 0  ;;  %v5944_v48 = vsel %vm1002_vm1, %v8666_v21, 0  ;;  %v8696_v18 = vld [vmem:[%s9044_s23 + $0x1c0] sm:$0xff]  }
0x275a   : > { %v4849_v3 = vpop.f32.mrf.mxu1  ;;  %v8697_v21 = vld [vmem:[%s9044_s23 + $0x100] sm:$0xff]  }
0x275b   : > { %v8668_v3 = vld [vmem:[%s9044_s23 + $0x1f8] sm:$0xff]  }
0x275c   : > { %v8518_v27 = vpop.f32.mrf.mxu1 }
0x2760   : > { %v4855_v59 = vld [vmem:[#allocation3 + $0x8] sm:$0xff] }
0x2761   : > { %v4864_v29 = vadd.f32 %v7667_v20, %v4855_v59  ;;  %v8654_v20 = vld [vmem:[%s9044_s23 + $0x98] sm:$0xff]  }
0x2762   : > { %v5953_v6 = vsel %vm1002_vm1, %v8654_v20, 0  ;;  %v8682_v20 = vld [vmem:[%s9044_s23 + $0x1a0] sm:$0xff]  }
0x2763   : > { %v4866_v30 = vadd.f32 %v4864_v29, %v9448_v7  ;;  %v5917_v7 = vsel %vm1002_vm1, %v8637_v19, 0  ;;  %8029 = vmatpush3.bf16.xpose.msra.mxu1 %v5953_v6  ;;  %v6052_v6 = vsel %vm1002_vm1, %v8682_v20, 0 }
0x2764   : > { %8003 = vmatpush3.bf16.xpose.msra.mxu0 %v5917_v7  ;;  %8544 = vmatprep.subr.msk.bf16.mxu1 %vm1002_vm1, %v8656_v28  ;;  %v8669_v7 = vld [vmem:[%s9044_s23 + $0x138] sm:$0xff]   ;;  %v8687_v28 = vld [vmem:[%s9044_s23 + $0x150] sm:$0xff]  }
0x2765   : > { %v4870_v22 = vsel %vm1002_vm1, %v4866_v30, 0.0  ;;  %8532 = vmatprep.subr.msk.bf16.mxu0 %vm1002_vm1, %v8639_v38  ;;  %v7669_v38 = vld [vmem:[%s933_s24] ss:$0 sm:$0xff] }
0x2766   : > { %4871 = vadd.xlane.f32.xlu0 %v4870_v22 }
0x276a   : > { %4880 = vadd.xlane.f32.xlu0 %v4879_v34 }
0x276b   : > { %8031 = vmatpush3.bf16.xpose.msra.mxu1 %v5950_v52  ;;  %v5998_v52 = vsel %vm1002_vm1, %v8689_v16, 0  ;;  %v8730_v16 = vld [vmem:[%s9044_s23 + $0x280] sm:$0xff]  }
0x276c   : > { %8005 = vmatpush3.bf16.xpose.msra.mxu0 %v5914_v44  ;;  %8545 = vmatprep.subr.msk.bf16.mxu1 %vm1002_vm1, %v8660_v55  ;;  %v6013_v44 = vsel %vm1002_vm1, %v8669_v7, 0  ;;  %v8691_v55 = vld [vmem:[%s9044_s23 + $0x148] sm:$0xff]  }
0x276d   : > { %8533 = vmatprep.subr.msk.bf16.mxu0 %vm1002_vm1, %v8643_v45  ;;  %v6061_v45 = vsel %vm1002_vm1, %v8670_v42, 0  ;;  %v8710_v7 = vld [vmem:[%s9044_s23 + $0x2a8] sm:$0xff]  }
0x2773   : > { %8033 = vmatpush3.bf16.xpose.msra.mxu1 %v5947_v49  ;;  %v5995_v49 = vsel %vm1002_vm1, %v8693_v47, 0  ;;  %v8734_v47 = vld [vmem:[%s9044_s23 + $0x3b8] sm:$0xff]  }
0x2774   : > { %8007 = vmatpush3.bf16.xpose.msra.mxu0 %v5911_v53  ;;  %8546 = vmatprep.subr.msk.bf16.mxu1 %vm1002_vm1, %v8664_v17  ;;  %v6010_v53 = vsel %vm1002_vm1, %v8673_v57, 0  ;;  %v8695_v17 = vld [vmem:[%s9044_s23 + $0x140] sm:$0xff]  }
0x2775   : > { %8534 = vmatprep.subr.msk.bf16.mxu0 %vm1002_vm1, %v8647_v54  ;;  %v6058_v54 = vsel %vm1002_vm1, %v8674_v46, 0  ;;  %v8714_v57 = vld [vmem:[%s9044_s23 + $0x2a0] sm:$0xff]  }
0x277b   : > { %8035 = vmatpush3.bf16.xpose.msra.mxu1 %v5944_v48  ;;  %v5992_v48 = vsel %vm1002_vm1, %v8697_v21, 0  ;;  %v8738_v21 = vld [vmem:[%s9044_s23 + $0x3b0] sm:$0xff]  }
0x277c   : > { %8009 = vmatpush3.bf16.xpose.msra.mxu0 %v5908_v62  ;;  %8555 = vmatprep.subr.msk.bf16.mxu1 %vm1002_vm1, %v8668_v3  ;;  %v6007_v62 = vsel %vm1002_vm1, %v8677_v56, 0  ;;  %v8699_v3 = vld [vmem:[%s9044_s23 + $0x278] sm:$0xff]  }
0x277d   : > { %8535 = vmatprep.subr.msk.bf16.mxu0 %vm1002_vm1, %v8651_v63  ;;  %v6055_v63 = vsel %vm1002_vm1, %v8678_v60, 0  ;;  %v8718_v56 = vld [vmem:[%s9044_s23 + $0x298] sm:$0xff]  }
0x2784   : > { %8011 = vmatpush3.bf16.xpose.msra.mxu0 %v5905_v5  ;;  %v6004_v5 = vsel %vm1002_vm1, %v8681_v2, 0  ;;  %v8722_v2 = vld [vmem:[%s9044_s23 + $0x290] sm:$0xff]  }
0x2785   : > { %8536 = vmatprep.subr.msk.bf16.mxu0 %vm1002_vm1, %v8655_v50 }
0x278c   : > { %8013 = vmatpush3.bf16.xpose.msra.mxu0 %v5902_v4  ;;  %v8690_v4 = vld [vmem:[%s9044_s23 + $0x190] sm:$0xff]  }
0x278d   : > { %8537 = vmatprep.subr.msk.bf16.mxu0 %vm1002_vm1, %v8659_v10  ;;  %v6046_v10 = vsel %vm1002_vm1, %v8690_v4, 0 }
0x2794   : > { %8015 = vmatpush3.bf16.xpose.msra.mxu0 %v5899_v26  ;;  %v8694_v26 = vld [vmem:[%s9044_s23 + $0x188] sm:$0xff]  }
0x2795   : > { %8538 = vmatprep.subr.msk.bf16.mxu0 %vm1002_vm1, %v8663_v41  ;;  %v6043_v41 = vsel %vm1002_vm1, %v8694_v26, 0 }
0x279c   : > { %8017 = vmatpush3.bf16.xpose.msra.mxu0 %v5896_v24  ;;  %v8698_v24 = vld [vmem:[%s9044_s23 + $0x180] sm:$0xff]  }
0x279d   : > { %8547 = vmatprep.subr.msk.bf16.mxu0 %vm1002_vm1, %v8667_v25  ;;  %v6040_v25 = vsel %vm1002_vm1, %v8698_v24, 0 }
0x27ef   : > { %v4872_v9 = vpop.xlane.xlu0 %4871 }
0x27f0   : > { %v4874_v11 = vmul.f32 0.03125, %v4872_v9  ;;  %v8683_v9 = vld [vmem:[%s9044_s23 + $0x158] sm:$0xff]  }
0x27f2   : > { %v4876_v12 = vsub.f32 %v4866_v30, %v4874_v11  ;;  %v8684_v11 = vld [vmem:[%s9044_s23 + $0x1d8] sm:$0xff]  }
0x27f3   : > { %v4881_v27 = vpop.xlane.xlu0 %4880 }
0x27f4   : > { %v4878_v40 = vmul.f32 %v4876_v12, %v4876_v12  ;;  %v4885_v51 = vmul.f32 0.03125, %v4881_v27  ;;  %v8700_v27 = vld [vmem:[%s9044_s23 + $0x2f8] sm:$0xff]  }
0x27f6   : > { %v4882_v37 = vsel %vm1002_vm1, %v4878_v40, 0.0  ;;  %v4887_v59 = vadd.f32 1e-05, %v4885_v51  ;;  %v8686_v40 = vld [vmem:[%s9044_s23 + $0x198] sm:$0xff]  }
0x27f7   : > { %4883 = vadd.xlane.f32.xlu1 %v4882_v37  ;;  %v6049_v50 = vsel %vm1002_vm1, %v8686_v40, 0  ;;  %v8701_v51 = vld [vmem:[%s9044_s23 + $0x238] sm:$0xff]  }
0x27f8   : > { %8831 = vrsqrt.f32 %v4887_v59  ;;  %v8702_v59 = vld [vmem:[%s9044_s23 + $0x2b8] sm:$0xff]  }
0x2805   : > { %v8832_v33 = vpop.eup %8831 }
0x2806   : > { %v4891_v34 = vmul.f32 %v8832_v33, %v9804_v61  ;;  %v8704_v33 = vld [vmem:[%s9044_s23 + $0x2f0] sm:$0xff]  }
0x2808   : > { %v4900_v19 = vmul.f32 %v7668_v14, %v4891_v34  ;;  %v8705_v34 = vld [vmem:[%s9044_s23 + $0x230] sm:$0xff]  }
0x280a   : > { %v9893_v61 = vadd.f32 %v7669_v38, %v4900_v19  ;;  %v8707_v19 = vld [vmem:[%s9044_s23 + $0x268] sm:$0xff]  }
0x2880   : > { %v4884_v29 = vpop.xlane.xlu1 %4883 }
0x2881   : > { %v4886_v30 = vmul.f32 0.03125, %v4884_v29  ;;  %v6109_v29 = vsel %vm1002_vm1, %v8701_v51, 0  ;;  %v8742_v51 = vld [vmem:[%s9044_s23 + $0x3a8] sm:$0xff]  }
0x2883   : > { %v4888_v22 = vadd.f32 1e-05, %v4886_v30  ;;  %v6157_v30 = vsel %vm1002_vm1, %v8702_v59, 0 }
0x2885   : > { %8833 = vrsqrt.f32 %v4888_v22  ;;  %v8703_v22 = vld [vmem:[%s9044_s23 + $0x270] sm:$0xff]  }
0x2892   : > { %v8834_v23 = vpop.eup %8833 }
0x2893   : > { %v4892_v36 = vmul.f32 %v8834_v23, %v4876_v12  ;;  %v8685_v12 = vld [vmem:[%s9044_s23 + $0x118] sm:$0xff]   ;;  %v6106_v23 = vsel %vm1002_vm1, %v8705_v34, 0  ;;  %v8746_v34 = vld [vmem:[%s9044_s23 + $0x3a0] sm:$0xff]  }
0x2894   : > { %v6001_v37 = vsel %vm1002_vm1, %v8685_v12, 0  ;;  %v8726_v12 = vld [vmem:[%s9044_s23 + $0x288] sm:$0xff]  }
0x2895   : > { %v4901_v39 = vmul.f32 %v7668_v14, %v4892_v36  ;;  %v8706_v14 = vld [vmem:[%s9044_s23 + $0x2b0] sm:$0xff]  }
0x2896   : > { %v6154_v36 = vsel %vm1002_vm1, %v8706_v14, 0 }
0x2897   : > { %v9895_v43 = vadd.f32 %v7669_v38, %v4901_v39  ;;  %v8708_v38 = vld [vmem:[%s9044_s23 + $0x2e8] sm:$0xff]  }
0x2898   : > { %v8709_v39 = vld [vmem:[%s9044_s23 + $0x228] sm:$0xff]  }
0x2899   : > { %v9899_v31 = vpack.c.bf16 %v9895_v43, %v9893_v61  ;;  %v6103_v42 = vsel %vm1002_vm1, %v8709_v39, 0  ;;  %v8750_v39 = vld [vmem:[%s9044_s23 + $0x398] sm:$0xff]  }
0x289b   : > { %8018 = vmatprep.mubr.msk.bf16.mxu0 %vm1002_vm1, %v9899_v31  ;;  %8036 = vmatprep.mubr.msk.bf16.mxu1 %vm1002_vm1, %v9899_v31 }
0x289c   : > { %8019 = vmatmul.mubr.msk.bf16.vlgmr.msra.gmra.mxu0 %vm1002_vm1, %v9899_v31  ;;  %8037 = vmatmul.mubr.msk.bf16.vlgmr.msra.gmra.mxu1 %vm1002_vm1, %v9899_v31 }
0x289d   : > { %8039 = vmatpush3.bf16.xpose.msra.mxu0 %v6013_v44  ;;  %8057 = vmatpush3.bf16.xpose.msra.mxu1 %v6061_v45  ;;  %v8711_v44 = vld [vmem:[%s9044_s23 + $0x260] sm:$0xff]   ;;  %v6151_v45 = vsel %vm1002_vm1, %v8710_v7, 0 }
0x289e   : > { %8054 = vmatprep.mubr.msk.bf16.mxu0 %vm1002_vm1, %v9899_v31  ;;  %8072 = vmatprep.mubr.msk.bf16.mxu1 %vm1002_vm1, %v9899_v31 }
0x289f   : > { %8548 = vmatprep.subr.msk.bf16.mxu0 %vm1002_vm1, %v8671_v8  ;;  %8556 = vmatprep.subr.msk.bf16.mxu1 %vm1002_vm1, %v8672_v58  ;;  %v8712_v8 = vld [vmem:[%s9044_s23 + $0x2e0] sm:$0xff]  }
0x28a0   : > { %v8713_v58 = vld [vmem:[%s9044_s23 + $0x220] sm:$0xff]  }
0x28a1   : > { %v6100_v46 = vsel %vm1002_vm1, %v8713_v58, 0  ;;  %v8754_v58 = vld [vmem:[%s9044_s23 + $0x390] sm:$0xff]  }
0x28a5   : > { %8041 = vmatpush3.bf16.xpose.msra.mxu0 %v6010_v53  ;;  %8059 = vmatpush3.bf16.xpose.msra.mxu1 %v6058_v54  ;;  %v8715_v53 = vld [vmem:[%s9044_s23 + $0x258] sm:$0xff]   ;;  %v6148_v54 = vsel %vm1002_vm1, %v8714_v57, 0 }
0x28a6   : > { %8549 = vmatprep.subr.msk.bf16.mxu0 %vm1002_vm1, %v8675_v13  ;;  %8557 = vmatprep.subr.msk.bf16.mxu1 %vm1002_vm1, %v8676_v35  ;;  %v8716_v13 = vld [vmem:[%s9044_s23 + $0x2d8] sm:$0xff]  }
0x28a7   : > { %v8717_v35 = vld [vmem:[%s9044_s23 + $0x218] sm:$0xff]  }
0x28a8   : > { %v6097_v60 = vsel %vm1002_vm1, %v8717_v35, 0  ;;  %v8758_v35 = vld [vmem:[%s9044_s23 + $0x388] sm:$0xff]  }
0x28ad   : > { %8043 = vmatpush3.bf16.xpose.msra.mxu0 %v6007_v62  ;;  %8061 = vmatpush3.bf16.xpose.msra.mxu1 %v6055_v63  ;;  %v8719_v62 = vld [vmem:[%s9044_s23 + $0x250] sm:$0xff]   ;;  %v6145_v63 = vsel %vm1002_vm1, %v8718_v56, 0 }
0x28ae   : > { %8550 = vmatprep.subr.msk.bf16.mxu0 %vm1002_vm1, %v8679_v0  ;;  %8558 = vmatprep.subr.msk.bf16.mxu1 %vm1002_vm1, %v8680_v1  ;;  %v8720_v0 = vld [vmem:[%s9044_s23 + $0x2d0] sm:$0xff]  }
0x28af   : > { %v8721_v1 = vld [vmem:[%s9044_s23 + $0x210] sm:$0xff]  }
0x28b0   : > { %v6094_v20 = vsel %vm1002_vm1, %v8721_v1, 0  ;;  %v8762_v1 = vld [vmem:[%s9044_s23 + $0x380] sm:$0xff]  }
0x28b5   : > { %8045 = vmatpush3.bf16.xpose.msra.mxu0 %v6004_v5  ;;  %8063 = vmatpush3.bf16.xpose.msra.mxu1 %v6052_v6  ;;  %v8723_v5 = vld [vmem:[%s9044_s23 + $0x248] sm:$0xff]   ;;  %v6142_v6 = vsel %vm1002_vm1, %v8722_v2, 0  ;;  %v6671_v2 = vld [vmem:[%s9050_s27 + $0x80] sm:$0xff] }
0x28b6   : > { %8551 = vmatprep.subr.msk.bf16.mxu0 %vm1002_vm1, %v8683_v9  ;;  %8559 = vmatprep.subr.msk.bf16.mxu1 %vm1002_vm1, %v8684_v11  ;;  %v8724_v9 = vld [vmem:[%s9044_s23 + $0x2c8] sm:$0xff]  }
0x28b7   : > { %v8725_v11 = vld [vmem:[%s9044_s23 + $0x208] sm:$0xff]  }
0x28b8   : > { %v6091_v40 = vsel %vm1002_vm1, %v8725_v11, 0 }
0x28bd   : > { %8047 = vmatpush3.bf16.xpose.msra.mxu0 %v6001_v37  ;;  %8065 = vmatpush3.bf16.xpose.msra.mxu1 %v6049_v50  ;;  %v8727_v37 = vld [vmem:[%s9044_s23 + $0x240] sm:$0xff]   ;;  %v6139_v50 = vsel %vm1002_vm1, %v8726_v12, 0  ;;  %v6232_v12 = vsel %vm1002_vm1, %v8762_v1, 0 }
0x28be   : > { %8552 = vmatprep.subr.msk.bf16.mxu0 %vm1002_vm1, %v8687_v28  ;;  %8560 = vmatprep.subr.msk.bf16.mxu1 %vm1002_vm1, %v8688_v15  ;;  %v8728_v28 = vld [vmem:[%s9044_s23 + $0x2c0] sm:$0xff]  }
0x28bf   : > { %v8729_v15 = vld [vmem:[%s9044_s23 + $0x200] sm:$0xff]  }
0x28c0   : > { %v6088_v4 = vsel %vm1002_vm1, %v8729_v15, 0  ;;  %v6663_v15 = vld [vmem:[%s9050_s27 + $0x40] sm:$0xff] }
0x28c5   : > { %8049 = vmatpush3.bf16.xpose.msra.mxu0 %v5998_v52  ;;  %8067 = vmatpush3.bf16.xpose.msra.mxu1 %v6046_v10  ;;  %v8731_v52 = vld [vmem:[%s9044_s23 + $0x378] sm:$0xff]   ;;  %v6136_v10 = vsel %vm1002_vm1, %v8730_v16, 0  ;;  %v6656_v16 = vld [vmem:[%s9050_s27 + $0x8] sm:$0xff] }
0x28c6   : > { %8553 = vmatprep.subr.msk.bf16.mxu0 %vm1002_vm1, %v8691_v55  ;;  %8561 = vmatprep.subr.msk.bf16.mxu1 %vm1002_vm1, %v8692_v32  ;;  %v8732_v55 = vld [vmem:[%s9044_s23 + $0x3f8] sm:$0xff]  }
0x28c7   : > { %v8733_v32 = vld [vmem:[%s9044_s23 + $0x338] sm:$0xff]  }
0x28c8   : > { %v6205_v26 = vsel %vm1002_vm1, %v8733_v32, 0 }
0x28cd   : > { %8051 = vmatpush3.bf16.xpose.msra.mxu0 %v5995_v49  ;;  %8069 = vmatpush3.bf16.xpose.msra.mxu1 %v6043_v41  ;;  %v6253_v49 = vsel %vm1002_vm1, %v8734_v47, 0  ;;  %v8735_v41 = vld [vmem:[%s9044_s23 + $0x370] sm:$0xff]  }
0x28ce   : > { %8554 = vmatprep.subr.msk.bf16.mxu0 %vm1002_vm1, %v8695_v17  ;;  %8562 = vmatprep.subr.msk.bf16.mxu1 %vm1002_vm1, %v8696_v18  ;;  %v8736_v17 = vld [vmem:[%s9044_s23 + $0x3f0] sm:$0xff]  }
0x28cf   : > { %v8737_v18 = vld [vmem:[%s9044_s23 + $0x330] sm:$0xff]  }
0x28d0   : > { %v6202_v24 = vsel %vm1002_vm1, %v8737_v18, 0 }
0x28d5   : > { %8053 = vmatpush3.bf16.xpose.msra.mxu0 %v5992_v48  ;;  %8071 = vmatpush3.bf16.xpose.msra.mxu1 %v6040_v25  ;;  %v8739_v48 = vld [vmem:[%s9044_s23 + $0x368] sm:$0xff]   ;;  %v6250_v25 = vsel %vm1002_vm1, %v8738_v21, 0 }
0x28d6   : > { %8563 = vmatprep.subr.msk.bf16.mxu0 %vm1002_vm1, %v8699_v3  ;;  %8571 = vmatprep.subr.msk.bf16.mxu1 %vm1002_vm1, %v8700_v27  ;;  %v8740_v3 = vld [vmem:[%s9044_s23 + $0x3e8] sm:$0xff]  }
0x28d7   : > { %v8741_v27 = vld [vmem:[%s9044_s23 + $0x328] sm:$0xff]  }
0x28d8   : > { %v6199_v59 = vsel %vm1002_vm1, %v8741_v27, 0  ;;  %v6673_v27 = vld [vmem:[%s9050_s27 + $0x90] sm:$0xff] }
0x28dc   : > { %8055 = vmatmul.mubr.msk.bf16.vlgmr.msra.gmra.mxu0 %vm1002_vm1, %v9899_v31  ;;  %8073 = vmatmul.mubr.msk.bf16.vlgmr.msra.gmra.mxu1 %vm1002_vm1, %v9899_v31 }
0x28dd   : > { %8075 = vmatpush3.bf16.xpose.msra.mxu0 %v6109_v29  ;;  %8090 = vmatprep.mubr.msk.bf16.mxu0 %vm1002_vm1, %v9899_v31  ;;  %v8743_v29 = vld [vmem:[%s9044_s23 + $0x360] sm:$0xff]  }
0x28de   : > { %8093 = vmatpush3.bf16.xpose.msra.mxu1 %v6157_v30  ;;  %8108 = vmatprep.mubr.msk.bf16.mxu1 %vm1002_vm1, %v9899_v31  ;;  %v6247_v30 = vsel %vm1002_vm1, %v8742_v51, 0  ;;  %v6681_v51 = vld [vmem:[%s9050_s27 + $0xd0] sm:$0xff] }
0x28df   : > { %8564 = vmatprep.subr.msk.bf16.mxu0 %vm1002_vm1, %v8703_v22  ;;  %8572 = vmatprep.subr.msk.bf16.mxu1 %vm1002_vm1, %v8704_v33  ;;  %v8744_v22 = vld [vmem:[%s9044_s23 + $0x3e0] sm:$0xff]  }
0x28e0   : > { %v8745_v33 = vld [vmem:[%s9044_s23 + $0x320] sm:$0xff]  }
0x28e1   : > { %v6196_v14 = vsel %vm1002_vm1, %v8745_v33, 0  ;;  %v6682_v33 = vld [vmem:[%s9050_s27 + $0xd8] sm:$0xff] }
0x28e5   : > { %8077 = vmatpush3.bf16.xpose.msra.mxu0 %v6106_v23  ;;  %v8747_v23 = vld [vmem:[%s9044_s23 + $0x358] sm:$0xff]  }
0x28e6   : > { %8095 = vmatpush3.bf16.xpose.msra.mxu1 %v6154_v36  ;;  %8565 = vmatprep.subr.msk.bf16.mxu0 %vm1002_vm1, %v8707_v19  ;;  %v6244_v19 = vsel %vm1002_vm1, %v8746_v34, 0  ;;  %v8748_v36 = vld [vmem:[%s9044_s23 + $0x3d8] sm:$0xff]  }
0x28e7   : > { %8573 = vmatprep.subr.msk.bf16.mxu1 %vm1002_vm1, %v8708_v38  ;;  %v8749_v38 = vld [vmem:[%s9044_s23 + $0x318] sm:$0xff]  }
0x28e8   : > { %v6193_v7 = vsel %vm1002_vm1, %v8749_v38, 0 }
0x28ed   : > { %8079 = vmatpush3.bf16.xpose.msra.mxu0 %v6103_v42  ;;  %v8751_v42 = vld [vmem:[%s9044_s23 + $0x350] sm:$0xff]  }
0x28ee   : > { %8097 = vmatpush3.bf16.xpose.msra.mxu1 %v6151_v45  ;;  %8566 = vmatprep.subr.msk.bf16.mxu0 %vm1002_vm1, %v8711_v44  ;;  %v6241_v44 = vsel %vm1002_vm1, %v8750_v39, 0  ;;  %v8752_v45 = vld [vmem:[%s9044_s23 + $0x3d0] sm:$0xff]  }
0x28ef   : > { %8574 = vmatprep.subr.msk.bf16.mxu1 %vm1002_vm1, %v8712_v8  ;;  %v8753_v8 = vld [vmem:[%s9044_s23 + $0x310] sm:$0xff]  }
0x28f0   : > { %v6190_v57 = vsel %vm1002_vm1, %v8753_v8, 0 }
0x28f5   : > { %8081 = vmatpush3.bf16.xpose.msra.mxu0 %v6100_v46  ;;  %v8755_v46 = vld [vmem:[%s9044_s23 + $0x348] sm:$0xff]  }
0x28f6   : > { %8099 = vmatpush3.bf16.xpose.msra.mxu1 %v6148_v54  ;;  %8567 = vmatprep.subr.msk.bf16.mxu0 %vm1002_vm1, %v8715_v53  ;;  %v6238_v53 = vsel %vm1002_vm1, %v8754_v58, 0  ;;  %v8756_v54 = vld [vmem:[%s9044_s23 + $0x3c8] sm:$0xff]  }
0x28f7   : > { %8575 = vmatprep.subr.msk.bf16.mxu1 %vm1002_vm1, %v8716_v13  ;;  %v8757_v13 = vld [vmem:[%s9044_s23 + $0x308] sm:$0xff]  }
0x28f8   : > { %v6187_v56 = vsel %vm1002_vm1, %v8757_v13, 0 }
0x28fd   : > { %8083 = vmatpush3.bf16.xpose.msra.mxu0 %v6097_v60  ;;  %v8759_v60 = vld [vmem:[%s9044_s23 + $0x340] sm:$0xff]  }
0x28fe   : > { %8101 = vmatpush3.bf16.xpose.msra.mxu1 %v6145_v63  ;;  %8568 = vmatprep.subr.msk.bf16.mxu0 %vm1002_vm1, %v8719_v62  ;;  %v6235_v62 = vsel %vm1002_vm1, %v8758_v35, 0  ;;  %v8760_v63 = vld [vmem:[%s9044_s23 + $0x3c0] sm:$0xff]  }
0x28ff   : > { %8576 = vmatprep.subr.msk.bf16.mxu1 %vm1002_vm1, %v8720_v0  ;;  %v8761_v0 = vld [vmem:[%s9044_s23 + $0x300] sm:$0xff]   ;;  %s10331_s23 = scalar_lea.vmem %s10271_s13, %s8995_s29 }
0x2905   : > { %8085 = vmatpush3.bf16.xpose.msra.mxu0 %v6094_v20  ;;  %v6679_v20 = vld [vmem:[%s9050_s27 + $0xc0] sm:$0xff] }
0x2906   : > { %8103 = vmatpush3.bf16.xpose.msra.mxu1 %v6142_v6  ;;  %8569 = vmatprep.subr.msk.bf16.mxu0 %vm1002_vm1, %v8723_v5  ;;  %v6672_v5 = vld [vmem:[%s9050_s27 + $0x88] sm:$0xff]  ;;  %v7824_v11 = vcombine.high %v6671_v2, %v6679_v20 }
0x2907   : > { %8577 = vmatprep.subr.msk.bf16.mxu1 %vm1002_vm1, %v8724_v9  ;;  %v6680_v6 = vld [vmem:[%s9050_s27 + $0xc8] sm:$0xff]  ;;  %v6184_v9 = vsel %vm1002_vm1, %v8761_v0, 0  ;;  %v6665_v0 = vld [vmem:[%s9050_s27 + $0x50] sm:$0xff] }
0x2908   : > { %v7825_v32 = vcombine.low %v6672_v5, %v6680_v6 }
0x290d   : > { %8087 = vmatpush3.bf16.xpose.msra.mxu0 %v6091_v40  ;;  %v7826_v40 = vcombine.high %v6672_v5, %v6680_v6  ;;  %v7827_v6 = vcombine.low %v6673_v27, %v6681_v51 }
0x290e   : > { %8105 = vmatpush3.bf16.xpose.msra.mxu1 %v6139_v50  ;;  %8570 = vmatprep.subr.msk.bf16.mxu0 %vm1002_vm1, %v8727_v37  ;;  %v5172_v37 = vlaneseq }
0x290f   : > { %8578 = vmatprep.subr.msk.bf16.mxu1 %vm1002_vm1, %v8728_v28  ;;  %v6655_v28 = vld [vmem:[%s9050_s27] sm:$0xff] }
0x2910   : > { %v10119_v50 = vshrl.u32 %v5172_v37, 7  ;;  %v7808_v47 = vcombine.high %v6655_v28, %v6663_v15 }
0x2912   : > { %v5182_v18 = vsub.s32 2, %v10119_v50 }
0x2915   : > { %8089 = vmatpush3.bf16.xpose.msra.mxu0 %v6088_v4  ;;  %v6664_v4 = vld [vmem:[%s9050_s27 + $0x48] sm:$0xff] }
0x2916   : > { %8107 = vmatpush3.bf16.xpose.msra.mxu1 %v6136_v10  ;;  %8579 = vmatprep.subr.msk.bf16.mxu0 %vm1002_vm1, %v8731_v52  ;;  %v7823_v52 = vcombine.low %v6671_v2, %v6679_v20  ;;  %v5178_v10 = vsub.s32 1, %v10119_v50  ;;  %v7809_v39 = vcombine.low %v6656_v16, %v6664_v4  ;;  %v6658_v2 = vld [vmem:[%s9050_s27 + $0x18] sm:$0xff] }
0x2917   : > { %8587 = vmatprep.subr.msk.bf16.mxu1 %vm1002_vm1, %v8732_v55  ;;  %v5186_v55 = vsub.s32 3, %v10119_v50  ;;  %v6666_v20 = vld [vmem:[%s9050_s27 + $0x58] sm:$0xff] }
0x2918   : > { %v7814_v37 = vcombine.high %v6658_v2, %v6666_v20 }
0x291c   : > { %8091 = vmatmul.mubr.msk.bf16.vlgmr.msra.gmra.mxu0 %vm1002_vm1, %v9899_v31 }
0x291d   : > { %8109 = vmatmul.mubr.msk.bf16.vlgmr.msra.gmra.mxu1 %vm1002_vm1, %v9899_v31  ;;  %8111 = vmatpush3.bf16.xpose.msra.mxu0 %v6205_v26  ;;  %v7810_v26 = vcombine.high %v6656_v16, %v6664_v4  ;;  %v6676_v16 = vld [vmem:[%s9050_s27 + $0xa8] sm:$0xff] }
0x291e   : > { %8126 = vmatprep.mubr.msk.bf16.mxu0 %vm1002_vm1, %v9899_v31  ;;  %8129 = vmatpush3.bf16.xpose.msra.mxu1 %v6253_v49  ;;  %v10130_v49 = vld [vmem:[%s9039_s0] sm:$0xff]  ;;  %v6684_v4 = vld [vmem:[%s9050_s27 + $0xe8] sm:$0xff] }
0x291f   : > { %8144 = vmatprep.mubr.msk.bf16.mxu1 %vm1002_vm1, %v9899_v31  ;;  %8580 = vmatprep.subr.msk.bf16.mxu0 %vm1002_vm1, %v8735_v41  ;;  %v5174_v41 = vsub.s32 0, %v10119_v50 }
0x2920   : > { %8588 = vmatprep.subr.msk.bf16.mxu1 %vm1002_vm1, %v8736_v17 }
0x2925   : > { %8113 = vmatpush3.bf16.xpose.msra.mxu0 %v6202_v24  ;;  %v5179_v24 = vrot.slane %v10130_v49, %v5178_v10 }
0x2926   : > { %8131 = vmatpush3.bf16.xpose.msra.mxu1 %v6250_v25  ;;  %8581 = vmatprep.subr.msk.bf16.mxu0 %vm1002_vm1, %v8739_v48  ;;  %v5187_v48 = vrot.slane %v10130_v49, %v5186_v55 }
0x2927   : > { %8589 = vmatprep.subr.msk.bf16.mxu1 %vm1002_vm1, %v8740_v3 }
0x292d   : > { %8115 = vmatpush3.bf16.xpose.msra.mxu0 %v6199_v59  ;;  %v5183_v59 = vrot.slane %v10130_v49, %v5182_v18 }
0x292e   : > { %8133 = vmatpush3.bf16.xpose.msra.mxu1 %v6247_v30  ;;  %8582 = vmatprep.subr.msk.bf16.mxu0 %vm1002_vm1, %v8743_v29 }
0x292f   : > { %8590 = vmatprep.subr.msk.bf16.mxu1 %vm1002_vm1, %v8744_v22  ;;  %v6674_v22 = vld [vmem:[%s9050_s27 + $0x98] sm:$0xff] }
0x2930   : > { %v7830_v8 = vcombine.high %v6674_v22, %v6682_v33 }
0x2935   : > { %8117 = vmatpush3.bf16.xpose.msra.mxu0 %v6196_v14 }
0x2936   : > { %8135 = vmatpush3.bf16.xpose.msra.mxu1 %v6244_v19  ;;  %8583 = vmatprep.subr.msk.bf16.mxu0 %vm1002_vm1, %v8747_v23  ;;  %v7807_v23 = vcombine.low %v6655_v28, %v6663_v15  ;;  %v6675_v28 = vld [vmem:[%s9050_s27 + $0xa0] sm:$0xff] }
0x2937   : > { %8591 = vmatprep.subr.msk.bf16.mxu1 %vm1002_vm1, %v8748_v36  ;;  %v6683_v15 = vld [vmem:[%s9050_s27 + $0xe0] sm:$0xff] }
0x293d   : > { %8119 = vmatpush3.bf16.xpose.msra.mxu0 %v6193_v7  ;;  %v7828_v7 = vcombine.high %v6673_v27, %v6681_v51 }
0x293e   : > { %8137 = vmatpush3.bf16.xpose.msra.mxu1 %v6241_v44  ;;  %8584 = vmatprep.subr.msk.bf16.mxu0 %vm1002_vm1, %v8751_v42 }
0x293f   : > { %8592 = vmatprep.subr.msk.bf16.mxu1 %vm1002_vm1, %v8752_v45 }
0x2945   : > { %8121 = vmatpush3.bf16.xpose.msra.mxu0 %v6190_v57 }
0x2946   : > { %8139 = vmatpush3.bf16.xpose.msra.mxu1 %v6238_v53  ;;  %8585 = vmatprep.subr.msk.bf16.mxu0 %vm1002_vm1, %v8755_v46 }
0x2947   : > { %8593 = vmatprep.subr.msk.bf16.mxu1 %vm1002_vm1, %v8756_v54 }
0x294d   : > { %8123 = vmatpush3.bf16.xpose.msra.mxu0 %v6187_v56 }
0x294e   : > { %8141 = vmatpush3.bf16.xpose.msra.mxu1 %v6235_v62  ;;  %8586 = vmatprep.subr.msk.bf16.mxu0 %vm1002_vm1, %v8759_v60 }
0x294f   : > { %8594 = vmatprep.subr.msk.bf16.mxu1 %vm1002_vm1, %v8760_v63  ;;  %v6657_v63 = vld [vmem:[%s9050_s27 + $0x10] sm:$0xff] }
0x2955   : > { %8125 = vmatpush3.bf16.xpose.msra.mxu0 %v6184_v9 }
0x2956   : > { %8143 = vmatpush3.bf16.xpose.msra.mxu1 %v6232_v12  ;;  %6882 = vmatprep.subr.bf16.mxu0 %v7824_v11  ;;  %v7829_v11 = vcombine.low %v6674_v22, %v6682_v33  ;;  %v7812_v12 = vcombine.high %v6657_v63, %v6665_v0 }
0x2957   : > { %6923 = vmatprep.subr.bf16.mxu1 %v7826_v40 }
0x295c   : > { %8127 = vmatmul.mubr.msk.bf16.vlgmr.msra.gmra.mxu0 %vm1002_vm1, %v9899_v31  ;;  %v6313_v17 = vpop.f32.mrf.mxu0  ;;  %v6356_v21 = vpop.f32.mrf.mxu1 }
0x295d   : > { %8145 = vmatmul.mubr.msk.bf16.vlgmr.msra.gmra.mxu1 %vm1002_vm1, %v9899_v31  ;;  %6883 = vmatpush1.bf16.xpose.msra.mxu0 %v7823_v52  ;;  %v5175_v31 = vrot.slane %v10130_v49, %v5174_v41  ;;  %v6357_v57 = vadd.f32 %v6356_v21, %v5183_v59  ;;  %v7811_v52 = vcombine.low %v6657_v63, %v6665_v0  ;;  %v5202_v21 = vsub.s32 7, %v10119_v50 }
0x295e   : > { %6924 = vmatpush1.bf16.xpose.msra.mxu1 %v7825_v32  ;;  %v6315_v25 = vpop.f32.mrf.mxu0  ;;  %v6358_v3 = vpop.f32.mrf.mxu1  ;;  %6884 = vmatprep.subr.bf16.mxu0 %v7808_v47  ;;  %v7813_v32 = vcombine.low %v6658_v2, %v6666_v20  ;;  %v7832_v47 = vcombine.high %v6675_v28, %v6683_v15  ;;  %v7831_v0 = vcombine.low %v6675_v28, %v6683_v15 }
0x295f   : > { %6925 = vmatprep.subr.bf16.mxu1 %v7810_v26  ;;  %v6316_v34 = vadd.f32 %v6315_v25, %v5179_v24  ;;  %v6359_v14 = vadd.f32 %v6358_v3, %v5187_v48  ;;  %v6314_v58 = vadd.f32 %v6313_v17, %v5175_v31  ;;  %v6625_v5 = vmax.f32 %v6357_v57, 0.0 }
0x2960   : > { %v6317_v29 = vpop.f32.mrf.mxu0  ;;  %v6360_v30 = vpop.f32.mrf.mxu1  ;;  %v7834_v26 = vcombine.high %v6676_v16, %v6684_v4  ;;  %v5194_v17 = vsub.s32 5, %v10119_v50  ;;  %v5203_v51 = vrot.slane %v10130_v49, %v5202_v21 }
0x2961   : > { %v6318_v19 = vadd.f32 %v6317_v29, %v5175_v31  ;;  %v6361_v42 = vadd.f32 %v6360_v30, %v5183_v59  ;;  %v6624_v46 = vmax.f32 %v6316_v34, 0.0  ;;  %v6626_v53 = vmax.f32 %v6359_v14, 0.0 }
0x2962   : > { %v6319_v36 = vpop.f32.mrf.mxu0  ;;  %v6362_v38 = vpop.f32.mrf.mxu1  ;;  %v6623_v1 = vmax.f32 %v6314_v58, 0.0  ;;  %v5195_v27 = vrot.slane %v10130_v49, %v5194_v17  ;;  %v6667_v58 = vld [vmem:[%s9050_s27 + $0x60] sm:$0xff] }
0x2963   : > { %v6320_v44 = vadd.f32 %v6319_v36, %v5179_v24  ;;  %v6363_v45 = vadd.f32 %v6362_v38, %v5187_v48  ;;  %v6639_v35 = vmax.f32 %v6318_v19, 0.0  ;;  %v6641_v56 = vmax.f32 %v6361_v42, 0.0 }
0x2964   : > { %v5190_v24 = vsub.s32 4, %v10119_v50  ;;  %v5198_v48 = vsub.s32 6, %v10119_v50 }
0x2965   : > { %v6640_v54 = vmax.f32 %v6320_v44, 0.0  ;;  %v6642_v13 = vmax.f32 %v6363_v45, 0.0  ;;  %6885 = vmatpush1.bf16.xpose.msra.mxu0 %v7807_v23  ;;  %v6687_v9 = vpack.c.bf16 %v6639_v35, %v6623_v1  ;;  %v6689_v40 = vpack.c.bf16 %v6641_v56, %v6625_v5  ;;  %v6668_v35 = vld [vmem:[%s9050_s27 + $0x68] sm:$0xff] }
0x2966   : > { %6926 = vmatpush1.bf16.xpose.msra.mxu1 %v7809_v39  ;;  %6964 = vmatprep.subr.bf16.mxu0 %v7828_v7  ;;  %v5191_v31 = vrot.slane %v10130_v49, %v5190_v24  ;;  %v5199_v59 = vrot.slane %v10130_v49, %v5198_v48  ;;  %v7833_v1 = vcombine.low %v6676_v16, %v6684_v4  ;;  %v5169_v4 = vld [vmem:[%s9039_s0 + $0x8] sm:$0xff] }
0x2967   : > { %v6688_v60 = vpack.c.bf16 %v6640_v54, %v6624_v46  ;;  %v6690_v62 = vpack.c.bf16 %v6642_v13, %v6626_v53  ;;  %7005 = vmatprep.subr.bf16.mxu1 %v7830_v8  ;;  %v6659_v8 = vld [vmem:[%s9050_s27 + $0x20] sm:$0xff]  ;;  %v6660_v13 = vld [vmem:[%s9050_s27 + $0x28] sm:$0xff] }
0x2968   : > { %v7816_v5 = vcombine.high %v6659_v8, %v6667_v58  ;;  %v7817_v28 = vcombine.low %v6660_v13, %v6668_v35 }
0x2969   : > { %6902 = vmatprep.mubr.bf16.mxu0 %v6688_v60  ;;  %6943 = vmatprep.mubr.bf16.mxu1 %v6690_v62 }
0x296c   : > { %6903 = vmatmul.mubr.bf16.vlgmr.msra.gmra.mxu0 %v6687_v9  ;;  %v6677_v9 = vld [vmem:[%s9050_s27 + $0xb0] sm:$0xff] }
0x296d   : > { %6944 = vmatmul.mubr.bf16.vlgmr.msra.gmra.mxu1 %v6689_v40  ;;  %6965 = vmatpush1.bf16.xpose.msra.mxu0 %v7827_v6  ;;  %v7818_v6 = vcombine.high %v6660_v13, %v6668_v35  ;;  %v6686_v40 = vld [vmem:[%s9050_s27 + $0xf8] sm:$0xff] }
0x296e   : > { %7006 = vmatpush1.bf16.xpose.msra.mxu1 %v7829_v11  ;;  %6966 = vmatprep.subr.bf16.mxu0 %v7812_v12  ;;  %v6685_v11 = vld [vmem:[%s9050_s27 + $0xf0] sm:$0xff]  ;;  %v6678_v12 = vld [vmem:[%s9050_s27 + $0xb8] sm:$0xff] }
0x296f   : > { %7007 = vmatprep.subr.bf16.mxu1 %v7814_v37  ;;  %v7815_v37 = vcombine.low %v6659_v8, %v6667_v58  ;;  %v7836_v15 = vcombine.high %v6677_v9, %v6685_v11  ;;  %v7838_v16 = vcombine.high %v6678_v12, %v6686_v40  ;;  %v6670_v8 = vld [vmem:[%s9050_s27 + $0x78] sm:$0xff]  ;;  %v7837_v13 = vcombine.low %v6678_v12, %v6686_v40 }
0x2975   : > { %6967 = vmatpush1.bf16.xpose.msra.mxu0 %v7811_v52 }
0x2976   : > { %7008 = vmatpush1.bf16.xpose.msra.mxu1 %v7813_v32  ;;  %7046 = vmatprep.subr.bf16.mxu0 %v7832_v47  ;;  %v5211_v47 = vrot.slane %v5169_v4, %v5178_v10 }
0x2977   : > { %7087 = vmatprep.subr.bf16.mxu1 %v7834_v26  ;;  %v5207_v26 = vrot.slane %v5169_v4, %v5174_v41 }
0x299c   : > { %v6399_v25 = vpop.f32.mrf.mxu0  ;;  %v6442_v3 = vpop.f32.mrf.mxu1 }
0x299d   : > { %v6400_v36 = vadd.f32 %v6399_v25, %v5191_v31  ;;  %v6443_v38 = vadd.f32 %v6442_v3, %v5199_v59  ;;  %v5219_v3 = vrot.slane %v5169_v4, %v5186_v55 }
0x299e   : > { %v6401_v29 = vpop.f32.mrf.mxu0  ;;  %v6444_v30 = vpop.f32.mrf.mxu1 }
0x299f   : > { %v6402_v34 = vadd.f32 %v6401_v29, %v5195_v27  ;;  %v6445_v14 = vadd.f32 %v6444_v30, %v5203_v51  ;;  %v6627_v56 = vmax.f32 %v6400_v36, 0.0  ;;  %v6629_v60 = vmax.f32 %v6443_v38, 0.0 }
0x29a0   : > { %v6403_v22 = vpop.f32.mrf.mxu0  ;;  %v6446_v33 = vpop.f32.mrf.mxu1 }
0x29a1   : > { %v6404_v23 = vadd.f32 %v6403_v22, %v5191_v31  ;;  %v6447_v19 = vadd.f32 %v6446_v33, %v5199_v59  ;;  %v6628_v57 = vmax.f32 %v6402_v34, 0.0  ;;  %v6630_v46 = vmax.f32 %v6445_v14, 0.0 }
0x29a2   : > { %v6405_v39 = vpop.f32.mrf.mxu0  ;;  %v6448_v7 = vpop.f32.mrf.mxu1 }
0x29a3   : > { %v6406_v42 = vadd.f32 %v6405_v39, %v5195_v27  ;;  %v6449_v44 = vadd.f32 %v6448_v7, %v5203_v51  ;;  %v6643_v45 = vmax.f32 %v6404_v23, 0.0  ;;  %v6645_v49 = vmax.f32 %v6447_v19, 0.0  ;;  %v6661_v39 = vld [vmem:[%s9050_s27 + $0x30] sm:$0xff] }
0x29a4   : > { %v5215_v27 = vrot.slane %v5169_v4, %v5182_v18  ;;  %v6669_v7 = vld [vmem:[%s9050_s27 + $0x70] sm:$0xff] }
0x29a5   : > { %v6644_v53 = vmax.f32 %v6406_v42, 0.0  ;;  %v6646_v54 = vmax.f32 %v6449_v44, 0.0  ;;  %v6691_v2 = vpack.c.bf16 %v6643_v45, %v6627_v56  ;;  %v6693_v20 = vpack.c.bf16 %v6645_v49, %v6629_v60  ;;  %v6662_v49 = vld [vmem:[%s9050_s27 + $0x38] sm:$0xff]  ;;  %s10337_s27 = sld [smem:[#allocation22_spill]] (!%p7841_p5) }
0x29a6   : > { %v7820_v35 = vcombine.high %v6661_v39, %v6669_v7  ;;  %v7822_v60 = vcombine.high %v6662_v49, %v6670_v8 }
0x29a7   : > { %v6692_v62 = vpack.c.bf16 %v6644_v53, %v6628_v57  ;;  %v6694_v63 = vpack.c.bf16 %v6646_v54, %v6630_v46  ;;  %v7835_v46 = vcombine.low %v6677_v9, %v6685_v11  ;;  %v5231_v9 = vrot.slane %v5169_v4, %v5198_v48 }
0x29a9   : > { %6984 = vmatprep.mubr.bf16.mxu0 %v6692_v62  ;;  %7025 = vmatprep.mubr.bf16.mxu1 %v6694_v63  ;;  %v7819_v62 = vcombine.low %v6661_v39, %v6669_v7  ;;  %v7821_v63 = vcombine.low %v6662_v49, %v6670_v8 }
0x29aa   : > { %6985 = vmatmul.mubr.bf16.vlgmr.msra.gmra.mxu0 %v6691_v2  ;;  %7026 = vmatmul.mubr.bf16.vlgmr.msra.gmra.mxu1 %v6693_v20  ;;  %v5227_v2 = vrot.slane %v5169_v4, %v5194_v17  ;;  %v5223_v20 = vrot.slane %v5169_v4, %v5190_v24 }
0x29ab   : > { %7047 = vmatpush1.bf16.xpose.msra.mxu0 %v7831_v0  ;;  %7088 = vmatpush1.bf16.xpose.msra.mxu1 %v7833_v1 }
0x29ac   : > { %7048 = vmatprep.subr.bf16.mxu0 %v7816_v5  ;;  %7089 = vmatprep.subr.bf16.mxu1 %v7818_v6  ;;  %v5235_v6 = vrot.slane %v5169_v4, %v5202_v21 }
0x29b3   : > { %7049 = vmatpush1.bf16.xpose.msra.mxu0 %v7815_v37  ;;  %7090 = vmatpush1.bf16.xpose.msra.mxu1 %v7817_v28 }
0x29b4   : > { %7128 = vmatprep.subr.bf16.mxu0 %v7836_v15  ;;  %7169 = vmatprep.subr.bf16.mxu1 %v7838_v16 }
0x29dc   : > { %v6485_v52 = vpop.f32.mrf.mxu0 }
0x29dd   : > { %v6528_v32 = vpop.f32.mrf.mxu1  ;;  %v6486_v22 = vadd.f32 %v6485_v52, %v5207_v26 }
0x29de   : > { %v6487_v25 = vpop.f32.mrf.mxu0  ;;  %v6529_v34 = vadd.f32 %v6528_v32, %v5215_v27 }
0x29df   : > { %v6530_v51 = vpop.f32.mrf.mxu1  ;;  %v6488_v59 = vadd.f32 %v6487_v25, %v5211_v47  ;;  %v6631_v42 = vmax.f32 %v6486_v22, 0.0  ;;  %v7806_v22 = vld [vmem:[%s10331_s23] ss:$0 sm:$0xff] }
0x29e0   : > { %v6489_v31 = vpop.f32.mrf.mxu0  ;;  %v6531_v33 = vadd.f32 %v6530_v51, %v5219_v3  ;;  %v6633_v58 = vmax.f32 %v6529_v34, 0.0 }
0x29e1   : > { %v6490_v29 = vadd.f32 %v6489_v31, %v5207_v26  ;;  %v6532_v30 = vpop.f32.mrf.mxu1  ;;  %v6632_v36 = vmax.f32 %v6488_v59, 0.0 }
0x29e2   : > { %v6533_v10 = vadd.f32 %v6532_v30, %v5215_v27  ;;  %v6491_v41 = vpop.f32.mrf.mxu0  ;;  %v6634_v44 = vmax.f32 %v6531_v33, 0.0 }
0x29e3   : > { %v6492_v14 = vadd.f32 %v6491_v41, %v5211_v47  ;;  %v6534_v23 = vpop.f32.mrf.mxu1  ;;  %v6647_v55 = vmax.f32 %v6490_v29, 0.0 }
0x29e4   : > { %v6535_v19 = vadd.f32 %v6534_v23, %v5219_v3  ;;  %v6649_v18 = vmax.f32 %v6533_v10, 0.0 }
0x29e5   : > { %v6648_v38 = vmax.f32 %v6492_v14, 0.0  ;;  %v6695_v53 = vpack.c.bf16 %v6647_v55, %v6631_v42 }
0x29e6   : > { %v6650_v45 = vmax.f32 %v6535_v19, 0.0  ;;  %v6697_v56 = vpack.c.bf16 %v6649_v18, %v6633_v58 }
0x29e7   : > { %v6696_v57 = vpack.c.bf16 %v6648_v38, %v6632_v36 }
0x29e8   : > { %v6698_v54 = vpack.c.bf16 %v6650_v45, %v6634_v44 }
0x29e9   : > { %7066 = vmatprep.mubr.bf16.mxu0 %v6696_v57 }
0x29ea   : > { %7107 = vmatprep.mubr.bf16.mxu1 %v6698_v54  ;;  %7067 = vmatmul.mubr.bf16.vlgmr.msra.gmra.mxu0 %v6695_v53 }
0x29eb   : > { %7108 = vmatmul.mubr.bf16.vlgmr.msra.gmra.mxu1 %v6697_v56  ;;  %7129 = vmatpush1.bf16.xpose.msra.mxu0 %v7835_v46 }
0x29ec   : > { %7170 = vmatpush1.bf16.xpose.msra.mxu1 %v7837_v13  ;;  %7130 = vmatprep.subr.bf16.mxu0 %v7820_v35 }
0x29ed   : > { %7171 = vmatprep.subr.bf16.mxu1 %v7822_v60 }
0x29f3   : > { %7131 = vmatpush1.bf16.xpose.msra.mxu0 %v7819_v62 }
0x29f4   : > { %7172 = vmatpush1.bf16.xpose.msra.mxu1 %v7821_v63 }
0x2a1c   : > { %v6571_v0 = vpop.f32.mrf.mxu0 }
0x2a1d   : > { %v6614_v1 = vpop.f32.mrf.mxu1  ;;  %v6572_v15 = vadd.f32 %v6571_v0, %v5223_v20 }
0x2a1e   : > { %v6573_v5 = vpop.f32.mrf.mxu0  ;;  %v6615_v17 = vadd.f32 %v6614_v1, %v5231_v9 }
0x2a1f   : > { %v6616_v11 = vpop.f32.mrf.mxu1  ;;  %v6574_v40 = vadd.f32 %v6573_v5, %v5227_v2  ;;  %v6635_v50 = vmax.f32 %v6572_v15, 0.0 }
0x2a20   : > { %v6575_v12 = vpop.f32.mrf.mxu0  ;;  %v6617_v16 = vadd.f32 %v6616_v11, %v5235_v6  ;;  %v6637_v51 = vmax.f32 %v6615_v17, 0.0 }
0x2a21   : > { %v6576_v37 = vadd.f32 %v6575_v12, %v5223_v20  ;;  %v6618_v28 = vpop.f32.mrf.mxu1  ;;  %v6636_v3 = vmax.f32 %v6574_v40, 0.0 }
0x2a22   : > { %v6619_v52 = vadd.f32 %v6618_v28, %v5231_v9  ;;  %v6577_v32 = vpop.f32.mrf.mxu0  ;;  %v6638_v48 = vmax.f32 %v6617_v16, 0.0 }
0x2a23   : > { %v6578_v47 = vadd.f32 %v6577_v32, %v5227_v2  ;;  %v6620_v26 = vpop.f32.mrf.mxu1  ;;  %v6651_v24 = vmax.f32 %v6576_v37, 0.0 }
0x2a24   : > { %v6621_v25 = vadd.f32 %v6620_v26, %v5235_v6  ;;  %v6653_v21 = vmax.f32 %v6619_v52, 0.0 }
0x2a25   : > { %v6652_v27 = vmax.f32 %v6578_v47, 0.0  ;;  %v6699_v59 = vpack.c.bf16 %v6651_v24, %v6635_v50 }
0x2a26   : > { %v6654_v4 = vmax.f32 %v6621_v25, 0.0  ;;  %v6701_v30 = vpack.c.bf16 %v6653_v21, %v6637_v51 }
0x2a27   : > { %v6700_v31 = vpack.c.bf16 %v6652_v27, %v6636_v3 }
0x2a28   : > { %v6702_v29 = vpack.c.bf16 %v6654_v4, %v6638_v48 }
0x2a29   : > { %7148 = vmatprep.mubr.bf16.mxu0 %v6700_v31 }
0x2a2a   : > { %7189 = vmatprep.mubr.bf16.mxu1 %v6702_v29  ;;  %7149 = vmatmul.mubr.bf16.vlgmr.msra.gmra.mxu0 %v6699_v59 }
0x2a2b   : > { %7190 = vmatmul.mubr.bf16.vlgmr.msra.gmra.mxu1 %v6701_v30 }
0x2a2c   : > { %v6904_v33 = vpop.f32.mrf.mxu0 }
0x2a2d   : > { %v6905_v10 = vadd.f32 %v7806_v22, %v6904_v33  ;;  %v6945_v41 = vpop.f32.mrf.mxu1 }
0x2a2e   : > { %v6906_v34 = vpop.f32.mrf.mxu0 }
0x2a2f   : > { %v6946_v14 = vadd.f32 %v6945_v41, %v6905_v10  ;;  %v6947_v23 = vpop.f32.mrf.mxu1 }
0x2a30   : > { %v6907_v55 = vpop.f32.mrf.mxu0  ;;  %v7839_v23 = vld [vmem:[%s936_s25] ss:$0 sm:$0xff] }
0x2a31   : > { %v6908_v19 = vadd.f32 %v7806_v22, %v6907_v55  ;;  %v6948_v36 = vpop.f32.mrf.mxu1 }
0x2a32   : > { %v6909_v18 = vpop.f32.mrf.mxu0 }
0x2a33   : > { %v6949_v38 = vadd.f32 %v6948_v36, %v6908_v19  ;;  %v6950_v39 = vpop.f32.mrf.mxu1  ;;  %v7840_v19 = vld [vmem:[%s10333_s3] ss:$0 sm:$0xff] }
0x2a6a   : > { %v6986_v7 = vpop.f32.mrf.mxu0  ;;  %v7027_v42 = vpop.f32.mrf.mxu1 }
0x2a6b   : > { %v6987_v44 = vadd.f32 %v6986_v7, %v6946_v14 }
0x2a6c   : > { %v6988_v45 = vpop.f32.mrf.mxu0  ;;  %v7029_v49 = vpop.f32.mrf.mxu1 }
0x2a6d   : > { %v7028_v8 = vadd.f32 %v7027_v42, %v6987_v44 }
0x2a6e   : > { %v6989_v58 = vpop.f32.mrf.mxu0  ;;  %v7030_v57 = vpop.f32.mrf.mxu1 }
0x2a6f   : > { %v6990_v46 = vadd.f32 %v6989_v58, %v6949_v38 }
0x2a70   : > { %v6991_v53 = vpop.f32.mrf.mxu0  ;;  %v7032_v54 = vpop.f32.mrf.mxu1 }
0x2a71   : > { %v7031_v13 = vadd.f32 %v7030_v57, %v6990_v46 }
0x2aaa   : > { %v7068_v35 = vpop.f32.mrf.mxu0 }
0x2aab   : > { %v7109_v56 = vpop.f32.mrf.mxu1  ;;  %v7069_v20 = vadd.f32 %v7068_v35, %v7028_v8 }
0x2aac   : > { %v7070_v60 = vpop.f32.mrf.mxu0 }
0x2aad   : > { %v7111_v62 = vpop.f32.mrf.mxu1  ;;  %v7110_v5 = vadd.f32 %v7109_v56, %v7069_v20 }
0x2aae   : > { %v7071_v63 = vpop.f32.mrf.mxu0 }
0x2aaf   : > { %v7112_v0 = vpop.f32.mrf.mxu1  ;;  %v7072_v6 = vadd.f32 %v7071_v63, %v7031_v13 }
0x2ab0   : > { %v7073_v1 = vpop.f32.mrf.mxu0 }
0x2ab1   : > { %v7114_v2 = vpop.f32.mrf.mxu1  ;;  %v7113_v37 = vadd.f32 %v7112_v0, %v7072_v6 }
0x2aea   : > { %v7150_v9 = vpop.f32.mrf.mxu0 }
0x2aeb   : > { %v7151_v11 = vadd.f32 %v7150_v9, %v7110_v5  ;;  %v7191_v12 = vpop.f32.mrf.mxu1 }
0x2aec   : > { %v7152_v40 = vpop.f32.mrf.mxu0 }
0x2aed   : > { %v7192_v28 = vadd.f32 %v7191_v12, %v7151_v11  ;;  %v7193_v15 = vpop.f32.mrf.mxu1 }
0x2aee   : > { %v7153_v16 = vpop.f32.mrf.mxu0 }
0x2aef   : > { %v7198_v52 = vadd.f32 %v7192_v28, %v9893_v61  ;;  %v7154_v32 = vadd.f32 %v7153_v16, %v7113_v37  ;;  %v7194_v17 = vpop.f32.mrf.mxu1 }
0x2af0   : > { %v7155_v47 = vpop.f32.mrf.mxu0 }
0x2af1   : > { %v7195_v26 = vadd.f32 %v7194_v17, %v7154_v32  ;;  %v7196_v24 = vpop.f32.mrf.mxu1  ;;  %v7200_v25 = vsel %vm1002_vm1, %v7198_v52, 0.0 }
0x2af2   : > { %7201 = vadd.xlane.f32.xlu0 %v7200_v25 }
0x2af3   : > { %v7199_v3 = vadd.f32 %v7195_v26, %v9895_v43 }
0x2af5   : > { %v7203_v21 = vsel %vm1002_vm1, %v7199_v3, 0.0 }
0x2af6   : > { %7204 = vadd.xlane.f32.xlu1 %v7203_v21 }
0x2b7b   : > { %v7202_v27 = vpop.xlane.xlu0 %7201 }
0x2b7c   : > { %v7206_v50 = vmul.f32 0.03125, %v7202_v27 }
0x2b7e   : > { %v7208_v48 = vsub.f32 %v7198_v52, %v7206_v50 }
0x2b7f   : > { %v7205_v4 = vpop.xlane.xlu1 %7204 }
0x2b80   : > { %v7207_v51 = vmul.f32 0.03125, %v7205_v4  ;;  %v7210_v31 = vmul.f32 %v7208_v48, %v7208_v48 }
0x2b82   : > { %v7209_v61 = vsub.f32 %v7199_v3, %v7207_v51  ;;  %v7212_v59 = vsel %vm1002_vm1, %v7210_v31, 0.0 }
0x2b83   : > { %7213 = vadd.xlane.f32.xlu0 %v7212_v59 }
0x2b84   : > { %v7211_v29 = vmul.f32 %v7209_v61, %v7209_v61 }
0x2b86   : > { %v7215_v30 = vsel %vm1002_vm1, %v7211_v29, 0.0 }
0x2b87   : > { %7216 = vadd.xlane.f32.xlu1 %v7215_v30 }
0x2c0c   : > { %v7214_v43 = vpop.xlane.xlu0 %7213 }
0x2c0d   : > { %v7218_v22 = vmul.f32 0.03125, %v7214_v43 }
0x2c0f   : > { %v7220_v33 = vadd.f32 1e-05, %v7218_v22 }
0x2c10   : > { %v7217_v10 = vpop.xlane.xlu1 %7216 }
0x2c11   : > { %8835 = vrsqrt.f32 %v7220_v33  ;;  %v7219_v41 = vmul.f32 0.03125, %v7217_v10 }
0x2c13   : > { %v7221_v34 = vadd.f32 1e-05, %v7219_v41 }
0x2c15   : > { %8837 = vrsqrt.f32 %v7221_v34 }
0x2c1e   : > { %v8836_v14 = vpop.eup %8835 }
0x2c1f   : > { %v7224_v55 = vmul.f32 %v8836_v14, %v7208_v48 }
0x2c21   : > { %v7233_v36 = vmul.f32 %v7839_v23, %v7224_v55 }
0x2c22   : > { %v8838_v18 = vpop.eup %8837 }
0x2c23   : > { %v7242_v38 = vadd.f32 %v7840_v19, %v7233_v36  ;;  %v7225_v39 = vmul.f32 %v8838_v18, %v7209_v61 }
0x2c25   : > { %7244 = vst.msk [vmem:[#allocation2] sm:$0xff] %vm1002_vm1, %v7242_v38  ;;  %v7234_v7 = vmul.f32 %v7839_v23, %v7225_v39  ;;  %7249 = sbr.rel (%p7841_p5) target bundleno = 11539 (0x2d13), region = 116 }
0x2c27   : > { %v7243_v42 = vadd.f32 %v7840_v19, %v7234_v7 }
0x2c29   : > { %7245 = vst.msk [vmem:[#allocation2 + $0x8] sm:$0xff] %vm1002_vm1, %v7243_v42 }
0x2c2a   : > { %v8841_v44 = vld [vmem:[%s10335_s12 + $0x18] sm:$0xff]   ;;  %v8866_v45 = vmov 0.0   ;;  %vm8867_vm6 = vmmov 0   ;;  %v8842_v8 = vld [vmem:[%s10335_s12 + $0x10] sm:$0xff]   ;;  %v8843_v57 = vld [vmem:[%s10335_s12 + $0x8] sm:$0xff]   ;;  %v7258_v13 = vpack.c.bf16 %v7243_v42, %v7242_v38  ;;  %vm7342_vm7 = vcmask 523264  }
0x2c2b   : > { %8519 = vmatprep.subr.bf16.mxu0 %v8866_v45  ;;  %v7299_v49 = vsel %vm1002_vm1, %v8841_v44, 0  ;;  %8527 = vmatprep.mubr.msk.bf16.mxu0 %vm8867_vm6, %v8866_v45  ;;  %v7296_v58 = vsel %vm1002_vm1, %v8842_v8, 0  ;;  %v7293_v46 = vsel %vm1002_vm1, %v8843_v57, 0  ;;  %v8844_v53 = vld [vmem:[%s10335_s12] sm:$0xff]  }
0x2c2c   : > { %8520 = vmatpush3.bf16.xpose.msra.mxu0 %v7299_v49  ;;  %v7290_v54 = vsel %vm1002_vm1, %v8844_v53, 0  ;;  %v7842_v35 = vld [vmem:[%s10336_s10] ss:$0 sm:$0xff] }
0x2c2d   : > { %8521 = vmatprep.subr.bf16.mxu0 %v8866_v45 }
0x2c34   : > { %8522 = vmatpush3.bf16.xpose.msra.mxu0 %v7296_v58 }
0x2c35   : > { %8523 = vmatprep.subr.bf16.mxu0 %v8866_v45 }
0x2c3c   : > { %8524 = vmatpush3.bf16.xpose.msra.mxu0 %v7293_v46 }
0x2c3d   : > { %8525 = vmatprep.subr.bf16.mxu0 %v8866_v45 }
0x2c44   : > { %8526 = vmatpush3.bf16.xpose.msra.mxu0 %v7290_v54 }
0x2c4b   : > { %8528 = vmatmul.mubr.msk.bf16.vlgmr.msra.gmra.mxu0 %vm1002_vm1, %v7258_v13 }
0x2d0b   : > { %v7335_v56 = vpop.f32.mrf.mxu0 }
0x2d0c   : > { %v7336_v60 = vadd.f32 %v7842_v35, %v7335_v56 }
0x2d0d   : > { %v8529_v62 = vpop.f32.mrf.mxu0 }
0x2d0e   : > { %7343 = vst.msk [vmem:[%s10337_s27] sm:$0xff] %vm7342_vm7, %v7336_v60 }
0x2d0f   : > { %v7338_v63 = vpop.f32.mrf.mxu0 }
0x2d10   : > { %v7339_v0 = vadd.f32 %v7842_v35, %v7338_v63 }
0x2d11   : > { %v8530_v1 = vpop.f32.mrf.mxu0 }
0x2d12   : > { %7344 = vst.msk [vmem:[%s10337_s27 + $0x8] sm:$0xff] %vm7342_vm7, %v7339_v0 }
0x2d13 PF: > { %s10338_s2 = sld [smem:[#allocation4_spill]] }
0x2d19   : > { %s32_s3 = sadd.s32 1, %s10338_s2  }
0x2d1a   : > { %p29_p6 = scmp.ge.s32.totalorder %s32_s3, 4  }
0x2d1c   :  { %31 = sbr.rel (!%p29_p6) target bundleno = 16 (0x10), region = 194 }

</bundles_post_ra>
